<compile_context>
chip_gen: v7x
topology: tpu7x:2x2x1
jax: 0.10.0
libtpu: 0.0.40
codegen_flags: <defaults>
</compile_context>

<pallas_src>
import functools

import jax
import jax.numpy as jnp
from jax.experimental import pallas as pl
from jax.experimental.pallas import tpu as pltpu


CFG = dict(vocab=100, hidden=256, layers=2, heads=2, inter=1024,
           max_pos=16, type_vocab=2, n_classes=3, ln_eps=1e-12)

_TRANS_B = (((1,), (1,)), ((), ()))   # contract dim 1 of both operands (q @ k^T)


# ----------------------------- in-kernel helpers -----------------------------

def _gelu(x):
    # tanh-approx GELU (HF BERT uses erf-GELU; numerically ~1e-3 close)
    c = 0.7978845608028654  # sqrt(2/pi)
    return 0.5 * x * (1.0 + jnp.tanh(c * (x + 0.044715 * x * x * x)))


def _layernorm(x, g, b, eps):
    mu = jnp.mean(x, axis=-1, keepdims=True)
    d = x - mu
    var = jnp.mean(d * d, axis=-1, keepdims=True)
    return d * jax.lax.rsqrt(var + eps) * g + b


# ------------------------------- fused kernel -------------------------------

def _bert_fused_kernel(x_ref, am_ref,
                       embg_ref, embb_ref,
                       qkvw_ref, qkvb_ref, wo_ref, bo_ref,
                       ln1g_ref, ln1b_ref,
                       w1_ref, b1_ref, w2_ref, b2_ref,
                       ln2g_ref, ln2b_ref,
                       pw_ref, pb_ref, fw_ref, fb_ref,
                       o_ref, *, L, S, H, nH, Dh, eps):
    """Embedding-LN -> L encoder layers -> pooler -> classifier for one batch element."""
    # --- embedding LayerNorm (embedding dropout p=0.1: identity at inference) ---
    x = _layernorm(x_ref[...], embg_ref[...], embb_ref[...], eps)         # (S, H) f32

    # additive attention mask built in-kernel from the raw 0/1 mask row
    add_mask = (1.0 - am_ref[0]) * (-1e9)                                 # (1, S)
    scale = 1.0 / float(Dh) ** 0.5

    for l in range(L):                                                    # static unroll
        # ---- fused QKV projection: one bf16 MXU pass -> (S, 3H) f32 ----
        qkv = jnp.dot(x.astype(jnp.bfloat16), qkvw_ref[l],
                      preferred_element_type=jnp.float32) + qkvb_ref[l]

        # ---- per-head attention (128-aligned static column slices) ----
        ctx_heads = []
        for h in range(nH):
            q = (qkv[:, h * Dh:(h + 1) * Dh] * scale).astype(jnp.bfloat16)          # (S,Dh)
            k = qkv[:, H + h * Dh:H + (h + 1) * Dh].astype(jnp.bfloat16)            # (S,Dh)
            v = qkv[:, 2 * H + h * Dh:2 * H + (h + 1) * Dh].astype(jnp.bfloat16)    # (S,Dh)

            s = jax.lax.dot_general(q, k, _TRANS_B,
                                    preferred_element_type=jnp.float32)             # (S,S)
            s = s + add_mask
            m = jnp.max(s, axis=-1, keepdims=True)
            p = jnp.exp(s - m)
            p = p * pl.reciprocal(jnp.sum(p, axis=-1, keepdims=True), approx=True)

            ctx_heads.append(jnp.dot(p.astype(jnp.bfloat16), v,
                                     preferred_element_type=jnp.float32))           # (S,Dh)

        # merge heads (lane-aligned concat) + single output-projection MXU pass
        ctx = jnp.concatenate(ctx_heads, axis=-1)                                   # (S,H)
        attn = jnp.dot(ctx.astype(jnp.bfloat16), wo_ref[l],
                       preferred_element_type=jnp.float32)                          # (S,H)

        # attention-output dropout (p=0.1): identity at inference
        x = _layernorm(attn + bo_ref[l] + x, ln1g_ref[l], ln1b_ref[l], eps)

        # ---- FFN: gelu(x @ w1 + b1) @ w2 + b2, residual + LayerNorm ----
        hmid = _gelu(jnp.dot(x.astype(jnp.bfloat16), w1_ref[l],
                             preferred_element_type=jnp.float32) + b1_ref[l])
        ffn = jnp.dot(hmid.astype(jnp.bfloat16), w2_ref[l],
                      preferred_element_type=jnp.float32) + b2_ref[l]
        x = _layernorm(ffn + x, ln2g_ref[l], ln2b_ref[l], eps)

    # --- pooler: tanh(W_p * h_[CLS] + b_p); classifier-head dropout = identity ---
    # TODO(synk): training-mode dropout (pltpu.prng_seed/prng_random_bits + 1/(1-p)) not implemented.
    cls = x[0:1, :]                                                                 # (1,H)
    pooled = jnp.tanh(jnp.dot(cls.astype(jnp.bfloat16), pw_ref[...],
                              preferred_element_type=jnp.float32) + pb_ref[...])
    o_ref[0] = jnp.dot(pooled.astype(jnp.bfloat16), fw_ref[...],
                       preferred_element_type=jnp.float32) + fb_ref[...]            # (1,C)


def bert_sentiment_forward(fp, input_ids, attention_mask, cfg):
    B, S = input_ids.shape
    H, nH, I, L = cfg["hidden"], cfg["heads"], cfg["inter"], cfg["layers"]
    C, eps = cfg["n_classes"], cfg["ln_eps"]
    Dh = H // nH

    # --- BERT embeddings: gathers are XLA glue; LN + everything else is in-kernel ---
    we = fp["word_emb"][input_ids]                        # (B,S,H)
    pe = fp["pos_emb"][jnp.arange(S)][None, :, :]         # (1,S,H)
    te = fp["type_emb"][0][None, None, :]                 # (1,1,H)  token_type_ids = 0
    x = (we + pe + te).reshape(B * S, H).astype(jnp.float32)
    mask_b1s = attention_mask.astype(jnp.float32).reshape(B, 1, S)

    kernel = functools.partial(_bert_fused_kernel,
                               L=L, S=S, H=H, nH=nH, Dh=Dh, eps=eps)

    def fixed2(shape):
        return pl.BlockSpec(shape, lambda b: (0, 0))       # whole-array 2-D weight block

    def fixed3(shape):
        return pl.BlockSpec(shape, lambda b: (0, 0, 0))    # whole-array stacked weight block

    grid_spec = pltpu.PrefetchScalarGridSpec(
        num_scalar_prefetch=0,
        grid=(B,),                                          # one batch element per step
        in_specs=[
            pl.BlockSpec((S, H), lambda b: (b, 0)),         # embedding rows of batch b
            pl.BlockSpec((1, 1, S), lambda b: (b, 0, 0)),   # raw 0/1 mask row of batch b
            fixed2((1, H)), fixed2((1, H)),                 # embedding LN
            fixed3((L, H, 3 * H)), fixed3((L, 1, 3 * H)),   # fused QKV (stacked over layers)
            fixed3((L, H, H)), fixed3((L, 1, H)),           # attention output proj
            fixed3((L, 1, H)), fixed3((L, 1, H)),           # LN1
            fixed3((L, H, I)), fixed3((L, 1, I)),           # FFN up
            fixed3((L, I, H)), fixed3((L, 1, H)),           # FFN down
            fixed3((L, 1, H)), fixed3((L, 1, H)),           # LN2
            fixed2((H, H)), fixed2((1, H)),                 # pooler
            fixed2((H, C)), fixed2((1, C)),                 # classifier
        ],
        out_specs=pl.BlockSpec((1, 1, C), lambda b: (b, 0, 0)),
    )

    logits = pl.pallas_call(
        kernel,
        out_shape=jax.ShapeDtypeStruct((B, 1, C), jnp.float32),
        grid_spec=grid_spec,
        compiler_params=pltpu.CompilerParams(
            dimension_semantics=("parallel",),              # shard batch over TensorCores
            vmem_limit_bytes=32 * 1024 * 1024),             # fits v5e/v6e/v7x budgets
    )(x, mask_b1s,
      fp["emb_ln_g"], fp["emb_ln_b"],
      fp["qkv_w"], fp["qkv_b"], fp["wo"], fp["bo"],
      fp["ln1_g"], fp["ln1_b"],
      fp["w1"], fp["b1"], fp["w2"], fp["b2"],
      fp["ln2_g"], fp["ln2_b"],
      fp["pool_w"], fp["pool_b"], fp["fc_w"], fp["fc_b"])
    return logits.reshape(B, C)


# --------------------------- model construction ---------------------------

def init_params(key, cfg):
    H, I = cfg["hidden"], cfg["inter"]
    keys = iter(jax.random.split(key, 256))

    def nrm(shape, scale=0.02):
        return scale * jax.random.normal(next(keys), shape, jnp.float32)

    params = {
        "word_emb": nrm((cfg["vocab"], H)),
        "pos_emb": nrm((cfg["max_pos"], H)),
        "type_emb": nrm((cfg["type_vocab"], H)),
        "emb_ln_g": jnp.ones((H,), jnp.float32),
        "emb_ln_b": jnp.zeros((H,), jnp.float32),
        "layers": [],
        "pool_w": nrm((H, H)), "pool_b": jnp.zeros((H,), jnp.float32),
        "fc_w": nrm((H, cfg["n_classes"])),
        "fc_b": jnp.zeros((cfg["n_classes"],), jnp.float32),
    }
    for _ in range(cfg["layers"]):
        params["layers"].append({
            "wq": nrm((H, H)), "bq": jnp.zeros((H,), jnp.float32),
            "wk": nrm((H, H)), "bk": jnp.zeros((H,), jnp.float32),
            "wv": nrm((H, H)), "bv": jnp.zeros((H,), jnp.float32),
            "wo": nrm((H, H)), "bo": jnp.zeros((H,), jnp.float32),
            "ln1_g": jnp.ones((H,), jnp.float32), "ln1_b": jnp.zeros((H,), jnp.float32),
            "w1": nrm((H, I)), "b1": jnp.zeros((I,), jnp.float32),
            "w2": nrm((I, H)), "b2": jnp.zeros((H,), jnp.float32),
            "ln2_g": jnp.ones((H,), jnp.float32), "ln2_b": jnp.zeros((H,), jnp.float32),
        })
    return params


def prepare_params(params, cfg):
    """One-time kernel-friendly repack: layer-stacked, fused bf16 QKV, (1,N) biases."""
    H, I, C = cfg["hidden"], cfg["inter"], cfg["n_classes"]
    layers = params["layers"]
    L = len(layers)

    def stack(name):
        return jnp.stack([lyr[name] for lyr in layers])

    fast = {
        "word_emb": params["word_emb"],
        "pos_emb": params["pos_emb"],
        "type_emb": params["type_emb"],
        "emb_ln_g": params["emb_ln_g"].reshape(1, H),
        "emb_ln_b": params["emb_ln_b"].reshape(1, H),
        "qkv_w": jnp.stack([jnp.concatenate([l["wq"], l["wk"], l["wv"]], axis=1)
                            for l in layers]).astype(jnp.bfloat16),        # (L,H,3H)
        "qkv_b": jnp.stack([jnp.concatenate([l["bq"], l["bk"], l["bv"]])
                            for l in layers]).reshape(L, 1, 3 * H),        # (L,1,3H)
        "wo": stack("wo").astype(jnp.bfloat16),                            # (L,H,H)
        "bo": stack("bo").reshape(L, 1, H),
        "ln1_g": stack("ln1_g").reshape(L, 1, H),
        "ln1_b": stack("ln1_b").reshape(L, 1, H),
        "w1": stack("w1").astype(jnp.bfloat16),                            # (L,H,I)
        "b1": stack("b1").reshape(L, 1, I),
        "w2": stack("w2").astype(jnp.bfloat16),                            # (L,I,H)
        "b2": stack("b2").reshape(L, 1, H),
        "ln2_g": stack("ln2_g").reshape(L, 1, H),
        "ln2_b": stack("ln2_b").reshape(L, 1, H),
        "pool_w": params["pool_w"].astype(jnp.bfloat16),
        "pool_b": params["pool_b"].reshape(1, H),
        "fc_w": params["fc_w"].astype(jnp.bfloat16),
        "fc_b": params["fc_b"].reshape(1, C),
    }
    return fast


# ---------------------------------- main -----------------------------------

if __name__ == "__main__":
    key = jax.random.PRNGKey(0)
    pkey, ikey = jax.random.split(key)

    params = init_params(pkey, CFG)
    fp = prepare_params(params, CFG)

    B, S = 2, 8
    input_ids = jax.random.randint(ikey, (B, S), 0, CFG["vocab"], dtype=jnp.int32)
    attention_mask = jnp.array(
        [[1, 1, 1, 1, 1, 1, 1, 1],
         [1, 1, 1, 1, 1, 0, 0, 0]], dtype=jnp.int32)

    fwd = jax.jit(functools.partial(bert_sentiment_forward, cfg=CFG))
    logits = jax.block_until_ready(fwd(fp, input_ids, attention_mask))

    assert logits.shape == (B, CFG["n_classes"])
    assert bool(jnp.all(jnp.isfinite(logits)))
    print("KERNEL_OK")
</pallas_src>

<mosaic_0001>
module attributes {stable_mosaic.version = 11 : i64} {
  func.func @_bert_fused_kernel(%arg0: i32, %arg1: memref<8x256xf32, #tpu.memory_space<vmem>>, %arg2: memref<1x1x8xf32, #tpu.memory_space<vmem>>, %arg3: memref<1x256xf32, #tpu.memory_space<vmem>>, %arg4: memref<1x256xf32, #tpu.memory_space<vmem>>, %arg5: memref<2x256x768xbf16, #tpu.memory_space<vmem>>, %arg6: memref<2x1x768xf32, #tpu.memory_space<vmem>>, %arg7: memref<2x256x256xbf16, #tpu.memory_space<vmem>>, %arg8: memref<2x1x256xf32, #tpu.memory_space<vmem>>, %arg9: memref<2x1x256xf32, #tpu.memory_space<vmem>>, %arg10: memref<2x1x256xf32, #tpu.memory_space<vmem>>, %arg11: memref<2x256x1024xbf16, #tpu.memory_space<vmem>>, %arg12: memref<2x1x1024xf32, #tpu.memory_space<vmem>>, %arg13: memref<2x1024x256xbf16, #tpu.memory_space<vmem>>, %arg14: memref<2x1x256xf32, #tpu.memory_space<vmem>>, %arg15: memref<2x1x256xf32, #tpu.memory_space<vmem>>, %arg16: memref<2x1x256xf32, #tpu.memory_space<vmem>>, %arg17: memref<256x256xbf16, #tpu.memory_space<vmem>>, %arg18: memref<1x256xf32, #tpu.memory_space<vmem>>, %arg19: memref<256x3xbf16, #tpu.memory_space<vmem>>, %arg20: memref<1x3xf32, #tpu.memory_space<vmem>>, %arg21: memref<1x1x3xf32, #tpu.memory_space<vmem>>) attributes {dimension_semantics = [#tpu.dimension_semantics<parallel>], iteration_bounds = array<i64: 2>, scalar_prefetch = 0 : i64, scratch_operands = 0 : i64, tpu.core_type = #tpu.core_type<tc>, window_params = [{transform_indices = @transform_0, window_bounds = array<i64: 8, 256>}, {transform_indices = @transform_1, window_bounds = array<i64: 1, 1, 8>}, {pipeline_mode = #tpu.pipeline_mode<synchronous>, transform_indices = @transform_2, window_bounds = array<i64: 1, 256>}, {pipeline_mode = #tpu.pipeline_mode<synchronous>, transform_indices = @transform_3, window_bounds = array<i64: 1, 256>}, {pipeline_mode = #tpu.pipeline_mode<synchronous>, transform_indices = @transform_4, window_bounds = array<i64: 2, 256, 768>}, {pipeline_mode = #tpu.pipeline_mode<synchronous>, transform_indices = @transform_5, window_bounds = array<i64: 2, 1, 768>}, {pipeline_mode = #tpu.pipeline_mode<synchronous>, transform_indices = @transform_6, window_bounds = array<i64: 2, 256, 256>}, {pipeline_mode = #tpu.pipeline_mode<synchronous>, transform_indices = @transform_7, window_bounds = array<i64: 2, 1, 256>}, {pipeline_mode = #tpu.pipeline_mode<synchronous>, transform_indices = @transform_8, window_bounds = array<i64: 2, 1, 256>}, {pipeline_mode = #tpu.pipeline_mode<synchronous>, transform_indices = @transform_9, window_bounds = array<i64: 2, 1, 256>}, {pipeline_mode = #tpu.pipeline_mode<synchronous>, transform_indices = @transform_10, window_bounds = array<i64: 2, 256, 1024>}, {pipeline_mode = #tpu.pipeline_mode<synchronous>, transform_indices = @transform_11, window_bounds = array<i64: 2, 1, 1024>}, {pipeline_mode = #tpu.pipeline_mode<synchronous>, transform_indices = @transform_12, window_bounds = array<i64: 2, 1024, 256>}, {pipeline_mode = #tpu.pipeline_mode<synchronous>, transform_indices = @transform_13, window_bounds = array<i64: 2, 1, 256>}, {pipeline_mode = #tpu.pipeline_mode<synchronous>, transform_indices = @transform_14, window_bounds = array<i64: 2, 1, 256>}, {pipeline_mode = #tpu.pipeline_mode<synchronous>, transform_indices = @transform_15, window_bounds = array<i64: 2, 1, 256>}, {pipeline_mode = #tpu.pipeline_mode<synchronous>, transform_indices = @transform_16, window_bounds = array<i64: 256, 256>}, {pipeline_mode = #tpu.pipeline_mode<synchronous>, transform_indices = @transform_17, window_bounds = array<i64: 1, 256>}, {pipeline_mode = #tpu.pipeline_mode<synchronous>, transform_indices = @transform_18, window_bounds = array<i64: 256, 3>}, {pipeline_mode = #tpu.pipeline_mode<synchronous>, transform_indices = @transform_19, window_bounds = array<i64: 1, 3>}, {transform_indices = @transform_20, window_bounds = array<i64: 1, 1, 3>}]} {
    %c0 = arith.constant 0 : index
    %c0_0 = arith.constant 0 : index
    %0 = vector.load %arg1[%c0, %c0_0] : memref<8x256xf32, #tpu.memory_space<vmem>>, vector<8x256xf32>
    %c0_1 = arith.constant 0 : index
    %c0_2 = arith.constant 0 : index
    %1 = vector.load %arg3[%c0_1, %c0_2] : memref<1x256xf32, #tpu.memory_space<vmem>>, vector<1x256xf32>
    %c0_3 = arith.constant 0 : index
    %c0_4 = arith.constant 0 : index
    %2 = vector.load %arg4[%c0_3, %c0_4] : memref<1x256xf32, #tpu.memory_space<vmem>>, vector<1x256xf32>
    %cst = arith.constant dense<0.000000e+00> : vector<8xf32>
    %3 = vector.multi_reduction <add>, %0, %cst [1] : vector<8x256xf32> to vector<8xf32>
    %4 = vector.shape_cast %3 : vector<8xf32> to vector<8x1xf32>
    %cst_5 = arith.constant 2.560000e+02 : f32
    %5 = vector.broadcast %cst_5 : f32 to vector<8x1xf32>
    %6 = arith.divf %4, %5 : vector<8x1xf32>
    %7 = vector.broadcast %6 : vector<8x1xf32> to vector<8x256xf32>
    %8 = arith.subf %0, %7 : vector<8x256xf32>
    %9 = arith.mulf %8, %8 : vector<8x256xf32>
    %cst_6 = arith.constant dense<0.000000e+00> : vector<8xf32>
    %10 = vector.multi_reduction <add>, %9, %cst_6 [1] : vector<8x256xf32> to vector<8xf32>
    %11 = vector.shape_cast %10 : vector<8xf32> to vector<8x1xf32>
    %cst_7 = arith.constant 2.560000e+02 : f32
    %12 = vector.broadcast %cst_7 : f32 to vector<8x1xf32>
    %13 = arith.divf %11, %12 : vector<8x1xf32>
    %cst_8 = arith.constant 9.99999996E-13 : f32
    %14 = vector.broadcast %cst_8 : f32 to vector<8x1xf32>
    %15 = arith.addf %13, %14 : vector<8x1xf32>
    %16 = math.rsqrt %15 : vector<8x1xf32>
    %17 = vector.broadcast %16 : vector<8x1xf32> to vector<8x256xf32>
    %18 = arith.mulf %8, %17 : vector<8x256xf32>
    %19 = vector.broadcast %1 : vector<1x256xf32> to vector<8x256xf32>
    %20 = arith.mulf %18, %19 : vector<8x256xf32>
    %21 = vector.broadcast %2 : vector<1x256xf32> to vector<8x256xf32>
    %22 = arith.addf %20, %21 : vector<8x256xf32>
    %c0_9 = arith.constant 0 : index
    %c0_10 = arith.constant 0 : index
    %c0_11 = arith.constant 0 : index
    %23 = vector.load %arg2[%c0_9, %c0_10, %c0_11] : memref<1x1x8xf32, #tpu.memory_space<vmem>>, vector<1x1x8xf32>
    %24 = vector.shape_cast %23 : vector<1x1x8xf32> to vector<1x8xf32>
    %cst_12 = arith.constant 1.000000e+00 : f32
    %25 = vector.broadcast %cst_12 : f32 to vector<1x8xf32>
    %26 = arith.subf %25, %24 : vector<1x8xf32>
    %cst_13 = arith.constant -1.000000e+09 : f32
    %27 = vector.broadcast %cst_13 : f32 to vector<1x8xf32>
    %28 = arith.mulf %26, %27 : vector<1x8xf32>
    %29 = arith.truncf %22 : vector<8x256xf32> to vector<8x256xbf16>
    %c0_14 = arith.constant 0 : index
    %c0_15 = arith.constant 0 : index
    %c0_16 = arith.constant 0 : index
    %30 = vector.load %arg5[%c0_14, %c0_15, %c0_16] : memref<2x256x768xbf16, #tpu.memory_space<vmem>>, vector<1x256x768xbf16>
    %31 = vector.shape_cast %30 : vector<1x256x768xbf16> to vector<256x768xbf16>
    %cst_17 = arith.constant dense<0.000000e+00> : vector<8x768xf32>
    %32 = tpu.matmul %29, %31, %cst_17 {dimension_numbers = #tpu.dot_dimension_numbers<[1], [0], [0], [1], [0, 0, 1, 1], [], []>} : vector<8x256xbf16>, vector<256x768xbf16>, vector<8x768xf32> -> vector<8x768xf32>
    %c0_18 = arith.constant 0 : index
    %c0_19 = arith.constant 0 : index
    %c0_20 = arith.constant 0 : index
    %33 = vector.load %arg6[%c0_18, %c0_19, %c0_20] : memref<2x1x768xf32, #tpu.memory_space<vmem>>, vector<1x1x768xf32>
    %34 = vector.shape_cast %33 : vector<1x1x768xf32> to vector<1x768xf32>
    %35 = vector.broadcast %34 : vector<1x768xf32> to vector<8x768xf32>
    %36 = arith.addf %32, %35 : vector<8x768xf32>
    %37 = vector.extract_strided_slice %36 {offsets = [0, 0], sizes = [8, 128], strides = [1, 1]} : vector<8x768xf32> to vector<8x128xf32>
    %cst_21 = arith.constant 0.0883883461 : f32
    %38 = vector.broadcast %cst_21 : f32 to vector<8x128xf32>
    %39 = arith.mulf %37, %38 : vector<8x128xf32>
    %40 = arith.truncf %39 : vector<8x128xf32> to vector<8x128xbf16>
    %41 = vector.extract_strided_slice %36 {offsets = [0, 256], sizes = [8, 128], strides = [1, 1]} : vector<8x768xf32> to vector<8x128xf32>
    %42 = arith.truncf %41 : vector<8x128xf32> to vector<8x128xbf16>
    %43 = vector.extract_strided_slice %36 {offsets = [0, 512], sizes = [8, 128], strides = [1, 1]} : vector<8x768xf32> to vector<8x128xf32>
    %44 = arith.truncf %43 : vector<8x128xf32> to vector<8x128xbf16>
    %cst_22 = arith.constant dense<0.000000e+00> : vector<8x8xf32>
    %45 = tpu.matmul %40, %42, %cst_22 {dimension_numbers = #tpu.dot_dimension_numbers<[1], [1], [0], [0], [0, 0, 1, 0], [], []>} : vector<8x128xbf16>, vector<8x128xbf16>, vector<8x8xf32> -> vector<8x8xf32>
    %46 = vector.broadcast %28 : vector<1x8xf32> to vector<8x8xf32>
    %47 = arith.addf %45, %46 : vector<8x8xf32>
    %cst_23 = arith.constant dense<0xFF800000> : vector<8xf32>
    %48 = vector.multi_reduction <maximumf>, %47, %cst_23 [1] : vector<8x8xf32> to vector<8xf32>
    %49 = vector.shape_cast %48 : vector<8xf32> to vector<8x1xf32>
    %50 = vector.broadcast %49 : vector<8x1xf32> to vector<8x8xf32>
    %51 = arith.subf %47, %50 : vector<8x8xf32>
    %52 = math.exp %51 : vector<8x8xf32>
    %cst_24 = arith.constant dense<0.000000e+00> : vector<8xf32>
    %53 = vector.multi_reduction <add>, %52, %cst_24 [1] : vector<8x8xf32> to vector<8xf32>
    %54 = vector.shape_cast %53 : vector<8xf32> to vector<8x1xf32>
    %55 = tpu.reciprocal %54 {approx = true} : vector<8x1xf32> -> vector<8x1xf32>
    %56 = vector.broadcast %55 : vector<8x1xf32> to vector<8x8xf32>
    %57 = arith.mulf %52, %56 : vector<8x8xf32>
    %58 = arith.truncf %57 : vector<8x8xf32> to vector<8x8xbf16>
    %cst_25 = arith.constant dense<0.000000e+00> : vector<8x128xf32>
    %59 = tpu.matmul %58, %44, %cst_25 {dimension_numbers = #tpu.dot_dimension_numbers<[1], [0], [0], [1], [0, 0, 1, 1], [], []>} : vector<8x8xbf16>, vector<8x128xbf16>, vector<8x128xf32> -> vector<8x128xf32>
    %60 = vector.extract_strided_slice %36 {offsets = [0, 128], sizes = [8, 128], strides = [1, 1]} : vector<8x768xf32> to vector<8x128xf32>
    %cst_26 = arith.constant 0.0883883461 : f32
    %61 = vector.broadcast %cst_26 : f32 to vector<8x128xf32>
    %62 = arith.mulf %60, %61 : vector<8x128xf32>
    %63 = arith.truncf %62 : vector<8x128xf32> to vector<8x128xbf16>
    %64 = vector.extract_strided_slice %36 {offsets = [0, 384], sizes = [8, 128], strides = [1, 1]} : vector<8x768xf32> to vector<8x128xf32>
    %65 = arith.truncf %64 : vector<8x128xf32> to vector<8x128xbf16>
    %66 = vector.extract_strided_slice %36 {offsets = [0, 640], sizes = [8, 128], strides = [1, 1]} : vector<8x768xf32> to vector<8x128xf32>
    %67 = arith.truncf %66 : vector<8x128xf32> to vector<8x128xbf16>
    %cst_27 = arith.constant dense<0.000000e+00> : vector<8x8xf32>
    %68 = tpu.matmul %63, %65, %cst_27 {dimension_numbers = #tpu.dot_dimension_numbers<[1], [1], [0], [0], [0, 0, 1, 0], [], []>} : vector<8x128xbf16>, vector<8x128xbf16>, vector<8x8xf32> -> vector<8x8xf32>
    %69 = vector.broadcast %28 : vector<1x8xf32> to vector<8x8xf32>
    %70 = arith.addf %68, %69 : vector<8x8xf32>
    %cst_28 = arith.constant dense<0xFF800000> : vector<8xf32>
    %71 = vector.multi_reduction <maximumf>, %70, %cst_28 [1] : vector<8x8xf32> to vector<8xf32>
    %72 = vector.shape_cast %71 : vector<8xf32> to vector<8x1xf32>
    %73 = vector.broadcast %72 : vector<8x1xf32> to vector<8x8xf32>
    %74 = arith.subf %70, %73 : vector<8x8xf32>
    %75 = math.exp %74 : vector<8x8xf32>
    %cst_29 = arith.constant dense<0.000000e+00> : vector<8xf32>
    %76 = vector.multi_reduction <add>, %75, %cst_29 [1] : vector<8x8xf32> to vector<8xf32>
    %77 = vector.shape_cast %76 : vector<8xf32> to vector<8x1xf32>
    %78 = tpu.reciprocal %77 {approx = true} : vector<8x1xf32> -> vector<8x1xf32>
    %79 = vector.broadcast %78 : vector<8x1xf32> to vector<8x8xf32>
    %80 = arith.mulf %75, %79 : vector<8x8xf32>
    %81 = arith.truncf %80 : vector<8x8xf32> to vector<8x8xbf16>
    %cst_30 = arith.constant dense<0.000000e+00> : vector<8x128xf32>
    %82 = tpu.matmul %81, %67, %cst_30 {dimension_numbers = #tpu.dot_dimension_numbers<[1], [0], [0], [1], [0, 0, 1, 1], [], []>} : vector<8x8xbf16>, vector<8x128xbf16>, vector<8x128xf32> -> vector<8x128xf32>
    %83 = tpu.concatenate %59, %82 in 1 : vector<8x128xf32>, vector<8x128xf32> -> vector<8x256xf32>
    %84 = arith.truncf %83 : vector<8x256xf32> to vector<8x256xbf16>
    %c0_31 = arith.constant 0 : index
    %c0_32 = arith.constant 0 : index
    %c0_33 = arith.constant 0 : index
    %85 = vector.load %arg7[%c0_31, %c0_32, %c0_33] : memref<2x256x256xbf16, #tpu.memory_space<vmem>>, vector<1x256x256xbf16>
    %86 = vector.shape_cast %85 : vector<1x256x256xbf16> to vector<256x256xbf16>
    %cst_34 = arith.constant dense<0.000000e+00> : vector<8x256xf32>
    %87 = tpu.matmul %84, %86, %cst_34 {dimension_numbers = #tpu.dot_dimension_numbers<[1], [0], [0], [1], [0, 0, 1, 1], [], []>} : vector<8x256xbf16>, vector<256x256xbf16>, vector<8x256xf32> -> vector<8x256xf32>
    %c0_35 = arith.constant 0 : index
    %c0_36 = arith.constant 0 : index
    %c0_37 = arith.constant 0 : index
    %88 = vector.load %arg8[%c0_35, %c0_36, %c0_37] : memref<2x1x256xf32, #tpu.memory_space<vmem>>, vector<1x1x256xf32>
    %89 = vector.shape_cast %88 : vector<1x1x256xf32> to vector<1x256xf32>
    %90 = vector.broadcast %89 : vector<1x256xf32> to vector<8x256xf32>
    %91 = arith.addf %87, %90 : vector<8x256xf32>
    %92 = arith.addf %91, %22 : vector<8x256xf32>
    %c0_38 = arith.constant 0 : index
    %c0_39 = arith.constant 0 : index
    %c0_40 = arith.constant 0 : index
    %93 = vector.load %arg9[%c0_38, %c0_39, %c0_40] : memref<2x1x256xf32, #tpu.memory_space<vmem>>, vector<1x1x256xf32>
    %94 = vector.shape_cast %93 : vector<1x1x256xf32> to vector<1x256xf32>
    %c0_41 = arith.constant 0 : index
    %c0_42 = arith.constant 0 : index
    %c0_43 = arith.constant 0 : index
    %95 = vector.load %arg10[%c0_41, %c0_42, %c0_43] : memref<2x1x256xf32, #tpu.memory_space<vmem>>, vector<1x1x256xf32>
    %96 = vector.shape_cast %95 : vector<1x1x256xf32> to vector<1x256xf32>
    %cst_44 = arith.constant dense<0.000000e+00> : vector<8xf32>
    %97 = vector.multi_reduction <add>, %92, %cst_44 [1] : vector<8x256xf32> to vector<8xf32>
    %98 = vector.shape_cast %97 : vector<8xf32> to vector<8x1xf32>
    %cst_45 = arith.constant 2.560000e+02 : f32
    %99 = vector.broadcast %cst_45 : f32 to vector<8x1xf32>
    %100 = arith.divf %98, %99 : vector<8x1xf32>
    %101 = vector.broadcast %100 : vector<8x1xf32> to vector<8x256xf32>
    %102 = arith.subf %92, %101 : vector<8x256xf32>
    %103 = arith.mulf %102, %102 : vector<8x256xf32>
    %cst_46 = arith.constant dense<0.000000e+00> : vector<8xf32>
    %104 = vector.multi_reduction <add>, %103, %cst_46 [1] : vector<8x256xf32> to vector<8xf32>
    %105 = vector.shape_cast %104 : vector<8xf32> to vector<8x1xf32>
    %cst_47 = arith.constant 2.560000e+02 : f32
    %106 = vector.broadcast %cst_47 : f32 to vector<8x1xf32>
    %107 = arith.divf %105, %106 : vector<8x1xf32>
    %cst_48 = arith.constant 9.99999996E-13 : f32
    %108 = vector.broadcast %cst_48 : f32 to vector<8x1xf32>
    %109 = arith.addf %107, %108 : vector<8x1xf32>
    %110 = math.rsqrt %109 : vector<8x1xf32>
    %111 = vector.broadcast %110 : vector<8x1xf32> to vector<8x256xf32>
    %112 = arith.mulf %102, %111 : vector<8x256xf32>
    %113 = vector.broadcast %94 : vector<1x256xf32> to vector<8x256xf32>
    %114 = arith.mulf %112, %113 : vector<8x256xf32>
    %115 = vector.broadcast %96 : vector<1x256xf32> to vector<8x256xf32>
    %116 = arith.addf %114, %115 : vector<8x256xf32>
    %117 = arith.truncf %116 : vector<8x256xf32> to vector<8x256xbf16>
    %c0_49 = arith.constant 0 : index
    %c0_50 = arith.constant 0 : index
    %c0_51 = arith.constant 0 : index
    %118 = vector.load %arg11[%c0_49, %c0_50, %c0_51] : memref<2x256x1024xbf16, #tpu.memory_space<vmem>>, vector<1x256x1024xbf16>
    %119 = vector.shape_cast %118 : vector<1x256x1024xbf16> to vector<256x1024xbf16>
    %cst_52 = arith.constant dense<0.000000e+00> : vector<8x1024xf32>
    %120 = tpu.matmul %117, %119, %cst_52 {dimension_numbers = #tpu.dot_dimension_numbers<[1], [0], [0], [1], [0, 0, 1, 1], [], []>} : vector<8x256xbf16>, vector<256x1024xbf16>, vector<8x1024xf32> -> vector<8x1024xf32>
    %c0_53 = arith.constant 0 : index
    %c0_54 = arith.constant 0 : index
    %c0_55 = arith.constant 0 : index
    %121 = vector.load %arg12[%c0_53, %c0_54, %c0_55] : memref<2x1x1024xf32, #tpu.memory_space<vmem>>, vector<1x1x1024xf32>
    %122 = vector.shape_cast %121 : vector<1x1x1024xf32> to vector<1x1024xf32>
    %123 = vector.broadcast %122 : vector<1x1024xf32> to vector<8x1024xf32>
    %124 = arith.addf %120, %123 : vector<8x1024xf32>
    %cst_56 = arith.constant 5.000000e-01 : f32
    %125 = vector.broadcast %cst_56 : f32 to vector<8x1024xf32>
    %126 = arith.mulf %125, %124 : vector<8x1024xf32>
    %cst_57 = arith.constant 4.471500e-02 : f32
    %127 = vector.broadcast %cst_57 : f32 to vector<8x1024xf32>
    %128 = arith.mulf %127, %124 : vector<8x1024xf32>
    %129 = arith.mulf %128, %124 : vector<8x1024xf32>
    %130 = arith.mulf %129, %124 : vector<8x1024xf32>
    %131 = arith.addf %124, %130 : vector<8x1024xf32>
    %cst_58 = arith.constant 0.797884583 : f32
    %132 = vector.broadcast %cst_58 : f32 to vector<8x1024xf32>
    %133 = arith.mulf %132, %131 : vector<8x1024xf32>
    %134 = math.tanh %133 : vector<8x1024xf32>
    %cst_59 = arith.constant 1.000000e+00 : f32
    %135 = vector.broadcast %cst_59 : f32 to vector<8x1024xf32>
    %136 = arith.addf %135, %134 : vector<8x1024xf32>
    %137 = arith.mulf %126, %136 : vector<8x1024xf32>
    %138 = arith.truncf %137 : vector<8x1024xf32> to vector<8x1024xbf16>
    %c0_60 = arith.constant 0 : index
    %c0_61 = arith.constant 0 : index
    %c0_62 = arith.constant 0 : index
    %139 = vector.load %arg13[%c0_60, %c0_61, %c0_62] : memref<2x1024x256xbf16, #tpu.memory_space<vmem>>, vector<1x1024x256xbf16>
    %140 = vector.shape_cast %139 : vector<1x1024x256xbf16> to vector<1024x256xbf16>
    %cst_63 = arith.constant dense<0.000000e+00> : vector<8x256xf32>
    %141 = tpu.matmul %138, %140, %cst_63 {dimension_numbers = #tpu.dot_dimension_numbers<[1], [0], [0], [1], [0, 0, 1, 1], [], []>} : vector<8x1024xbf16>, vector<1024x256xbf16>, vector<8x256xf32> -> vector<8x256xf32>
    %c0_64 = arith.constant 0 : index
    %c0_65 = arith.constant 0 : index
    %c0_66 = arith.constant 0 : index
    %142 = vector.load %arg14[%c0_64, %c0_65, %c0_66] : memref<2x1x256xf32, #tpu.memory_space<vmem>>, vector<1x1x256xf32>
    %143 = vector.shape_cast %142 : vector<1x1x256xf32> to vector<1x256xf32>
    %144 = vector.broadcast %143 : vector<1x256xf32> to vector<8x256xf32>
    %145 = arith.addf %141, %144 : vector<8x256xf32>
    %146 = arith.addf %145, %116 : vector<8x256xf32>
    %c0_67 = arith.constant 0 : index
    %c0_68 = arith.constant 0 : index
    %c0_69 = arith.constant 0 : index
    %147 = vector.load %arg15[%c0_67, %c0_68, %c0_69] : memref<2x1x256xf32, #tpu.memory_space<vmem>>, vector<1x1x256xf32>
    %148 = vector.shape_cast %147 : vector<1x1x256xf32> to vector<1x256xf32>
    %c0_70 = arith.constant 0 : index
    %c0_71 = arith.constant 0 : index
    %c0_72 = arith.constant 0 : index
    %149 = vector.load %arg16[%c0_70, %c0_71, %c0_72] : memref<2x1x256xf32, #tpu.memory_space<vmem>>, vector<1x1x256xf32>
    %150 = vector.shape_cast %149 : vector<1x1x256xf32> to vector<1x256xf32>
    %cst_73 = arith.constant dense<0.000000e+00> : vector<8xf32>
    %151 = vector.multi_reduction <add>, %146, %cst_73 [1] : vector<8x256xf32> to vector<8xf32>
    %152 = vector.shape_cast %151 : vector<8xf32> to vector<8x1xf32>
    %cst_74 = arith.constant 2.560000e+02 : f32
    %153 = vector.broadcast %cst_74 : f32 to vector<8x1xf32>
    %154 = arith.divf %152, %153 : vector<8x1xf32>
    %155 = vector.broadcast %154 : vector<8x1xf32> to vector<8x256xf32>
    %156 = arith.subf %146, %155 : vector<8x256xf32>
    %157 = arith.mulf %156, %156 : vector<8x256xf32>
    %cst_75 = arith.constant dense<0.000000e+00> : vector<8xf32>
    %158 = vector.multi_reduction <add>, %157, %cst_75 [1] : vector<8x256xf32> to vector<8xf32>
    %159 = vector.shape_cast %158 : vector<8xf32> to vector<8x1xf32>
    %cst_76 = arith.constant 2.560000e+02 : f32
    %160 = vector.broadcast %cst_76 : f32 to vector<8x1xf32>
    %161 = arith.divf %159, %160 : vector<8x1xf32>
    %cst_77 = arith.constant 9.99999996E-13 : f32
    %162 = vector.broadcast %cst_77 : f32 to vector<8x1xf32>
    %163 = arith.addf %161, %162 : vector<8x1xf32>
    %164 = math.rsqrt %163 : vector<8x1xf32>
    %165 = vector.broadcast %164 : vector<8x1xf32> to vector<8x256xf32>
    %166 = arith.mulf %156, %165 : vector<8x256xf32>
    %167 = vector.broadcast %148 : vector<1x256xf32> to vector<8x256xf32>
    %168 = arith.mulf %166, %167 : vector<8x256xf32>
    %169 = vector.broadcast %150 : vector<1x256xf32> to vector<8x256xf32>
    %170 = arith.addf %168, %169 : vector<8x256xf32>
    %171 = arith.truncf %170 : vector<8x256xf32> to vector<8x256xbf16>
    %c1 = arith.constant 1 : index
    %c0_78 = arith.constant 0 : index
    %c0_79 = arith.constant 0 : index
    %172 = vector.load %arg5[%c1, %c0_78, %c0_79] : memref<2x256x768xbf16, #tpu.memory_space<vmem>>, vector<1x256x768xbf16>
    %173 = vector.shape_cast %172 : vector<1x256x768xbf16> to vector<256x768xbf16>
    %cst_80 = arith.constant dense<0.000000e+00> : vector<8x768xf32>
    %174 = tpu.matmul %171, %173, %cst_80 {dimension_numbers = #tpu.dot_dimension_numbers<[1], [0], [0], [1], [0, 0, 1, 1], [], []>} : vector<8x256xbf16>, vector<256x768xbf16>, vector<8x768xf32> -> vector<8x768xf32>
    %c1_81 = arith.constant 1 : index
    %c0_82 = arith.constant 0 : index
    %c0_83 = arith.constant 0 : index
    %175 = vector.load %arg6[%c1_81, %c0_82, %c0_83] : memref<2x1x768xf32, #tpu.memory_space<vmem>>, vector<1x1x768xf32>
    %176 = vector.shape_cast %175 : vector<1x1x768xf32> to vector<1x768xf32>
    %177 = vector.broadcast %176 : vector<1x768xf32> to vector<8x768xf32>
    %178 = arith.addf %174, %177 : vector<8x768xf32>
    %179 = vector.extract_strided_slice %178 {offsets = [0, 0], sizes = [8, 128], strides = [1, 1]} : vector<8x768xf32> to vector<8x128xf32>
    %cst_84 = arith.constant 0.0883883461 : f32
    %180 = vector.broadcast %cst_84 : f32 to vector<8x128xf32>
    %181 = arith.mulf %179, %180 : vector<8x128xf32>
    %182 = arith.truncf %181 : vector<8x128xf32> to vector<8x128xbf16>
    %183 = vector.extract_strided_slice %178 {offsets = [0, 256], sizes = [8, 128], strides = [1, 1]} : vector<8x768xf32> to vector<8x128xf32>
    %184 = arith.truncf %183 : vector<8x128xf32> to vector<8x128xbf16>
    %185 = vector.extract_strided_slice %178 {offsets = [0, 512], sizes = [8, 128], strides = [1, 1]} : vector<8x768xf32> to vector<8x128xf32>
    %186 = arith.truncf %185 : vector<8x128xf32> to vector<8x128xbf16>
    %cst_85 = arith.constant dense<0.000000e+00> : vector<8x8xf32>
    %187 = tpu.matmul %182, %184, %cst_85 {dimension_numbers = #tpu.dot_dimension_numbers<[1], [1], [0], [0], [0, 0, 1, 0], [], []>} : vector<8x128xbf16>, vector<8x128xbf16>, vector<8x8xf32> -> vector<8x8xf32>
    %188 = vector.broadcast %28 : vector<1x8xf32> to vector<8x8xf32>
    %189 = arith.addf %187, %188 : vector<8x8xf32>
    %cst_86 = arith.constant dense<0xFF800000> : vector<8xf32>
    %190 = vector.multi_reduction <maximumf>, %189, %cst_86 [1] : vector<8x8xf32> to vector<8xf32>
    %191 = vector.shape_cast %190 : vector<8xf32> to vector<8x1xf32>
    %192 = vector.broadcast %191 : vector<8x1xf32> to vector<8x8xf32>
    %193 = arith.subf %189, %192 : vector<8x8xf32>
    %194 = math.exp %193 : vector<8x8xf32>
    %cst_87 = arith.constant dense<0.000000e+00> : vector<8xf32>
    %195 = vector.multi_reduction <add>, %194, %cst_87 [1] : vector<8x8xf32> to vector<8xf32>
    %196 = vector.shape_cast %195 : vector<8xf32> to vector<8x1xf32>
    %197 = tpu.reciprocal %196 {approx = true} : vector<8x1xf32> -> vector<8x1xf32>
    %198 = vector.broadcast %197 : vector<8x1xf32> to vector<8x8xf32>
    %199 = arith.mulf %194, %198 : vector<8x8xf32>
    %200 = arith.truncf %199 : vector<8x8xf32> to vector<8x8xbf16>
    %cst_88 = arith.constant dense<0.000000e+00> : vector<8x128xf32>
    %201 = tpu.matmul %200, %186, %cst_88 {dimension_numbers = #tpu.dot_dimension_numbers<[1], [0], [0], [1], [0, 0, 1, 1], [], []>} : vector<8x8xbf16>, vector<8x128xbf16>, vector<8x128xf32> -> vector<8x128xf32>
    %202 = vector.extract_strided_slice %178 {offsets = [0, 128], sizes = [8, 128], strides = [1, 1]} : vector<8x768xf32> to vector<8x128xf32>
    %cst_89 = arith.constant 0.0883883461 : f32
    %203 = vector.broadcast %cst_89 : f32 to vector<8x128xf32>
    %204 = arith.mulf %202, %203 : vector<8x128xf32>
    %205 = arith.truncf %204 : vector<8x128xf32> to vector<8x128xbf16>
    %206 = vector.extract_strided_slice %178 {offsets = [0, 384], sizes = [8, 128], strides = [1, 1]} : vector<8x768xf32> to vector<8x128xf32>
    %207 = arith.truncf %206 : vector<8x128xf32> to vector<8x128xbf16>
    %208 = vector.extract_strided_slice %178 {offsets = [0, 640], sizes = [8, 128], strides = [1, 1]} : vector<8x768xf32> to vector<8x128xf32>
    %209 = arith.truncf %208 : vector<8x128xf32> to vector<8x128xbf16>
    %cst_90 = arith.constant dense<0.000000e+00> : vector<8x8xf32>
    %210 = tpu.matmul %205, %207, %cst_90 {dimension_numbers = #tpu.dot_dimension_numbers<[1], [1], [0], [0], [0, 0, 1, 0], [], []>} : vector<8x128xbf16>, vector<8x128xbf16>, vector<8x8xf32> -> vector<8x8xf32>
    %211 = vector.broadcast %28 : vector<1x8xf32> to vector<8x8xf32>
    %212 = arith.addf %210, %211 : vector<8x8xf32>
    %cst_91 = arith.constant dense<0xFF800000> : vector<8xf32>
    %213 = vector.multi_reduction <maximumf>, %212, %cst_91 [1] : vector<8x8xf32> to vector<8xf32>
    %214 = vector.shape_cast %213 : vector<8xf32> to vector<8x1xf32>
    %215 = vector.broadcast %214 : vector<8x1xf32> to vector<8x8xf32>
    %216 = arith.subf %212, %215 : vector<8x8xf32>
    %217 = math.exp %216 : vector<8x8xf32>
    %cst_92 = arith.constant dense<0.000000e+00> : vector<8xf32>
    %218 = vector.multi_reduction <add>, %217, %cst_92 [1] : vector<8x8xf32> to vector<8xf32>
    %219 = vector.shape_cast %218 : vector<8xf32> to vector<8x1xf32>
    %220 = tpu.reciprocal %219 {approx = true} : vector<8x1xf32> -> vector<8x1xf32>
    %221 = vector.broadcast %220 : vector<8x1xf32> to vector<8x8xf32>
    %222 = arith.mulf %217, %221 : vector<8x8xf32>
    %223 = arith.truncf %222 : vector<8x8xf32> to vector<8x8xbf16>
    %cst_93 = arith.constant dense<0.000000e+00> : vector<8x128xf32>
    %224 = tpu.matmul %223, %209, %cst_93 {dimension_numbers = #tpu.dot_dimension_numbers<[1], [0], [0], [1], [0, 0, 1, 1], [], []>} : vector<8x8xbf16>, vector<8x128xbf16>, vector<8x128xf32> -> vector<8x128xf32>
    %225 = tpu.concatenate %201, %224 in 1 : vector<8x128xf32>, vector<8x128xf32> -> vector<8x256xf32>
    %226 = arith.truncf %225 : vector<8x256xf32> to vector<8x256xbf16>
    %c1_94 = arith.constant 1 : index
    %c0_95 = arith.constant 0 : index
    %c0_96 = arith.constant 0 : index
    %227 = vector.load %arg7[%c1_94, %c0_95, %c0_96] : memref<2x256x256xbf16, #tpu.memory_space<vmem>>, vector<1x256x256xbf16>
    %228 = vector.shape_cast %227 : vector<1x256x256xbf16> to vector<256x256xbf16>
    %cst_97 = arith.constant dense<0.000000e+00> : vector<8x256xf32>
    %229 = tpu.matmul %226, %228, %cst_97 {dimension_numbers = #tpu.dot_dimension_numbers<[1], [0], [0], [1], [0, 0, 1, 1], [], []>} : vector<8x256xbf16>, vector<256x256xbf16>, vector<8x256xf32> -> vector<8x256xf32>
    %c1_98 = arith.constant 1 : index
    %c0_99 = arith.constant 0 : index
    %c0_100 = arith.constant 0 : index
    %230 = vector.load %arg8[%c1_98, %c0_99, %c0_100] : memref<2x1x256xf32, #tpu.memory_space<vmem>>, vector<1x1x256xf32>
    %231 = vector.shape_cast %230 : vector<1x1x256xf32> to vector<1x256xf32>
    %232 = vector.broadcast %231 : vector<1x256xf32> to vector<8x256xf32>
    %233 = arith.addf %229, %232 : vector<8x256xf32>
    %234 = arith.addf %233, %170 : vector<8x256xf32>
    %c1_101 = arith.constant 1 : index
    %c0_102 = arith.constant 0 : index
    %c0_103 = arith.constant 0 : index
    %235 = vector.load %arg9[%c1_101, %c0_102, %c0_103] : memref<2x1x256xf32, #tpu.memory_space<vmem>>, vector<1x1x256xf32>
    %236 = vector.shape_cast %235 : vector<1x1x256xf32> to vector<1x256xf32>
    %c1_104 = arith.constant 1 : index
    %c0_105 = arith.constant 0 : index
    %c0_106 = arith.constant 0 : index
    %237 = vector.load %arg10[%c1_104, %c0_105, %c0_106] : memref<2x1x256xf32, #tpu.memory_space<vmem>>, vector<1x1x256xf32>
    %238 = vector.shape_cast %237 : vector<1x1x256xf32> to vector<1x256xf32>
    %cst_107 = arith.constant dense<0.000000e+00> : vector<8xf32>
    %239 = vector.multi_reduction <add>, %234, %cst_107 [1] : vector<8x256xf32> to vector<8xf32>
    %240 = vector.shape_cast %239 : vector<8xf32> to vector<8x1xf32>
    %cst_108 = arith.constant 2.560000e+02 : f32
    %241 = vector.broadcast %cst_108 : f32 to vector<8x1xf32>
    %242 = arith.divf %240, %241 : vector<8x1xf32>
    %243 = vector.broadcast %242 : vector<8x1xf32> to vector<8x256xf32>
    %244 = arith.subf %234, %243 : vector<8x256xf32>
    %245 = arith.mulf %244, %244 : vector<8x256xf32>
    %cst_109 = arith.constant dense<0.000000e+00> : vector<8xf32>
    %246 = vector.multi_reduction <add>, %245, %cst_109 [1] : vector<8x256xf32> to vector<8xf32>
    %247 = vector.shape_cast %246 : vector<8xf32> to vector<8x1xf32>
    %cst_110 = arith.constant 2.560000e+02 : f32
    %248 = vector.broadcast %cst_110 : f32 to vector<8x1xf32>
    %249 = arith.divf %247, %248 : vector<8x1xf32>
    %cst_111 = arith.constant 9.99999996E-13 : f32
    %250 = vector.broadcast %cst_111 : f32 to vector<8x1xf32>
    %251 = arith.addf %249, %250 : vector<8x1xf32>
    %252 = math.rsqrt %251 : vector<8x1xf32>
    %253 = vector.broadcast %252 : vector<8x1xf32> to vector<8x256xf32>
    %254 = arith.mulf %244, %253 : vector<8x256xf32>
    %255 = vector.broadcast %236 : vector<1x256xf32> to vector<8x256xf32>
    %256 = arith.mulf %254, %255 : vector<8x256xf32>
    %257 = vector.broadcast %238 : vector<1x256xf32> to vector<8x256xf32>
    %258 = arith.addf %256, %257 : vector<8x256xf32>
    %259 = arith.truncf %258 : vector<8x256xf32> to vector<8x256xbf16>
    %c1_112 = arith.constant 1 : index
    %c0_113 = arith.constant 0 : index
    %c0_114 = arith.constant 0 : index
    %260 = vector.load %arg11[%c1_112, %c0_113, %c0_114] : memref<2x256x1024xbf16, #tpu.memory_space<vmem>>, vector<1x256x1024xbf16>
    %261 = vector.shape_cast %260 : vector<1x256x1024xbf16> to vector<256x1024xbf16>
    %cst_115 = arith.constant dense<0.000000e+00> : vector<8x1024xf32>
    %262 = tpu.matmul %259, %261, %cst_115 {dimension_numbers = #tpu.dot_dimension_numbers<[1], [0], [0], [1], [0, 0, 1, 1], [], []>} : vector<8x256xbf16>, vector<256x1024xbf16>, vector<8x1024xf32> -> vector<8x1024xf32>
    %c1_116 = arith.constant 1 : index
    %c0_117 = arith.constant 0 : index
    %c0_118 = arith.constant 0 : index
    %263 = vector.load %arg12[%c1_116, %c0_117, %c0_118] : memref<2x1x1024xf32, #tpu.memory_space<vmem>>, vector<1x1x1024xf32>
    %264 = vector.shape_cast %263 : vector<1x1x1024xf32> to vector<1x1024xf32>
    %265 = vector.broadcast %264 : vector<1x1024xf32> to vector<8x1024xf32>
    %266 = arith.addf %262, %265 : vector<8x1024xf32>
    %cst_119 = arith.constant 5.000000e-01 : f32
    %267 = vector.broadcast %cst_119 : f32 to vector<8x1024xf32>
    %268 = arith.mulf %267, %266 : vector<8x1024xf32>
    %cst_120 = arith.constant 4.471500e-02 : f32
    %269 = vector.broadcast %cst_120 : f32 to vector<8x1024xf32>
    %270 = arith.mulf %269, %266 : vector<8x1024xf32>
    %271 = arith.mulf %270, %266 : vector<8x1024xf32>
    %272 = arith.mulf %271, %266 : vector<8x1024xf32>
    %273 = arith.addf %266, %272 : vector<8x1024xf32>
    %cst_121 = arith.constant 0.797884583 : f32
    %274 = vector.broadcast %cst_121 : f32 to vector<8x1024xf32>
    %275 = arith.mulf %274, %273 : vector<8x1024xf32>
    %276 = math.tanh %275 : vector<8x1024xf32>
    %cst_122 = arith.constant 1.000000e+00 : f32
    %277 = vector.broadcast %cst_122 : f32 to vector<8x1024xf32>
    %278 = arith.addf %277, %276 : vector<8x1024xf32>
    %279 = arith.mulf %268, %278 : vector<8x1024xf32>
    %280 = arith.truncf %279 : vector<8x1024xf32> to vector<8x1024xbf16>
    %c1_123 = arith.constant 1 : index
    %c0_124 = arith.constant 0 : index
    %c0_125 = arith.constant 0 : index
    %281 = vector.load %arg13[%c1_123, %c0_124, %c0_125] : memref<2x1024x256xbf16, #tpu.memory_space<vmem>>, vector<1x1024x256xbf16>
    %282 = vector.shape_cast %281 : vector<1x1024x256xbf16> to vector<1024x256xbf16>
    %cst_126 = arith.constant dense<0.000000e+00> : vector<8x256xf32>
    %283 = tpu.matmul %280, %282, %cst_126 {dimension_numbers = #tpu.dot_dimension_numbers<[1], [0], [0], [1], [0, 0, 1, 1], [], []>} : vector<8x1024xbf16>, vector<1024x256xbf16>, vector<8x256xf32> -> vector<8x256xf32>
    %c1_127 = arith.constant 1 : index
    %c0_128 = arith.constant 0 : index
    %c0_129 = arith.constant 0 : index
    %284 = vector.load %arg14[%c1_127, %c0_128, %c0_129] : memref<2x1x256xf32, #tpu.memory_space<vmem>>, vector<1x1x256xf32>
    %285 = vector.shape_cast %284 : vector<1x1x256xf32> to vector<1x256xf32>
    %286 = vector.broadcast %285 : vector<1x256xf32> to vector<8x256xf32>
    %287 = arith.addf %283, %286 : vector<8x256xf32>
    %288 = arith.addf %287, %258 : vector<8x256xf32>
    %c1_130 = arith.constant 1 : index
    %c0_131 = arith.constant 0 : index
    %c0_132 = arith.constant 0 : index
    %289 = vector.load %arg15[%c1_130, %c0_131, %c0_132] : memref<2x1x256xf32, #tpu.memory_space<vmem>>, vector<1x1x256xf32>
    %290 = vector.shape_cast %289 : vector<1x1x256xf32> to vector<1x256xf32>
    %c1_133 = arith.constant 1 : index
    %c0_134 = arith.constant 0 : index
    %c0_135 = arith.constant 0 : index
    %291 = vector.load %arg16[%c1_133, %c0_134, %c0_135] : memref<2x1x256xf32, #tpu.memory_space<vmem>>, vector<1x1x256xf32>
    %292 = vector.shape_cast %291 : vector<1x1x256xf32> to vector<1x256xf32>
    %cst_136 = arith.constant dense<0.000000e+00> : vector<8xf32>
    %293 = vector.multi_reduction <add>, %288, %cst_136 [1] : vector<8x256xf32> to vector<8xf32>
    %294 = vector.shape_cast %293 : vector<8xf32> to vector<8x1xf32>
    %cst_137 = arith.constant 2.560000e+02 : f32
    %295 = vector.broadcast %cst_137 : f32 to vector<8x1xf32>
    %296 = arith.divf %294, %295 : vector<8x1xf32>
    %297 = vector.broadcast %296 : vector<8x1xf32> to vector<8x256xf32>
    %298 = arith.subf %288, %297 : vector<8x256xf32>
    %299 = arith.mulf %298, %298 : vector<8x256xf32>
    %cst_138 = arith.constant dense<0.000000e+00> : vector<8xf32>
    %300 = vector.multi_reduction <add>, %299, %cst_138 [1] : vector<8x256xf32> to vector<8xf32>
    %301 = vector.shape_cast %300 : vector<8xf32> to vector<8x1xf32>
    %cst_139 = arith.constant 2.560000e+02 : f32
    %302 = vector.broadcast %cst_139 : f32 to vector<8x1xf32>
    %303 = arith.divf %301, %302 : vector<8x1xf32>
    %cst_140 = arith.constant 9.99999996E-13 : f32
    %304 = vector.broadcast %cst_140 : f32 to vector<8x1xf32>
    %305 = arith.addf %303, %304 : vector<8x1xf32>
    %306 = math.rsqrt %305 : vector<8x1xf32>
    %307 = vector.broadcast %306 : vector<8x1xf32> to vector<8x256xf32>
    %308 = arith.mulf %298, %307 : vector<8x256xf32>
    %309 = vector.broadcast %290 : vector<1x256xf32> to vector<8x256xf32>
    %310 = arith.mulf %308, %309 : vector<8x256xf32>
    %311 = vector.broadcast %292 : vector<1x256xf32> to vector<8x256xf32>
    %312 = arith.addf %310, %311 : vector<8x256xf32>
    %313 = vector.extract_strided_slice %312 {offsets = [0, 0], sizes = [1, 256], strides = [1, 1]} : vector<8x256xf32> to vector<1x256xf32>
    %314 = arith.truncf %313 : vector<1x256xf32> to vector<1x256xbf16>
    %c0_141 = arith.constant 0 : index
    %c0_142 = arith.constant 0 : index
    %315 = vector.load %arg17[%c0_141, %c0_142] : memref<256x256xbf16, #tpu.memory_space<vmem>>, vector<256x256xbf16>
    %cst_143 = arith.constant dense<0.000000e+00> : vector<1x256xf32>
    %316 = tpu.matmul %314, %315, %cst_143 {dimension_numbers = #tpu.dot_dimension_numbers<[1], [0], [0], [1], [0, 0, 1, 1], [], []>} : vector<1x256xbf16>, vector<256x256xbf16>, vector<1x256xf32> -> vector<1x256xf32>
    %c0_144 = arith.constant 0 : index
    %c0_145 = arith.constant 0 : index
    %317 = vector.load %arg18[%c0_144, %c0_145] : memref<1x256xf32, #tpu.memory_space<vmem>>, vector<1x256xf32>
    %318 = arith.addf %316, %317 : vector<1x256xf32>
    %319 = math.tanh %318 : vector<1x256xf32>
    %320 = arith.truncf %319 : vector<1x256xf32> to vector<1x256xbf16>
    %c0_146 = arith.constant 0 : index
    %c0_147 = arith.constant 0 : index
    %321 = vector.load %arg19[%c0_146, %c0_147] : memref<256x3xbf16, #tpu.memory_space<vmem>>, vector<256x3xbf16>
    %cst_148 = arith.constant dense<0.000000e+00> : vector<1x3xf32>
    %322 = tpu.matmul %320, %321, %cst_148 {dimension_numbers = #tpu.dot_dimension_numbers<[1], [0], [0], [1], [0, 0, 1, 1], [], []>} : vector<1x256xbf16>, vector<256x3xbf16>, vector<1x3xf32> -> vector<1x3xf32>
    %c0_149 = arith.constant 0 : index
    %c0_150 = arith.constant 0 : index
    %323 = vector.load %arg20[%c0_149, %c0_150] : memref<1x3xf32, #tpu.memory_space<vmem>>, vector<1x3xf32>
    %324 = arith.addf %322, %323 : vector<1x3xf32>
    %c0_151 = arith.constant 0 : index
    %c0_152 = arith.constant 0 : index
    %c0_153 = arith.constant 0 : index
    %325 = vector.load %arg21[%c0_151, %c0_152, %c0_153] : memref<1x1x3xf32, #tpu.memory_space<vmem>>, vector<1x1x3xf32>
    %326 = vector.shape_cast %325 : vector<1x1x3xf32> to vector<1x3xf32>
    %327 = vector.shape_cast %324 : vector<1x3xf32> to vector<1x1x3xf32>
    tpu.vector_store %arg21[%c0_151, %c0_152, %c0_153], %327 {strides = array<i32>} : memref<1x1x3xf32, #tpu.memory_space<vmem>>, vector<1x1x3xf32>,
    return
  }
  func.func @transform_0(%arg0: i32) -> (i32, i32) {
    %c0_i32 = arith.constant 0 : i32
    %c0_i32_0 = arith.constant 0 : i32
    return %arg0, %c0_i32 : i32, i32
  }
  func.func @transform_1(%arg0: i32) -> (i32, i32, i32) {
    %c0_i32 = arith.constant 0 : i32
    %c0_i32_0 = arith.constant 0 : i32
    %c0_i32_1 = arith.constant 0 : i32
    return %arg0, %c0_i32, %c0_i32_0 : i32, i32, i32
  }
  func.func @transform_2(%arg0: i32) -> (i32, i32) {
    %c0_i32 = arith.constant 0 : i32
    %c0_i32_0 = arith.constant 0 : i32
    %c0_i32_1 = arith.constant 0 : i32
    return %c0_i32, %c0_i32_0 : i32, i32
  }
  func.func @transform_3(%arg0: i32) -> (i32, i32) {
    %c0_i32 = arith.constant 0 : i32
    %c0_i32_0 = arith.constant 0 : i32
    %c0_i32_1 = arith.constant 0 : i32
    return %c0_i32, %c0_i32_0 : i32, i32
  }
  func.func @transform_4(%arg0: i32) -> (i32, i32, i32) {
    %c0_i32 = arith.constant 0 : i32
    %c0_i32_0 = arith.constant 0 : i32
    %c0_i32_1 = arith.constant 0 : i32
    %c0_i32_2 = arith.constant 0 : i32
    return %c0_i32, %c0_i32_0, %c0_i32_1 : i32, i32, i32
  }
  func.func @transform_5(%arg0: i32) -> (i32, i32, i32) {
    %c0_i32 = arith.constant 0 : i32
    %c0_i32_0 = arith.constant 0 : i32
    %c0_i32_1 = arith.constant 0 : i32
    %c0_i32_2 = arith.constant 0 : i32
    return %c0_i32, %c0_i32_0, %c0_i32_1 : i32, i32, i32
  }
  func.func @transform_6(%arg0: i32) -> (i32, i32, i32) {
    %c0_i32 = arith.constant 0 : i32
    %c0_i32_0 = arith.constant 0 : i32
    %c0_i32_1 = arith.constant 0 : i32
    %c0_i32_2 = arith.constant 0 : i32
    return %c0_i32, %c0_i32_0, %c0_i32_1 : i32, i32, i32
  }
  func.func @transform_7(%arg0: i32) -> (i32, i32, i32) {
    %c0_i32 = arith.constant 0 : i32
    %c0_i32_0 = arith.constant 0 : i32
    %c0_i32_1 = arith.constant 0 : i32
    %c0_i32_2 = arith.constant 0 : i32
    return %c0_i32, %c0_i32_0, %c0_i32_1 : i32, i32, i32
  }
  func.func @transform_8(%arg0: i32) -> (i32, i32, i32) {
    %c0_i32 = arith.constant 0 : i32
    %c0_i32_0 = arith.constant 0 : i32
    %c0_i32_1 = arith.constant 0 : i32
    %c0_i32_2 = arith.constant 0 : i32
    return %c0_i32, %c0_i32_0, %c0_i32_1 : i32, i32, i32
  }
  func.func @transform_9(%arg0: i32) -> (i32, i32, i32) {
    %c0_i32 = arith.constant 0 : i32
    %c0_i32_0 = arith.constant 0 : i32
    %c0_i32_1 = arith.constant 0 : i32
    %c0_i32_2 = arith.constant 0 : i32
    return %c0_i32, %c0_i32_0, %c0_i32_1 : i32, i32, i32
  }
  func.func @transform_10(%arg0: i32) -> (i32, i32, i32) {
    %c0_i32 = arith.constant 0 : i32
    %c0_i32_0 = arith.constant 0 : i32
    %c0_i32_1 = arith.constant 0 : i32
    %c0_i32_2 = arith.constant 0 : i32
    return %c0_i32, %c0_i32_0, %c0_i32_1 : i32, i32, i32
  }
  func.func @transform_11(%arg0: i32) -> (i32, i32, i32) {
    %c0_i32 = arith.constant 0 : i32
    %c0_i32_0 = arith.constant 0 : i32
    %c0_i32_1 = arith.constant 0 : i32
    %c0_i32_2 = arith.constant 0 : i32
    return %c0_i32, %c0_i32_0, %c0_i32_1 : i32, i32, i32
  }
  func.func @transform_12(%arg0: i32) -> (i32, i32, i32) {
    %c0_i32 = arith.constant 0 : i32
    %c0_i32_0 = arith.constant 0 : i32
    %c0_i32_1 = arith.constant 0 : i32
    %c0_i32_2 = arith.constant 0 : i32
    return %c0_i32, %c0_i32_0, %c0_i32_1 : i32, i32, i32
  }
  func.func @transform_13(%arg0: i32) -> (i32, i32, i32) {
    %c0_i32 = arith.constant 0 : i32
    %c0_i32_0 = arith.constant 0 : i32
    %c0_i32_1 = arith.constant 0 : i32
    %c0_i32_2 = arith.constant 0 : i32
    return %c0_i32, %c0_i32_0, %c0_i32_1 : i32, i32, i32
  }
  func.func @transform_14(%arg0: i32) -> (i32, i32, i32) {
    %c0_i32 = arith.constant 0 : i32
    %c0_i32_0 = arith.constant 0 : i32
    %c0_i32_1 = arith.constant 0 : i32
    %c0_i32_2 = arith.constant 0 : i32
    return %c0_i32, %c0_i32_0, %c0_i32_1 : i32, i32, i32
  }
  func.func @transform_15(%arg0: i32) -> (i32, i32, i32) {
    %c0_i32 = arith.constant 0 : i32
    %c0_i32_0 = arith.constant 0 : i32
    %c0_i32_1 = arith.constant 0 : i32
    %c0_i32_2 = arith.constant 0 : i32
    return %c0_i32, %c0_i32_0, %c0_i32_1 : i32, i32, i32
  }
  func.func @transform_16(%arg0: i32) -> (i32, i32) {
    %c0_i32 = arith.constant 0 : i32
    %c0_i32_0 = arith.constant 0 : i32
    %c0_i32_1 = arith.constant 0 : i32
    return %c0_i32, %c0_i32_0 : i32, i32
  }
  func.func @transform_17(%arg0: i32) -> (i32, i32) {
    %c0_i32 = arith.constant 0 : i32
    %c0_i32_0 = arith.constant 0 : i32
    %c0_i32_1 = arith.constant 0 : i32
    return %c0_i32, %c0_i32_0 : i32, i32
  }
  func.func @transform_18(%arg0: i32) -> (i32, i32) {
    %c0_i32 = arith.constant 0 : i32
    %c0_i32_0 = arith.constant 0 : i32
    %c0_i32_1 = arith.constant 0 : i32
    return %c0_i32, %c0_i32_0 : i32, i32
  }
  func.func @transform_19(%arg0: i32) -> (i32, i32) {
    %c0_i32 = arith.constant 0 : i32
    %c0_i32_0 = arith.constant 0 : i32
    %c0_i32_1 = arith.constant 0 : i32
    return %c0_i32, %c0_i32_0 : i32, i32
  }
  func.func @transform_20(%arg0: i32) -> (i32, i32, i32) {
    %c0_i32 = arith.constant 0 : i32
    %c0_i32_0 = arith.constant 0 : i32
    %c0_i32_1 = arith.constant 0 : i32
    return %arg0, %c0_i32, %c0_i32_0 : i32, i32, i32
  }
}

</mosaic_0001>

<bundles_post_ra>
// kernel: bert_sentiment_forward.1
= control target key start
LH: loop header
LB: loop body
LE: loop exit
PB: predicated region body
PF: predicated region fallthrough
CT: control target
= control target key end

     0   :  { %s10985_s0 = inlined_call_operand.vmem [shape: f32[16,256], index: 0, kind: input, shape index: {}]   ;;  %s10986_s1 = inlined_call_operand.vmem [shape: f32[2,1,8], index: 1, kind: input, shape index: {}]   ;;  %s10987_s2 = inlined_call_operand.vmem [shape: f32[1,256], index: 2, kind: input, shape index: {}]   ;;  %s10988_s3 = inlined_call_operand.vmem [shape: f32[1,256], index: 3, kind: input, shape index: {}]   ;;  %s10989_s4 = inlined_call_operand.hbm [shape: bf16[2,256,768], index: 4, kind: input, shape index: {}]   ;;  %s10990_s5 = inlined_call_operand.vmem [shape: f32[2,1,768], index: 5, kind: input, shape index: {}]   ;;  %s10991_s6 = inlined_call_operand.vmem [shape: bf16[2,256,256], index: 6, kind: input, shape index: {}]   ;;  %s10992_s7 = inlined_call_operand.vmem [shape: f32[2,1,256], index: 7, kind: input, shape index: {}]   ;;  %s10993_s8 = inlined_call_operand.vmem [shape: f32[2,1,256], index: 8, kind: input, shape index: {}]   ;;  %s10994_s9 = inlined_call_operand.vmem [shape: f32[2,1,256], index: 9, kind: input, shape index: {}]   ;;  %s10995_s10 = inlined_call_operand.hbm [shape: bf16[2,256,1024], index: 10, kind: input, shape index: {}]   ;;  %s10996_s11 = inlined_call_operand.vmem [shape: f32[2,1,1024], index: 11, kind: input, shape index: {}]   ;;  %s10997_s12 = inlined_call_operand.hbm [shape: bf16[2,1024,256], index: 12, kind: input, shape index: {}]   ;;  %s10998_s13 = inlined_call_operand.vmem [shape: f32[2,1,256], index: 13, kind: input, shape index: {}]   ;;  %s10999_s14 = inlined_call_operand.vmem [shape: f32[2,1,256], index: 14, kind: input, shape index: {}]   ;;  %s11000_s15 = inlined_call_operand.vmem [shape: f32[2,1,256], index: 15, kind: input, shape index: {}]   ;;  %s11001_s16 = inlined_call_operand.hbm [shape: bf16[256,256], index: 16, kind: input, shape index: {}]   ;;  %s11002_s17 = inlined_call_operand.vmem [shape: f32[1,256], index: 17, kind: input, shape index: {}]   ;;  %s11003_s18 = inlined_call_operand.vmem [shape: bf16[256,3], index: 18, kind: input, shape index: {}]   ;;  %s11004_s19 = inlined_call_operand.vmem [shape: f32[1,3], index: 19, kind: input, shape index: {}]   ;;  %s11005_s20 = inlined_call_operand.hbm [shape: f32[2,1,3], index: 20, kind: output, shape index: {}]  }
   0x1   :  { %11020 = sst [smem:[#allocation23_spill]] %s10985_s0 }
   0x2   :  { %11021 = sst [smem:[#allocation24_spill]] %s10986_s1 }
   0x3   :  { %11022 = sst [smem:[#allocation25_spill]] %s10987_s2 }
   0x4   :  { %11023 = sst [smem:[#allocation26_spill]] %s10988_s3 }
   0x5   :  { %11024 = sst [smem:[#allocation27_spill]] %s10989_s4 }
   0x6   :  { %11025 = sst [smem:[#allocation28_spill]] %s10995_s10 }
   0x7   :  { %11026 = sst [smem:[#allocation29_spill]] %s11002_s17 }
   0x8   :  { %11027 = sst [smem:[#allocation30_spill]] %s11004_s19 }
   0x9   :  { %11028 = sst [smem:[#allocation31_spill]] %s11005_s20 }
   0xa   :  { %25 = vsyncpa [#allocation3], 0 }
   0xb   :  { %26 = vsyncpa [#allocation6], 0 }
   0xc   :  { %27 = vsyncpa [#allocation9], 0 }
   0xd   :  { %28 = vsyncpa [#allocation4], 0 }
   0xe   :  { %30 = vsyncpa [#allocation4 + $0x1], 0  ;;  %s10115_s1 = smov 0   ;;  %s10117_s22 = smov 0  }
   0xf   :  { %s10119_s23 = smov 0   ;;  %s10121_s24 = smov 0  }
  0x10 LB: > { %11029 = sst [smem:[#allocation15_spill]] %s9983_s1  ;;  %s10136_s2 = sadd.s32 4294967295, %s9995_s24   ;;  %s9995_s24 = sphi %s10121_s24, %s11065_s24   ;;  %s9991_s23 = sphi %s10119_s23, %s11068_s23   ;;  %s9987_s22 = sphi %s10117_s22, %s11067_s22   ;;  %s9983_s1 = sphi %s10115_s1, %s11066_s1  }
  0x11   : > { %11030 = sst [smem:[#allocation16_spill]] %s9987_s22  ;;  %s7863_s25 = sadd.s32 4294967294, %s9995_s24  }
  0x12   : > { %11031 = sst [smem:[#allocation17_spill]] %s9991_s23  ;;  %s10140_s3 = sadd.s32 1, %s9995_s24  }
  0x13   : > { %11032 = sst [smem:[#allocation18_spill]] %s9995_s24  ;;  %s473_s26 = sadd.s32 1, %s9991_s23 }
  0x14   : > { %11033 = sst [smem:[#allocation19_spill]] %s10140_s3  ;;  %s470_s27 = ssub.s32 %s9995_s24, %s10140_s3 }
  0x15   : > { %p483_p0 = scmp.ne.s32.totalorder %s9991_s23, %s9987_s22  ;;  %p471_p1 = scmp.eq.s32.totalorder %s470_s27, 0 }
  0x16   : > { %p484_p2 = scmp.eq.s32.totalorder %s10136_s2, 1  ;;  %p489_p3 = scmp.ne.s32.totalorder %s9987_s22, %s9983_s1 }
  0x17   : > { %p490_p4 = scmp.eq.s32.totalorder %s7863_s25, 1  ;;  %p7864_p7 = scmp.ge.s32.totalorder %s9995_s24, 1 }
  0x18   : > { %s10151_s28 = scalar_select %p471_p1, %s9991_s23, %s473_s26  }
  0x19   : > { %p10153_p5 = por %p484_p2, %p483_p0  ;;  %p10157_p6 = por %p490_p4, %p489_p3 }
  0x1a   : > { %11034 = sst [smem:[#allocation20_spill]] %s10151_s28  ;;  %p497_p8 = scmp.lt.s32.totalorder %s9995_s24, 3 }
  0x1b   : > { %s11035_s4 = scalar_select %p10153_p5, 1, 0 }
  0x1c   : > { %s11037_s29 = scalar_select %p10157_p6, 1, 0 }
  0x1d   : > { %11036 = sst [smem:[#allocation21_spill]] %s11035_s4  ;;  %p11013_p9 = scmp.eq.s32.totalorder %s10136_s2, 0 }
  0x1e   : > { %11038 = sst [smem:[#allocation22_spill]] %s11037_s29  ;;  %p10164_p10 = pnand %p7864_p7, %p497_p8 }
  0x1f   : > { %s9997_s0 = smov [#allocation5]   ;;  %s9998_s26 = smov [#allocation2]  }
  0x20   : > { %s11039_s30 = scalar_select %p10164_p10, 1, 0 }
  0x21   : > { %s543_s21 = sshll.u32 %s9997_s0, 4  ;;  %p8845_p11 = pneg %p10164_p10  ;;  %s544_s21 = int_to_ptr.vmem [resolvable:$true] %s543_s21 }
  0x22   : > { %s515_s27 = sshll.u32 %s9998_s26, 4  ;;  %s11041_s10 = sld [smem:[#allocation28_spill]]  ;;  %s10176_s27 = int_to_ptr.vmem [resolvable:$true] %s515_s27 }
  0x23   : > { %p10172_p12 = pnand %p11013_p9, %p8845_p11 }
  0x25   : > { %p10186_p0 = pneg %p10172_p12 }
  0x28   : > { %s9809_s3 = scalar_lea.hbm %s11041_s10, 32768 }
  0x29   : > { %p9810_p13 = scmp.ne.s32.totalorder %s11041_s10, %s9809_s3  ;;  %p9816_p3 = scmp.lt.u32.totalorder %s9809_s3, %s11041_s10 }
  0x2b   : > { %p9812_p1 = pnand %p10186_p0, %p9810_p13 }
  0x2d   : > { %p9813_p2 = pneg %p9812_p1 }
  0x2f   : > { %p9818_p4 = pnand %p9816_p3, %p9813_p2 }
  0x31   : > { %9821 = shalt.err (!%p9818_p4)
}
  0x32   : > { %s9822_s23 = scalar_lea.vmem %s544_s21, 32768  ;;  %p9830_p9 = scmp.lt.s32.totalorder %s544_s21, %s544_s21 }
  0x33   : > { %p9823_p7 = scmp.ne.s32.totalorder %s544_s21, %s9822_s23  ;;  %p9831_p6 = scmp.lt.s32.totalorder %s9822_s23, %s9822_s23 }
  0x35   : > { %p9825_p8 = pnand %p9823_p7, %p10186_p0  ;;  %p9832_p5 = por %p9831_p6, %p9830_p9 }
  0x37   : > { %p9826_p11 = pneg %p9825_p8 }
  0x39   : > { %p9833_p10 = pnand %p9832_p5, %p9826_p11 }
  0x3b   : > { %9836 = shalt.err (!%p9833_p10)
}
  0x3c   : > { %s9999_s1 = smov 512   ;;  %s10000_s28 = smov 32  }
  0x3d   : > { %8851 = dma.hbm_to_vmem [thread:$0]  (!%p10172_p12), %s11041_s10, 32768, %s544_s21, [#allocation6], %s9999_s1, %s9999_s1, %s10000_s28  }
  0x3e   : > { %s11043_s20 = sld [smem:[#allocation27_spill]] }
  0x44   : > { %s9837_s4 = scalar_lea.hbm %s11043_s20, 24576 }
  0x45   : > { %p9838_p13 = scmp.ne.s32.totalorder %s11043_s20, %s9837_s4  ;;  %p9844_p9 = scmp.lt.u32.totalorder %s9837_s4, %s11043_s20 }
  0x47   : > { %p9840_p5 = pnand %p9838_p13, %p10186_p0 }
  0x49   : > { %p9841_p6 = pneg %p9840_p5 }
  0x4b   : > { %p9846_p10 = pnand %p9844_p9, %p9841_p6 }
  0x4d   : > { %9849 = shalt.err (!%p9846_p10)
}
  0x4e   : > { %s9850_s21 = scalar_lea.vmem %s10176_s27, 24576  ;;  %p9858_p4 = scmp.lt.s32.totalorder %s10176_s27, %s10176_s27 }
  0x4f   : > { %p9851_p1 = scmp.ne.s32.totalorder %s10176_s27, %s9850_s21  ;;  %p9859_p7 = scmp.lt.s32.totalorder %s9850_s21, %s9850_s21 }
  0x51   : > { %p9853_p2 = pnand %p9851_p1, %p10186_p0  ;;  %p9860_p8 = por %p9859_p7, %p9858_p4 }
  0x53   : > { %p9854_p3 = pneg %p9853_p2 }
  0x55   : > { %p9861_p11 = pnand %p9860_p8, %p9854_p3 }
  0x57   : > { %9864 = shalt.err (!%p9861_p11)
}
  0x58   : > { %s10001_s19 = smov 384   ;;  %s10002_s17 = smov 24  }
  0x59   : > { %8848 = dma.hbm_to_vmem [thread:$0]  (!%p10172_p12), %s11043_s20, 24576, %s10176_s27, [#allocation3], %s10001_s19, %s10001_s19, %s10002_s17  }
  0x5a   : > { %s10003_s1 = smov [#allocation7]   ;;  %s9865_s29 = scalar_lea.hbm %s10997_s12, 32768 }
  0x5b   : > { %s559_s28 = sshll.u32 %s10003_s1, 4  ;;  %p9866_p13 = scmp.ne.s32.totalorder %s10997_s12, %s9865_s29  ;;  %s560_s28 = int_to_ptr.vmem [resolvable:$true] %s559_s28 }
  0x5c   : > { %p9872_p9 = scmp.lt.u32.totalorder %s9865_s29, %s10997_s12 }
  0x5d   : > { %p9868_p5 = pnand %p9866_p13, %p10186_p0 }
  0x5f   : > { %p9869_p6 = pneg %p9868_p5 }
  0x61   : > { %p9874_p10 = pnand %p9872_p9, %p9869_p6 }
  0x63   : > { %9877 = shalt.err (!%p9874_p10)
}
  0x64   : > { %s9878_s27 = scalar_lea.vmem %s560_s28, 32768  ;;  %p9886_p4 = scmp.lt.s32.totalorder %s560_s28, %s560_s28 }
  0x65   : > { %p9879_p1 = scmp.ne.s32.totalorder %s560_s28, %s9878_s27  ;;  %p9887_p7 = scmp.lt.s32.totalorder %s9878_s27, %s9878_s27 }
  0x67   : > { %p9881_p2 = pnand %p9879_p1, %p10186_p0  ;;  %p9888_p8 = por %p9887_p7, %p9886_p4 }
  0x69   : > { %p9882_p3 = pneg %p9881_p2 }
  0x6b   : > { %p9889_p11 = pnand %p9888_p8, %p9882_p3 }
  0x6d   : > { %9892 = shalt.err (!%p9889_p11)
}
  0x6e   : > { %s10004_s19 = smov 128   ;;  %s10005_s17 = smov 8  }
  0x6f   : > { %8854 = dma.hbm_to_vmem [thread:$0]  (!%p10172_p12), %s10997_s12, 32768, %s560_s28, [#allocation6], %s10004_s19, %s10004_s19, %s10005_s17  }
  0x70   : > { %s10006_s4 = smov [#allocation8]   ;;  %s9893_s29 = scalar_lea.hbm %s11001_s16, 4096 }
  0x71   : > { %s581_s1 = sshll.u32 %s10006_s4, 4  ;;  %p9894_p13 = scmp.ne.s32.totalorder %s11001_s16, %s9893_s29  ;;  %s582_s1 = int_to_ptr.vmem [resolvable:$true] %s581_s1 }
  0x72   : > { %p9900_p9 = scmp.lt.u32.totalorder %s9893_s29, %s11001_s16 }
  0x73   : > { %p9896_p5 = pnand %p9894_p13, %p10186_p0 }
  0x75   : > { %p9897_p6 = pneg %p9896_p5 }
  0x77   : > { %p9902_p10 = pnand %p9900_p9, %p9897_p6 }
  0x79   : > { %9905 = shalt.err (!%p9902_p10)
}
  0x7a   : > { %s9906_s28 = scalar_lea.vmem %s582_s1, 4096  ;;  %p9914_p4 = scmp.lt.s32.totalorder %s582_s1, %s582_s1 }
  0x7b   : > { %p9907_p1 = scmp.ne.s32.totalorder %s582_s1, %s9906_s28  ;;  %p9915_p7 = scmp.lt.s32.totalorder %s9906_s28, %s9906_s28 }
  0x7d   : > { %p9909_p2 = pnand %p9907_p1, %p10186_p0  ;;  %p9916_p8 = por %p9915_p7, %p9914_p4 }
  0x7f   : > { %p9910_p3 = pneg %p9909_p2 }
  0x81   : > { %p9917_p11 = pnand %p9916_p8, %p9910_p3 }
  0x83   : > { %9920 = shalt.err (!%p9917_p11)
}
  0x84   : > { %8857 = dma.hbm_to_vmem [thread:$0]  (!%p10172_p12), %s11001_s16, 4096, %s582_s1, [#allocation9], %s10004_s19, %s10004_s19, %s10005_s17  }
  0x85   : > { %p11044_p13 = scmp.ne.s32.totalorder %s11039_s30, 0 }
  0x86   : > { %p11045_p5 = scmp.eq.s32.totalorder (!%p11044_p13), %s10136_s2, 0 }
  0x87   : > { %620 = sbr.rel (%p11044_p13) target bundleno = 6706 (0x1a32), region = 100 }
  0x8e   : > { %9966 = dma.done.wait (%p11045_p5), [#allocation3], 24576   ;;  %p11046_p0 = pmov %p11045_p5 }
  0x90   : > { %9968 = vsyncadd (%p11046_p0), [#allocation3], 4294942720  ;;  %p11047_p6 = pmov %p11046_p0 }
  0x91   : > { %p11048_p9 = pmov %p11046_p0 }
  0x92   : > { %9970 = dma.done.wait (%p11047_p6), [#allocation6], 65536  }
  0x93   : > { %9972 = vsyncadd (%p11048_p9), [#allocation6], 4294901760  ;;  %p11049_p10 = pmov %p11046_p0 }
  0x94   : > { %p11050_p12 = pmov %p11046_p0 }
  0x95   : > { %9974 = dma.done.wait (%p11049_p10), [#allocation9], 4096  }
  0x96   : > { %9976 = vsyncadd (%p11050_p12), [#allocation9], 4294963200  ;;  %p692_p1 = scmp.lt.s32.totalorder %s10136_s2, 1  ;;  %s11051_s17 = sld [smem:[#allocation23_spill]]  ;;  %v8915_v3 = vld [vmem:[#allocation2 + $0x4] ss:$24 sps:$4 sm:$0xff]  }
  0x97   : > { %v8917_v4 = vld [vmem:[#allocation2] ss:$24 sps:$4 sm:$0xff]   ;;  %v8918_v5 = vld [vmem:[#allocation2 + $0xc] ss:$24 sps:$4 sm:$0xff]   ;;  %1361 = vmatprep.subr.bf16.mxu0 %v8915_v3  ;;  %v8924_v8 = vld [vmem:[#allocation2 + $0x3c] ss:$24 sps:$4 sm:$0xff]  }
  0x98   : > { %s10277_s30 = scalar_select %p692_p1, %s10136_s2, 1  ;;  %v8920_v6 = vld [vmem:[#allocation2 + $0x8] ss:$24 sps:$4 sm:$0xff]   ;;  %v8921_v7 = vld [vmem:[#allocation2 + $0x34] ss:$24 sps:$4 sm:$0xff]   ;;  %1402 = vmatprep.subr.bf16.mxu1 %v8918_v5  ;;  %1362 = vmatpush1.bf16.msra.mxu0 %v8917_v4  ;;  %vm10008_vm0 = vmmov 0  }
  0x99   : > { %1403 = vmatpush1.bf16.msra.mxu1 %v8920_v6  ;;  %v8923_v9 = vld [vmem:[#allocation2 + $0x30] ss:$24 sps:$4 sm:$0xff]   ;;  %1363 = vmatprep.subr.bf16.mxu0 %v8921_v7  ;;  %v8927_v11 = vld [vmem:[#allocation2 + $0x64] ss:$24 sps:$4 sm:$0xff]   ;;  %v8929_v13 = vld [vmem:[#allocation2 + $0x60] ss:$24 sps:$4 sm:$0xff]  }
  0x9a   : > { %s8740_s25 = sshll.u32 %s10277_s30, 4  ;;  %v8926_v10 = vld [vmem:[#allocation2 + $0x38] ss:$24 sps:$4 sm:$0xff]   ;;  %1404 = vmatprep.subr.bf16.mxu1 %v8924_v8  ;;  %v8930_v12 = vld [vmem:[#allocation2 + $0x6c] ss:$24 sps:$4 sm:$0xff]   ;;  %s11052_s3 = sld [smem:[#allocation25_spill]] }
  0x9b   : > { %v8932_v14 = vld [vmem:[#allocation2 + $0x68] ss:$24 sps:$4 sm:$0xff]   ;;  %v8933_v15 = vld [vmem:[#allocation2 + $0x94] ss:$24 sps:$4 sm:$0xff]   ;;  %v8938_v18 = vld [vmem:[#allocation2 + $0x98] ss:$24 sps:$4 sm:$0xff]  }
  0x9c   : > { %s696_s4 = scalar_lea.vmem %s11051_s17, %s8740_s25  ;;  %1364 = vmatpush1.bf16.msra.mxu0 %v8923_v9  ;;  %v8936_v16 = vld [vmem:[#allocation2 + $0x9c] ss:$24 sps:$4 sm:$0xff]   ;;  %v8935_v17 = vld [vmem:[#allocation2 + $0x90] ss:$24 sps:$4 sm:$0xff]   ;;  %v8942_v20 = vld [vmem:[#allocation2 + $0xcc] ss:$24 sps:$4 sm:$0xff]  }
  0x9d   : > { %v10283_v0 = vld [vmem:[%s696_s4] sm:$0xff]  ;;  %v10285_v1 = vld [vmem:[%s696_s4 + $0x8] sm:$0xff]  ;;  %1405 = vmatpush1.bf16.msra.mxu1 %v8926_v10  ;;  %1365 = vmatprep.subr.bf16.mxu0 %v8927_v11  ;;  %v8948_v24 = vld [vmem:[#allocation2 + $0xfc] ss:$24 sps:$4 sm:$0xff]   ;;  %s11053_s23 = sld [smem:[#allocation26_spill]]  ;;  %vm1550_vm1 = vcmask 1043456  }
  0x9e   : > { %v705_v2 = vadd.f32 %v10285_v1, %v10283_v0  ;;  %1406 = vmatprep.subr.bf16.mxu1 %v8930_v12  ;;  %v8939_v19 = vld [vmem:[#allocation2 + $0xc4] ss:$24 sps:$4 sm:$0xff]   ;;  %v8941_v21 = vld [vmem:[#allocation2 + $0xc0] ss:$24 sps:$4 sm:$0xff]   ;;  %v8945_v23 = vld [vmem:[#allocation2 + $0xf4] ss:$24 sps:$4 sm:$0xff]  }
  0x9f   : > { %v8944_v22 = vld [vmem:[#allocation2 + $0xc8] ss:$24 sps:$4 sm:$0xff]   ;;  %v8950_v26 = vld [vmem:[#allocation2 + $0xf8] ss:$24 sps:$4 sm:$0xff]   ;;  %v8951_v27 = vld [vmem:[#allocation2 + $0x124] ss:$24 sps:$4 sm:$0xff]  }
  0xa0   : > { %706 = vadd.xlane.f32.xlu0 %v705_v2  ;;  %1366 = vmatpush1.bf16.msra.mxu0 %v8929_v13  ;;  %v8947_v25 = vld [vmem:[#allocation2 + $0xf0] ss:$24 sps:$4 sm:$0xff]   ;;  %v8954_v28 = vld [vmem:[#allocation2 + $0x12c] ss:$24 sps:$4 sm:$0xff]   ;;  %v8953_v29 = vld [vmem:[#allocation2 + $0x120] ss:$24 sps:$4 sm:$0xff]   ;;  %v723_v13 = vlaneseq }
  0xa1   : > { %1407 = vmatpush1.bf16.msra.mxu1 %v8932_v14  ;;  %1367 = vmatprep.subr.bf16.mxu0 %v8933_v15  ;;  %v8956_v30 = vld [vmem:[#allocation2 + $0x128] ss:$24 sps:$4 sm:$0xff]   ;;  %v8957_v31 = vld [vmem:[#allocation2 + $0x154] ss:$24 sps:$4 sm:$0xff]   ;;  %v8962_v34 = vld [vmem:[#allocation2 + $0x158] ss:$24 sps:$4 sm:$0xff]  }
  0xa2   : > { %1408 = vmatprep.subr.bf16.mxu1 %v8936_v16  ;;  %v8960_v32 = vld [vmem:[#allocation2 + $0x15c] ss:$24 sps:$4 sm:$0xff]   ;;  %v8959_v33 = vld [vmem:[#allocation2 + $0x150] ss:$24 sps:$4 sm:$0xff]   ;;  %v8966_v36 = vld [vmem:[#allocation2 + $0x18c] ss:$24 sps:$4 sm:$0xff]  }
  0xa3   : > { %v8963_v35 = vld [vmem:[#allocation2 + $0x184] ss:$24 sps:$4 sm:$0xff]   ;;  %v8965_v37 = vld [vmem:[#allocation2 + $0x180] ss:$24 sps:$4 sm:$0xff]   ;;  %v8969_v39 = vld [vmem:[#allocation2 + $0x1b4] ss:$24 sps:$4 sm:$0xff]  }
  0xa4   : > { %1368 = vmatpush1.bf16.msra.mxu0 %v8935_v17  ;;  %v8968_v38 = vld [vmem:[#allocation2 + $0x188] ss:$24 sps:$4 sm:$0xff]   ;;  %v8972_v40 = vld [vmem:[#allocation2 + $0x1bc] ss:$24 sps:$4 sm:$0xff]   ;;  %v8974_v42 = vld [vmem:[#allocation2 + $0x1b8] ss:$24 sps:$4 sm:$0xff]  }
  0xa5   : > { %1409 = vmatpush1.bf16.msra.mxu1 %v8938_v18  ;;  %1369 = vmatprep.subr.bf16.mxu0 %v8939_v19  ;;  %v8971_v41 = vld [vmem:[#allocation2 + $0x1b0] ss:$24 sps:$4 sm:$0xff]   ;;  %v8975_v43 = vld [vmem:[#allocation2 + $0x1e4] ss:$24 sps:$4 sm:$0xff]   ;;  %v8977_v51 = vld [vmem:[#allocation2 + $0x1e0] ss:$24 sps:$4 sm:$0xff]  }
  0xa6   : > { %1410 = vmatprep.subr.bf16.mxu1 %v8942_v20  ;;  %v8978_v52 = vld [vmem:[#allocation2 + $0x1ec] ss:$24 sps:$4 sm:$0xff]   ;;  %v8980_v53 = vld [vmem:[#allocation2 + $0x1e8] ss:$24 sps:$4 sm:$0xff]   ;;  %v8984_v56 = vld [vmem:[#allocation2 + $0x21c] ss:$24 sps:$4 sm:$0xff]  }
  0xa7   : > { %v8981_v54 = vld [vmem:[#allocation2 + $0x214] ss:$24 sps:$4 sm:$0xff]   ;;  %v8983_v55 = vld [vmem:[#allocation2 + $0x210] ss:$24 sps:$4 sm:$0xff]   ;;  %v8987_v58 = vld [vmem:[#allocation2 + $0x244] ss:$24 sps:$4 sm:$0xff]  }
  0xa8   : > { %1370 = vmatpush1.bf16.msra.mxu0 %v8941_v21  ;;  %v8986_v57 = vld [vmem:[#allocation2 + $0x218] ss:$24 sps:$4 sm:$0xff]   ;;  %v8990_v60 = vld [vmem:[#allocation2 + $0x24c] ss:$24 sps:$4 sm:$0xff]   ;;  %v8992_v61 = vld [vmem:[#allocation2 + $0x248] ss:$24 sps:$4 sm:$0xff]  }
  0xa9   : > { %1411 = vmatpush1.bf16.msra.mxu1 %v8944_v22  ;;  %1371 = vmatprep.subr.bf16.mxu0 %v8945_v23  ;;  %v8989_v59 = vld [vmem:[#allocation2 + $0x240] ss:$24 sps:$4 sm:$0xff]   ;;  %v8993_v62 = vld [vmem:[#allocation2 + $0x274] ss:$24 sps:$4 sm:$0xff]   ;;  %v8999_v2 = vld [vmem:[#allocation2 + $0x2a4] ss:$24 sps:$4 sm:$0xff]  }
  0xaa   : > { %1412 = vmatprep.subr.bf16.mxu1 %v8948_v24  ;;  %v8996_v63 = vld [vmem:[#allocation2 + $0x27c] ss:$24 sps:$4 sm:$0xff]   ;;  %v9002_v3 = vld [vmem:[#allocation2 + $0x2ac] ss:$24 sps:$4 sm:$0xff]   ;;  %v9001_v4 = vld [vmem:[#allocation2 + $0x2a0] ss:$24 sps:$4 sm:$0xff]  }
  0xab   : > { %v9004_v5 = vld [vmem:[#allocation2 + $0x2a8] ss:$24 sps:$4 sm:$0xff]   ;;  %v9005_v6 = vld [vmem:[#allocation2 + $0x2d4] ss:$24 sps:$4 sm:$0xff]   ;;  %v9010_v9 = vld [vmem:[#allocation2 + $0x2d8] ss:$24 sps:$4 sm:$0xff]  }
  0xac   : > { %1372 = vmatpush1.bf16.msra.mxu0 %v8947_v25  ;;  %v9008_v7 = vld [vmem:[#allocation2 + $0x2dc] ss:$24 sps:$4 sm:$0xff]   ;;  %v9007_v8 = vld [vmem:[#allocation2 + $0x2d0] ss:$24 sps:$4 sm:$0xff]   ;;  %v10299_v15 = vshrl.u32 %v723_v13, 7  ;;  %s11054_s22 = sld [smem:[#allocation24_spill]] }
  0xad   : > { %1413 = vmatpush1.bf16.msra.mxu1 %v8950_v26  ;;  %1373 = vmatprep.subr.bf16.mxu0 %v8951_v27  ;;  %v9013_v10 = vld [vmem:[#allocation2 + $0x14] ss:$24 sps:$4 sm:$0xff]   ;;  %v703_v18 = vld [vmem:[%s11052_s3] sm:$0x3]  ;;  %vm1534_vm2 = vcmask 64512   ;;  %s11055_s1 = sld [smem:[#allocation29_spill]] }
  0xae   : > { %1414 = vmatprep.subr.bf16.mxu1 %v8954_v28  ;;  %v10302_v16 = vsub.s32 1, %v10299_v15  ;;  %v10305_v17 = vsub.s32 0, %v10299_v15  ;;  %v704_v19 = vld [vmem:[%s11053_s23] sm:$0x3]  ;;  %s11056_s24 = sld [smem:[#allocation16_spill]]  ;;  %s11057_s23 = sld [smem:[#allocation30_spill]] }
  0xaf   : > { %s11058_s21 = sld [smem:[#allocation21_spill]]  ;;  %s8737_s27 = sshll.u32 %s10136_s2, 4  ;;  %vm7743_vm3 = vcmask 16384  }
  0xb0   : > { %1374 = vmatpush1.bf16.msra.mxu0 %v8953_v29  ;;  %v730_v20 = vrot.slane %v703_v18, %v10302_v16  ;;  %v726_v21 = vrot.slane %v703_v18, %v10305_v17  ;;  %v743_v24 = vrot.slane %v704_v19, %v10302_v16  ;;  %v739_v26 = vrot.slane %v704_v19, %v10305_v17  ;;  %s10009_s17 = smov [#allocation10]  }
  0xb1   : > { %1415 = vmatpush1.bf16.msra.mxu1 %v8956_v30  ;;  %1375 = vmatprep.subr.bf16.mxu0 %v8957_v31  ;;  %s9925_s4 = sshll.u32 %s10009_s17, 4  ;;  %s9926_s4 = int_to_ptr.vmem [resolvable:$false] %s9925_s4 }
  0xb2   : > { %1416 = vmatprep.subr.bf16.mxu1 %v8960_v32  ;;  %v9011_v32 = vld [vmem:[#allocation2 + $0x10] ss:$24 sps:$4 sm:$0xff]   ;;  %s699_s25 = scalar_lea.vmem %s11054_s22, %s10277_s30  ;;  %s11059_s30 = sld [smem:[#allocation31_spill]] }
  0xb4   : > { %1376 = vmatpush1.bf16.msra.mxu0 %v8959_v33  ;;  %s690_s3 = sand.u32 1, %s11056_s24  }
  0xb5   : > { %1417 = vmatpush1.bf16.msra.mxu1 %v8962_v34  ;;  %1377 = vmatprep.subr.bf16.mxu0 %v8963_v35  ;;  %v9016_v34 = vld [vmem:[#allocation2 + $0x44] ss:$24 sps:$4 sm:$0xff]   ;;  %v9014_v35 = vld [vmem:[#allocation2 + $0x40] ss:$24 sps:$4 sm:$0xff]   ;;  %s691_s28 = scalar_lea.vmem [#allocation10], %s690_s3  ;;  %s7746_s19 = scalar_lea.sflag [#allocation4], %s690_s3 }
  0xb6   : > { %1418 = vmatprep.subr.bf16.mxu1 %v8966_v36  ;;  %v9019_v36 = vld [vmem:[#allocation2 + $0x74] ss:$24 sps:$4 sm:$0xff]   ;;  %s7758_s10 = sshll.u32 %s691_s28, 4  ;;  %p11060_p3 = scmp.ne.s32.totalorder %s11058_s21, 0  ;;  %s10945_s10 = int_to_ptr.vmem [resolvable:$true] %s7758_s10 }
  0xb7   : > { %s9921_s2 = scalar_lea.vmem %s10945_s10, 16  ;;  %p9928_p8 = scmp.lt.s32.totalorder %s10945_s10, %s9926_s4 }
  0xb8   : > { %1378 = vmatpush1.bf16.msra.mxu0 %v8965_v37  ;;  %v9017_v37 = vld [vmem:[#allocation2 + $0x70] ss:$24 sps:$4 sm:$0xff]   ;;  %s10943_s0 = scalar_lea.hbm %s11059_s30, %s8737_s27  ;;  %p9922_p2 = scmp.ne.s32.totalorder %s10945_s10, %s9921_s2 }
  0xb9   : > { %1419 = vmatpush1.bf16.msra.mxu1 %v8968_v38  ;;  %1379 = vmatprep.subr.bf16.mxu0 %v8969_v39  ;;  %v9022_v38 = vld [vmem:[#allocation2 + $0xa4] ss:$24 sps:$4 sm:$0xff]   ;;  %v9020_v39 = vld [vmem:[#allocation2 + $0xa0] ss:$24 sps:$4 sm:$0xff]  }
  0xba   : > { %1420 = vmatprep.subr.bf16.mxu1 %v8972_v40  ;;  %v9025_v40 = vld [vmem:[#allocation2 + $0xd4] ss:$24 sps:$4 sm:$0xff]   ;;  %p9923_p4 = pnand %p9922_p2, %p11060_p3 }
  0xbc   : > { %1380 = vmatpush1.bf16.msra.mxu0 %v8971_v41  ;;  %v9023_v41 = vld [vmem:[#allocation2 + $0xd0] ss:$24 sps:$4 sm:$0xff]   ;;  %p9924_p7 = pneg %p9923_p4 }
  0xbd   : > { %1421 = vmatpush1.bf16.msra.mxu1 %v8974_v42  ;;  %1381 = vmatprep.subr.bf16.mxu0 %v8975_v43  ;;  %v9028_v42 = vld [vmem:[#allocation2 + $0x104] ss:$24 sps:$4 sm:$0xff]   ;;  %v9026_v43 = vld [vmem:[#allocation2 + $0x100] ss:$24 sps:$4 sm:$0xff]  }
  0xbe   : > { %1422 = vmatprep.subr.bf16.mxu1 %v8978_v52  ;;  %v9043_v52 = vld [vmem:[#allocation2 + $0x1f4] ss:$24 sps:$4 sm:$0xff]  }
  0xc0   : > { %1382 = vmatpush1.bf16.msra.mxu0 %v8977_v51  ;;  %v9038_v51 = vld [vmem:[#allocation2 + $0x1c0] ss:$24 sps:$4 sm:$0xff]  }
  0xc1   : > { %1423 = vmatpush1.bf16.msra.mxu1 %v8980_v53  ;;  %1383 = vmatprep.subr.bf16.mxu0 %v8981_v54  ;;  %v9041_v53 = vld [vmem:[#allocation2 + $0x1f0] ss:$24 sps:$4 sm:$0xff]   ;;  %v9046_v54 = vld [vmem:[#allocation2 + $0x224] ss:$24 sps:$4 sm:$0xff]  }
  0xc2   : > { %1424 = vmatprep.subr.bf16.mxu1 %v8984_v56  ;;  %v9049_v56 = vld [vmem:[#allocation2 + $0x254] ss:$24 sps:$4 sm:$0xff]  }
  0xc4   : > { %1384 = vmatpush1.bf16.msra.mxu0 %v8983_v55  ;;  %v9044_v55 = vld [vmem:[#allocation2 + $0x220] ss:$24 sps:$4 sm:$0xff]  }
  0xc5   : > { %1425 = vmatpush1.bf16.msra.mxu1 %v8986_v57  ;;  %1385 = vmatprep.subr.bf16.mxu0 %v8987_v58  ;;  %v9047_v57 = vld [vmem:[#allocation2 + $0x250] ss:$24 sps:$4 sm:$0xff]   ;;  %v9052_v58 = vld [vmem:[#allocation2 + $0x284] ss:$24 sps:$4 sm:$0xff]  }
  0xc6   : > { %1426 = vmatprep.subr.bf16.mxu1 %v8990_v60  ;;  %v9055_v60 = vld [vmem:[#allocation2 + $0x2b4] ss:$24 sps:$4 sm:$0xff]  }
  0xc8   : > { %1386 = vmatpush1.bf16.msra.mxu0 %v8989_v59  ;;  %v9050_v59 = vld [vmem:[#allocation2 + $0x280] ss:$24 sps:$4 sm:$0xff]  }
  0xc9   : > { %1427 = vmatpush1.bf16.msra.mxu1 %v8992_v61  ;;  %1387 = vmatprep.subr.bf16.mxu0 %v8993_v62  ;;  %v9053_v61 = vld [vmem:[#allocation2 + $0x2b0] ss:$24 sps:$4 sm:$0xff]   ;;  %v9058_v62 = vld [vmem:[#allocation2 + $0x2e4] ss:$24 sps:$4 sm:$0xff]  }
  0xca   : > { %1428 = vmatprep.subr.bf16.mxu1 %v8996_v63  ;;  %v9056_v63 = vld [vmem:[#allocation2 + $0x2e0] ss:$24 sps:$4 sm:$0xff]  }
 0x12d   : > { %v707_v44 = vpop.xlane.xlu0 %706 }
 0x12e   : > { %v709_v45 = vmul.f32 0.00390625, %v707_v44  ;;  %v9031_v44 = vld [vmem:[#allocation2 + $0x134] ss:$24 sps:$4 sm:$0xff]  }
 0x130   : > { %v10290_v46 = vsub.f32 %v10283_v0, %v709_v45  ;;  %v10293_v47 = vsub.f32 %v10285_v1, %v709_v45  ;;  %v8995_v0 = vld [vmem:[#allocation2 + $0x270] ss:$24 sps:$4 sm:$0xff]  }
 0x131   : > { %v8998_v1 = vld [vmem:[#allocation2 + $0x278] ss:$24 sps:$4 sm:$0xff]   ;;  %1388 = vmatpush1.bf16.msra.mxu0 %v8995_v0  ;;  %v10007_v0 = vmov 0.0  }
 0x132   : > { %v712_v48 = vmul.f32 %v10290_v46, %v10290_v46  ;;  %v713_v49 = vmul.f32 %v10293_v47, %v10293_v47  ;;  %1429 = vmatpush1.bf16.msra.mxu1 %v8998_v1  ;;  %1389 = vmatprep.subr.bf16.mxu0 %v8999_v2  ;;  %v9029_v45 = vld [vmem:[#allocation2 + $0x130] ss:$24 sps:$4 sm:$0xff]   ;;  %v10336_v1 = vsub.s32 2, %v10299_v15  ;;  %v10341_v2 = vld [vmem:[%s10990_s5] sm:$0x3f] }
 0x133   : > { %1430 = vmatprep.subr.bf16.mxu1 %v9002_v3 }
 0x134   : > { %v714_v50 = vadd.f32 %v713_v49, %v712_v48  ;;  %v9037_v48 = vld [vmem:[#allocation2 + $0x194] ss:$24 sps:$4 sm:$0xff]   ;;  %v9035_v49 = vld [vmem:[#allocation2 + $0x190] ss:$24 sps:$4 sm:$0xff]   ;;  %v862_v3 = vrot.slane %v10341_v2, %v10336_v1 }
 0x135   : > { %1390 = vmatpush1.bf16.msra.mxu0 %v9001_v4  ;;  %v854_v4 = vrot.slane %v10341_v2, %v10305_v17 }
 0x136   : > { %715 = vadd.xlane.f32.xlu0 %v714_v50  ;;  %1431 = vmatpush1.bf16.msra.mxu1 %v9004_v5  ;;  %v9040_v50 = vld [vmem:[#allocation2 + $0x1c4] ss:$24 sps:$4 sm:$0xff]  }
 0x137   : > { %1391 = vmatprep.subr.bf16.mxu0 %v9005_v6  ;;  %1432 = vmatprep.subr.bf16.mxu1 %v9008_v7 }
 0x139   : > { %1392 = vmatpush1.bf16.msra.mxu0 %v9007_v8 }
 0x13a   : > { %1433 = vmatpush1.bf16.msra.mxu1 %v9010_v9  ;;  %1443 = vmatprep.subr.bf16.mxu0 %v9013_v10 }
 0x13b   : > { %8779 = vmatprep.subr.bf16.mxu1 %v10007_v0 }
 0x1c3   : > { %v716_v11 = vpop.xlane.xlu0 %715 }
 0x1c4   : > { %v717_v12 = vmul.f32 0.00390625, %v716_v11 }
 0x1c6   : > { %v718_v14 = vadd.f32 1e-12, %v717_v12 }
 0x1c8   : > { %9747 = vrsqrt.f32 %v718_v14 }
 0x1d2   : > { %v9748_v22 = vpop.eup %9747 }
 0x1d3   : > { %v721_v23 = vmul.f32 %v9748_v22, %v10293_v47  ;;  %v720_v25 = vmul.f32 %v9748_v22, %v10290_v46  ;;  %v9034_v46 = vld [vmem:[#allocation2 + $0x164] ss:$24 sps:$4 sm:$0xff]   ;;  %v9032_v47 = vld [vmem:[#allocation2 + $0x160] ss:$24 sps:$4 sm:$0xff]  }
 0x1d5   : > { %v734_v27 = vmul.f32 %v730_v20, %v721_v23  ;;  %v733_v28 = vmul.f32 %v726_v21, %v720_v25  ;;  %v10351_v21 = vsub.s32 4, %v10299_v15 }
 0x1d7   : > { %v10319_v29 = vadd.f32 %v743_v24, %v734_v27  ;;  %v10321_v30 = vadd.f32 %v739_v26, %v733_v28  ;;  %v870_v22 = vrot.slane %v10341_v2, %v10351_v21 }
 0x1d9   : > { %v752_v31 = vpack.c.bf16 %v10319_v29, %v10319_v29  ;;  %v10327_v33 = vpack.c.bf16 %v10321_v30, %v10321_v30 }
 0x1db   : > { %1393 = vmatprep.mubr.bf16.mxu0 %v752_v31  ;;  %1434 = vmatprep.mubr.bf16.mxu1 %v752_v31 }
 0x1dc   : > { %1394 = vmatmul.mubr.bf16.vlgmr.msra.gmra.mrb[0].mxu0 %v10327_v33  ;;  %1435 = vmatmul.mubr.bf16.vlgmr.msra.gmra.mrb[0].mxu1 %v10327_v33 }
 0x1dd   : > { %1444 = vmatpush1.bf16.msra.mxu0 %v9011_v32  ;;  %1475 = vmatprep.mubr.bf16.mxu0 %v752_v31  ;;  %v748_v32 = vld [vmem:[%s699_s25] sm:$0x1] }
 0x1de   : > { %1445 = vmatprep.subr.bf16.mxu0 %v9016_v34  ;;  %8781 = vmatprep.mubr.msk.bf16.mxu1 %vm10008_vm0, %v10007_v0 }
 0x1e1   : > { %1446 = vmatpush1.bf16.msra.mxu0 %v9014_v35 }
 0x1e2   : > { %1447 = vmatprep.subr.bf16.mxu0 %v9019_v36 }
 0x1e5   : > { %1448 = vmatpush1.bf16.msra.mxu0 %v9017_v37 }
 0x1e6   : > { %1449 = vmatprep.subr.bf16.mxu0 %v9022_v38 }
 0x1e9   : > { %1450 = vmatpush1.bf16.msra.mxu0 %v9020_v39 }
 0x1ea   : > { %1451 = vmatprep.subr.bf16.mxu0 %v9025_v40 }
 0x1ed   : > { %1452 = vmatpush1.bf16.msra.mxu0 %v9023_v41 }
 0x1ee   : > { %1453 = vmatprep.subr.bf16.mxu0 %v9028_v42 }
 0x1f1   : > { %1454 = vmatpush1.bf16.msra.mxu0 %v9026_v43 }
 0x1f2   : > { %1455 = vmatprep.subr.bf16.mxu0 %v9031_v44 }
 0x1f5   : > { %1456 = vmatpush1.bf16.msra.mxu0 %v9029_v45 }
 0x1f6   : > { %1457 = vmatprep.subr.bf16.mxu0 %v9034_v46 }
 0x1f9   : > { %1458 = vmatpush1.bf16.msra.mxu0 %v9032_v47 }
 0x1fa   : > { %1459 = vmatprep.subr.bf16.mxu0 %v9037_v48  ;;  %v10368_v48 = vsub.s32 3, %v10299_v15 }
 0x1fd   : > { %1460 = vmatpush1.bf16.msra.mxu0 %v9035_v49  ;;  %v866_v49 = vrot.slane %v10341_v2, %v10368_v48 }
 0x1fe   : > { %1461 = vmatprep.subr.bf16.mxu0 %v9040_v50  ;;  %v10373_v50 = vsub.s32 5, %v10299_v15 }
 0x201   : > { %1462 = vmatpush1.bf16.msra.mxu0 %v9038_v51  ;;  %v858_v51 = vrot.slane %v10341_v2, %v10302_v16 }
 0x202   : > { %1463 = vmatprep.subr.bf16.mxu0 %v9043_v52 }
 0x205   : > { %1464 = vmatpush1.bf16.msra.mxu0 %v9041_v53 }
 0x206   : > { %1465 = vmatprep.subr.bf16.mxu0 %v9046_v54  ;;  %v874_v54 = vrot.slane %v10341_v2, %v10373_v50 }
 0x209   : > { %1466 = vmatpush1.bf16.msra.mxu0 %v9044_v55 }
 0x20a   : > { %1467 = vmatprep.subr.bf16.mxu0 %v9049_v56 }
 0x20d   : > { %1468 = vmatpush1.bf16.msra.mxu0 %v9047_v57 }
 0x20e   : > { %1469 = vmatprep.subr.bf16.mxu0 %v9052_v58 }
 0x211   : > { %1470 = vmatpush1.bf16.msra.mxu0 %v9050_v59 }
 0x212   : > { %1471 = vmatprep.subr.bf16.mxu0 %v9055_v60 }
 0x215   : > { %1472 = vmatpush1.bf16.msra.mxu0 %v9053_v61 }
 0x216   : > { %1473 = vmatprep.subr.bf16.mxu0 %v9058_v62 }
 0x219   : > { %1474 = vmatpush1.bf16.msra.mxu0 %v9056_v63 }
 0x21c   : > { %1476 = vmatmul.mubr.bf16.vlgmr.msra.gmra.mrb[4].mxu0 %v10327_v33  ;;  %v749_v33 = vsub.f32 1.0, %v748_v32  ;;  %v9065_v32 = vld [vmem:[%s10991_s6 + $0x20] ss:$8 sps:$4 sm:$0xff]  }
 0x21e   : > { %v750_v34 = vmul.f32 -1e+09, %v749_v33  ;;  %v9070_v33 = vld [vmem:[%s10991_s6 + $0x34] ss:$8 sps:$4 sm:$0xff]  }
 0x220   : > { %v10362_v35 = vrot.slane %v750_v34, %v10305_v17  ;;  %v9068_v34 = vld [vmem:[%s10991_s6 + $0x30] ss:$8 sps:$4 sm:$0xff]  }
 0x2af   : > { %v1395_v5 = vpop.f32.mrb[0].mxu0  ;;  %v1436_v6 = vpop.f32.mrb[0].mxu1 }
 0x2b0   : > { %v1437_v7 = vadd.f32 %v1436_v6, %v862_v3  ;;  %v1397_v8 = vpop.f32.mrb[1].mxu0  ;;  %v1438_v9 = vpop.f32.mrb[1].mxu1  ;;  %v1396_v10 = vadd.f32 %v1395_v5, %v854_v4 }
 0x2b1   : > { %v1399_v11 = vpop.f32.mrb[2].mxu0  ;;  %v1440_v12 = vpop.f32.mrb[2].mxu1  ;;  %v1439_v53 = vadd.f32 %v1438_v9, %v866_v49  ;;  %v1398_v56 = vadd.f32 %v1397_v8, %v858_v51  ;;  %v9091_v49 = vld [vmem:[%s10991_s6 + $0xa4] ss:$8 sps:$4 sm:$0xff]   ;;  %v9089_v51 = vld [vmem:[%s10991_s6 + $0xa0] ss:$8 sps:$4 sm:$0xff]  }
 0x2b2   : > { %v1486_v13 = vpack.c.bf16 %v1437_v7, %v1437_v7  ;;  %v1400_v14 = vpop.f32.mrb[3].mxu0  ;;  %v1441_v18 = vpop.f32.mrb[3].mxu1  ;;  %v1484_v19 = vmul.f32 0.088388346, %v1396_v10 }
 0x2b3   : > { %v1596_v58 = vpack.c.bf16 %v1439_v53, %v1439_v53  ;;  %v1594_v60 = vmul.f32 0.088388346, %v1398_v56  ;;  %v9092_v53 = vld [vmem:[%s10991_s6 + $0xb0] ss:$8 sps:$4 sm:$0xff]   ;;  %v9100_v56 = vld [vmem:[%s10991_s6 + $0xd4] ss:$8 sps:$4 sm:$0xff]  }
 0x2b4   : > { %8780 = vmatpush3.bf16.xpose.msra.mxu1 %v1486_v13  ;;  %v1485_v20 = vpack.c.bf16 %v1484_v19, %v1484_v19 }
 0x2b5   : > { %8785 = vmatprep.subr.bf16.mxu1 %v10007_v0  ;;  %v1595_v62 = vpack.c.bf16 %v1594_v60, %v1594_v60  ;;  %v9106_v60 = vld [vmem:[%s10991_s6 + $0xf4] ss:$8 sps:$4 sm:$0xff]  }
 0x2bb   : > { %8782 = vmatmul.mubr.bf16.vlgmr.msra.gmra.mrb[4].mxu1 %v1485_v20  ;;  %v9061_v20 = vld [vmem:[%s10991_s6 + $0x4] ss:$8 sps:$4 sm:$0xff]  }
 0x2bc   : > { %8787 = vmatprep.mubr.msk.bf16.mxu1 %vm10008_vm0, %v10007_v0 }
 0x2ef   : > { %v1477_v23 = vpop.f32.mrb[4].mxu0 }
 0x2f0   : > { %v1478_v24 = vadd.f32 %v1477_v23, %v870_v22  ;;  %v1479_v25 = vpop.f32.mrb[5].mxu0 }
 0x2f1   : > { %v1481_v26 = vpop.f32.mrb[6].mxu0  ;;  %v1480_v59 = vadd.f32 %v1479_v25, %v874_v54  ;;  %v9059_v25 = vld [vmem:[%s10991_s6] ss:$8 sps:$4 sm:$0xff]   ;;  %v9097_v54 = vld [vmem:[%s10991_s6 + $0xc4] ss:$8 sps:$4 sm:$0xff]  }
 0x2f2   : > { %v1487_v27 = vpack.c.bf16 %v1478_v24, %v1478_v24  ;;  %v1482_v28 = vpop.f32.mrb[7].mxu0 }
 0x2f3   : > { %v1597_v61 = vpack.c.bf16 %v1480_v59, %v1480_v59  ;;  %v9062_v28 = vld [vmem:[%s10991_s6 + $0x10] ss:$8 sps:$4 sm:$0xff]   ;;  %v9101_v59 = vld [vmem:[%s10991_s6 + $0xe0] ss:$8 sps:$4 sm:$0xff]  }
 0x2f4   : > { %v1552_v31 = vsel %vm1550_vm1, %v1487_v27, 0  ;;  %v9064_v27 = vld [vmem:[%s10991_s6 + $0x14] ss:$8 sps:$4 sm:$0xff]  }
 0x2f5   : > { %8786 = vmatpush3.bf16.msra.mxu1 %v1552_v31  ;;  %v1654_v63 = vsel %vm1550_vm1, %v1597_v61, 0  ;;  %v9067_v31 = vld [vmem:[%s10991_s6 + $0x24] ss:$8 sps:$4 sm:$0xff]   ;;  %v9104_v61 = vld [vmem:[%s10991_s6 + $0xf0] ss:$8 sps:$4 sm:$0xff]  }
 0x2f6   : > { %8791 = vmatprep.subr.bf16.mxu1 %v10007_v0 }
 0x38e   : > { %v1528_v36 = vpop.f32.mrb[4].mxu1 }
 0x38f   : > { %v1529_v37 = vadd.f32 %v1528_v36, %v10362_v35  ;;  %v8783_v38 = vpop.f32.mrb[5].mxu1  ;;  %v9073_v36 = vld [vmem:[%s10991_s6 + $0x44] ss:$8 sps:$4 sm:$0xff]  }
 0x390   : > { %v1531_v39 = vpop.f32.mrb[6].mxu1  ;;  %v9076_v38 = vld [vmem:[%s10991_s6 + $0x54] ss:$8 sps:$4 sm:$0xff]  }
 0x391   : > { %v8784_v40 = vpop.f32.mrb[7].mxu1  ;;  %v1535_v41 = vsel %vm1534_vm2, %v1529_v37, -inf  ;;  %v9074_v39 = vld [vmem:[%s10991_s6 + $0x50] ss:$8 sps:$4 sm:$0xff]  }
 0x392   : > { %1536 = vmax.xlane.f32.xlu1 %v1535_v41  ;;  %v9079_v40 = vld [vmem:[%s10991_s6 + $0x64] ss:$8 sps:$4 sm:$0xff]   ;;  %v9077_v41 = vld [vmem:[%s10991_s6 + $0x60] ss:$8 sps:$4 sm:$0xff]  }
 0x41f   : > { %v1537_v42 = vpop.xlane.xlu1 %1536 }
 0x420   : > { %v1538_v43 = vsub.f32 %v1529_v37, %v1537_v42  ;;  %v9071_v37 = vld [vmem:[%s10991_s6 + $0x40] ss:$8 sps:$4 sm:$0xff]   ;;  %v9082_v42 = vld [vmem:[%s10991_s6 + $0x74] ss:$8 sps:$4 sm:$0xff]  }
 0x422   : > { %v1539_v44 = vmul.f32 1.442695, %v1538_v43  ;;  %v9080_v43 = vld [vmem:[%s10991_s6 + $0x70] ss:$8 sps:$4 sm:$0xff]  }
 0x424   : > { %9749 = vpow2.f32 %v1539_v44  ;;  %v9085_v44 = vld [vmem:[%s10991_s6 + $0x84] ss:$8 sps:$4 sm:$0xff]  }
 0x42e   : > { %v9750_v45 = vpop.eup %9749 }
 0x42f   : > { %v1541_v46 = vsel %vm1534_vm2, %v9750_v45, 0.0 }
 0x430   : > { %1542 = vadd.xlane.f32.xlu1 %v1541_v46  ;;  %v9088_v46 = vld [vmem:[%s10991_s6 + $0x94] ss:$8 sps:$4 sm:$0xff]  }
 0x4bd   : > { %v1543_v47 = vpop.xlane.xlu1 %1542 }
 0x4be   : > { %9751 = vrcp.f32 %v1543_v47  ;;  %v9086_v47 = vld [vmem:[%s10991_s6 + $0x90] ss:$8 sps:$4 sm:$0xff]  }
 0x4c8   : > { %v9752_v52 = vpop.eup %9751 }
 0x4c9   : > { %v1545_v55 = vmul.f32 %v9752_v52, %v9750_v45  ;;  %v9083_v45 = vld [vmem:[%s10991_s6 + $0x80] ss:$8 sps:$4 sm:$0xff]   ;;  %v9094_v52 = vld [vmem:[%s10991_s6 + $0xb4] ss:$8 sps:$4 sm:$0xff]  }
 0x4cb   : > { %v1546_v57 = vpack.c.bf16 %v1545_v55, %v1545_v55  ;;  %v9095_v55 = vld [vmem:[%s10991_s6 + $0xc0] ss:$8 sps:$4 sm:$0xff]  }
 0x4cd   : > { %8788 = vmatmul.mubr.msk.bf16.vlgmr.msra.gmra.mrb[8].mxu1 %vm1534_vm2, %v1546_v57  ;;  %v9098_v57 = vld [vmem:[%s10991_s6 + $0xd0] ss:$8 sps:$4 sm:$0xff]  }
 0x4ce   : > { %8792 = vmatpush3.bf16.xpose.msra.mxu1 %v1596_v58  ;;  %8793 = vmatprep.mubr.msk.bf16.mxu1 %vm10008_vm0, %v10007_v0  ;;  %v9103_v58 = vld [vmem:[%s10991_s6 + $0xe4] ss:$8 sps:$4 sm:$0xff]  }
 0x4cf   : > { %8797 = vmatprep.subr.bf16.mxu1 %v10007_v0 }
 0x4d5   : > { %8794 = vmatmul.mubr.bf16.vlgmr.msra.gmra.mrb[12].mxu1 %v1595_v62 }
 0x4d6   : > { %8798 = vmatpush3.bf16.msra.mxu1 %v1654_v63  ;;  %8799 = vmatprep.mubr.msk.bf16.mxu1 %vm10008_vm0, %v10007_v0 }
 0x4d7   : > { %1902 = vmatprep.subr.bf16.mxu1 %v9061_v20 }
 0x5a0   : > { %v10386_v2 = vpop.f32.mrb[8].mxu1 }
 0x5a1   : > { %v8789_v3 = vpop.f32.mrb[9].mxu1 }
 0x5a2   : > { %v1591_v4 = vpop.f32.mrb[10].mxu1 }
 0x5a3   : > { %v8790_v5 = vpop.f32.mrb[11].mxu1  ;;  %v1696_v4 = vpack.c.bf16 %v10386_v2, %v10386_v2 }
 0x5a8   : > { %v1632_v6 = vpop.f32.mrb[12].mxu1 }
 0x5a9   : > { %v1633_v7 = vadd.f32 %v1632_v6, %v10362_v35  ;;  %v8795_v8 = vpop.f32.mrb[13].mxu1 }
 0x5aa   : > { %v1635_v9 = vpop.f32.mrb[14].mxu1 }
 0x5ab   : > { %v8796_v10 = vpop.f32.mrb[15].mxu1  ;;  %v1638_v11 = vsel %vm1534_vm2, %v1633_v7, -inf }
 0x5ac   : > { %1639 = vmax.xlane.f32.xlu0 %v1638_v11 }
 0x639   : > { %v1640_v12 = vpop.xlane.xlu0 %1639 }
 0x63a   : > { %v1641_v13 = vsub.f32 %v1633_v7, %v1640_v12  ;;  %v1730_v7 = vld [vmem:[%s10992_s7] sm:$0x3] }
 0x63b   : > { %v1735_v8 = vrot.slane %v1730_v7, %v10305_v17  ;;  %v1739_v9 = vrot.slane %v1730_v7, %v10302_v16 }
 0x63c   : > { %v1642_v14 = vmul.f32 1.442695, %v1641_v13 }
 0x63e   : > { %9753 = vpow2.f32 %v1642_v14 }
 0x648   : > { %v9754_v18 = vpop.eup %9753 }
 0x649   : > { %v1644_v19 = vsel %vm1534_vm2, %v9754_v18, 0.0 }
 0x64a   : > { %1645 = vadd.xlane.f32.xlu1 %v1644_v19 }
 0x6d7   : > { %v1646_v22 = vpop.xlane.xlu1 %1645 }
 0x6d8   : > { %9755 = vrcp.f32 %v1646_v22  ;;  %v1991_v22 = vld [vmem:[#allocation5] sm:$0xff] }
 0x6e2   : > { %v9756_v23 = vpop.eup %9755 }
 0x6e3   : > { %v1648_v24 = vmul.f32 %v9756_v23, %v9754_v18  ;;  %v1995_v23 = vld [vmem:[#allocation5 + $0x20] sm:$0xff] }
 0x6e5   : > { %v1649_v26 = vpack.c.bf16 %v1648_v24, %v1648_v24  ;;  %v1992_v24 = vld [vmem:[#allocation5 + $0x8] sm:$0xff] }
 0x6e7   : > { %8800 = vmatmul.mubr.msk.bf16.vlgmr.msra.gmra.mrb[16].mxu1 %vm1534_vm2, %v1649_v26  ;;  %v8008_v26 = vcombine.high %v1991_v22, %v1995_v23 }
 0x6e8   : > { %1903 = vmatpush1.bf16.msra.mxu1 %v9059_v25  ;;  %v8007_v25 = vcombine.low %v1991_v22, %v1995_v23  ;;  %v2047_v23 = vld [vmem:[#allocation5 + $0x1c0] sm:$0xff] }
 0x6e9   : > { %1904 = vmatprep.subr.bf16.mxu1 %v9064_v27  ;;  %v1996_v27 = vld [vmem:[#allocation5 + $0x28] sm:$0xff]  ;;  %2801 = vmatprep.subr.bf16.mxu0 %v8008_v26 }
 0x6ea   : > { %2802 = vmatpush1.bf16.msra.mxu0 %v8007_v25  ;;  %v2048_v25 = vld [vmem:[#allocation5 + $0x1c8] sm:$0xff] }
 0x6eb   : > { %v2052_v26 = vld [vmem:[#allocation5 + $0x1e8] sm:$0xff] }
 0x6ec   : > { %1905 = vmatpush1.bf16.msra.mxu1 %v9062_v28  ;;  %v1999_v28 = vld [vmem:[#allocation5 + $0x40] sm:$0xff] }
 0x6ed   : > { %1906 = vmatprep.subr.bf16.mxu1 %v9067_v31  ;;  %v2003_v31 = vld [vmem:[#allocation5 + $0x60] sm:$0xff] }
 0x6f0   : > { %1907 = vmatpush1.bf16.msra.mxu1 %v9065_v32  ;;  %v8009_v32 = vcombine.low %v1992_v24, %v1996_v27 }
 0x6f1   : > { %1908 = vmatprep.subr.bf16.mxu1 %v9070_v33  ;;  %v8010_v33 = vcombine.high %v1992_v24, %v1996_v27  ;;  %v2051_v24 = vld [vmem:[#allocation5 + $0x1e0] sm:$0xff] }
 0x6f4   : > { %1909 = vmatpush1.bf16.msra.mxu1 %v9068_v34  ;;  %v2000_v34 = vld [vmem:[#allocation5 + $0x48] sm:$0xff] }
 0x6f5   : > { %1910 = vmatprep.subr.bf16.mxu1 %v9073_v36  ;;  %v2004_v36 = vld [vmem:[#allocation5 + $0x68] sm:$0xff] }
 0x6f8   : > { %1911 = vmatpush1.bf16.msra.mxu1 %v9071_v37  ;;  %v2007_v37 = vld [vmem:[#allocation5 + $0x80] sm:$0xff] }
 0x6f9   : > { %1912 = vmatprep.subr.bf16.mxu1 %v9076_v38  ;;  %v2011_v38 = vld [vmem:[#allocation5 + $0xa0] sm:$0xff] }
 0x6fc   : > { %1913 = vmatpush1.bf16.msra.mxu1 %v9074_v39  ;;  %v2008_v39 = vld [vmem:[#allocation5 + $0x88] sm:$0xff] }
 0x6fd   : > { %1914 = vmatprep.subr.bf16.mxu1 %v9079_v40  ;;  %v2012_v40 = vld [vmem:[#allocation5 + $0xa8] sm:$0xff] }
 0x700   : > { %1915 = vmatpush1.bf16.msra.mxu1 %v9077_v41  ;;  %v8015_v41 = vcombine.low %v1999_v28, %v2003_v31 }
 0x701   : > { %1916 = vmatprep.subr.bf16.mxu1 %v9082_v42  ;;  %v8017_v42 = vcombine.low %v2000_v34, %v2004_v36 }
 0x704   : > { %1917 = vmatpush1.bf16.msra.mxu1 %v9080_v43  ;;  %v8024_v43 = vcombine.high %v2007_v37, %v2011_v38 }
 0x705   : > { %1918 = vmatprep.subr.bf16.mxu1 %v9085_v44  ;;  %v8026_v44 = vcombine.high %v2008_v39, %v2012_v40 }
 0x708   : > { %1919 = vmatpush1.bf16.msra.mxu1 %v9083_v45  ;;  %v2015_v45 = vld [vmem:[#allocation5 + $0xc0] sm:$0xff] }
 0x709   : > { %1920 = vmatprep.subr.bf16.mxu1 %v9088_v46  ;;  %v2019_v46 = vld [vmem:[#allocation5 + $0xe0] sm:$0xff] }
 0x70c   : > { %1921 = vmatpush1.bf16.msra.mxu1 %v9086_v47  ;;  %v2016_v47 = vld [vmem:[#allocation5 + $0xc8] sm:$0xff] }
 0x70d   : > { %1922 = vmatprep.subr.bf16.mxu1 %v9091_v49  ;;  %v2020_v49 = vld [vmem:[#allocation5 + $0xe8] sm:$0xff] }
 0x710   : > { %1923 = vmatpush1.bf16.msra.mxu1 %v9089_v51  ;;  %v8023_v51 = vcombine.low %v2007_v37, %v2011_v38  ;;  %v8063_v37 = vcombine.low %v2047_v23, %v2051_v24 }
 0x711   : > { %1924 = vmatprep.subr.bf16.mxu1 %v9094_v52  ;;  %v8025_v52 = vcombine.low %v2008_v39, %v2012_v40  ;;  %v2063_v40 = vld [vmem:[#allocation5 + $0x240] sm:$0xff] }
 0x714   : > { %1925 = vmatpush1.bf16.msra.mxu1 %v9092_v53  ;;  %v8032_v53 = vcombine.high %v2015_v45, %v2019_v46 }
 0x715   : > { %1926 = vmatprep.subr.bf16.mxu1 %v9097_v54  ;;  %v8034_v54 = vcombine.high %v2016_v47, %v2020_v49 }
 0x718   : > { %1927 = vmatpush1.bf16.msra.mxu1 %v9095_v55  ;;  %v2023_v55 = vld [vmem:[#allocation5 + $0x100] sm:$0xff] }
 0x719   : > { %1928 = vmatprep.subr.bf16.mxu1 %v9100_v56  ;;  %v2027_v56 = vld [vmem:[#allocation5 + $0x120] sm:$0xff] }
 0x71c   : > { %1929 = vmatpush1.bf16.msra.mxu1 %v9098_v57  ;;  %v2024_v57 = vld [vmem:[#allocation5 + $0x108] sm:$0xff] }
 0x71d   : > { %1930 = vmatprep.subr.bf16.mxu1 %v9103_v58  ;;  %v2028_v58 = vld [vmem:[#allocation5 + $0x128] sm:$0xff] }
 0x71e   : > { %v8041_v7 = vcombine.low %v2024_v57, %v2028_v58 }
 0x720   : > { %1931 = vmatpush1.bf16.msra.mxu1 %v9101_v59  ;;  %v8031_v59 = vcombine.low %v2015_v45, %v2019_v46 }
 0x721   : > { %1932 = vmatprep.subr.bf16.mxu1 %v9106_v60  ;;  %v8033_v60 = vcombine.low %v2016_v47, %v2020_v49  ;;  %v2071_v49 = vld [vmem:[#allocation5 + $0x280] sm:$0xff] }
 0x724   : > { %1933 = vmatpush1.bf16.msra.mxu1 %v9104_v61  ;;  %v8040_v61 = vcombine.high %v2023_v55, %v2027_v56 }
 0x725   : > { %2842 = vmatprep.subr.bf16.mxu1 %v8010_v33  ;;  %v2055_v33 = vld [vmem:[#allocation5 + $0x200] sm:$0xff] }
 0x7ba   : > { %v1690_v62 = vpop.f32.mrb[16].mxu1 }
 0x7bb   : > { %v1697_v63 = vpack.c.bf16 %v1690_v62, %v1690_v62  ;;  %v8801_v3 = vpop.f32.mrb[17].mxu1  ;;  %v8042_v62 = vcombine.high %v2024_v57, %v2028_v58 }
 0x7bc   : > { %v1693_v5 = vpop.f32.mrb[18].mxu1  ;;  %v2035_v3 = vld [vmem:[#allocation5 + $0x160] sm:$0xff] }
 0x7bd   : > { %v8802_v6 = vpop.f32.mrb[19].mxu1  ;;  %1934 = vmatprep.mubr.bf16.mxu1 %v1697_v63  ;;  %v2031_v63 = vld [vmem:[#allocation5 + $0x140] sm:$0xff]  ;;  %v2036_v5 = vld [vmem:[#allocation5 + $0x168] sm:$0xff] }
 0x7be   : > { %1935 = vmatmul.mubr.bf16.vlgmr.msra.gmra.mrb[20].mxu1 %v1696_v4  ;;  %v2032_v4 = vld [vmem:[#allocation5 + $0x148] sm:$0xff]  ;;  %v8039_v6 = vcombine.low %v2023_v55, %v2027_v56 }
 0x7bf   : > { %2843 = vmatpush1.bf16.msra.mxu1 %v8009_v32  ;;  %v8066_v32 = vcombine.high %v2048_v25, %v2052_v26 }
 0x891   : > { %v1936_v10 = vpop.f32.mrb[20].mxu1 }
 0x892   : > { %v1937_v11 = vadd.f32 %v1936_v10, %v1735_v8  ;;  %v1938_v12 = vpop.f32.mrb[21].mxu1  ;;  %v8048_v8 = vcombine.high %v2031_v63, %v2035_v3  ;;  %v2039_v10 = vld [vmem:[#allocation5 + $0x180] sm:$0xff] }
 0x893   : > { %v1939_v13 = vadd.f32 %v1938_v12, %v1739_v9  ;;  %v1940_v14 = vpop.f32.mrb[22].mxu1  ;;  %v8050_v9 = vcombine.high %v2032_v4, %v2036_v5  ;;  %v2040_v12 = vld [vmem:[#allocation5 + $0x188] sm:$0xff] }
 0x894   : > { %v10496_v18 = vadd.f32 %v1937_v11, %v10321_v30  ;;  %v1941_v2 = vpop.f32.mrb[23].mxu1  ;;  %v8016_v30 = vcombine.high %v1999_v28, %v2003_v31  ;;  %v2043_v11 = vld [vmem:[#allocation5 + $0x1a0] sm:$0xff]  ;;  %v8047_v14 = vcombine.low %v2031_v63, %v2035_v3  ;;  %v8064_v31 = vcombine.high %v2047_v23, %v2051_v24 }
 0x895   : > { %v10499_v19 = vadd.f32 %v1939_v13, %v10319_v29  ;;  %v8018_v29 = vcombine.high %v2000_v34, %v2004_v36  ;;  %v2044_v13 = vld [vmem:[#allocation5 + $0x1a8] sm:$0xff]  ;;  %v8049_v2 = vcombine.low %v2032_v4, %v2036_v5  ;;  %v8055_v27 = vcombine.low %v2039_v10, %v2043_v11 }
 0x896   : > { %2803 = vmatprep.subr.bf16.mxu0 %v8016_v30  ;;  %v8058_v22 = vcombine.high %v2040_v12, %v2044_v13  ;;  %v8057_v28 = vcombine.low %v2040_v12, %v2044_v13  ;;  %v2059_v30 = vld [vmem:[#allocation5 + $0x220] sm:$0xff]  ;;  %v2056_v34 = vld [vmem:[#allocation5 + $0x208] sm:$0xff] }
 0x897   : > { %v1947_v20 = vadd.f32 %v10499_v19, %v10496_v18  ;;  %2844 = vmatprep.subr.bf16.mxu1 %v8018_v29  ;;  %2804 = vmatpush1.bf16.msra.mxu0 %v8015_v41  ;;  %v2060_v36 = vld [vmem:[#allocation5 + $0x228] sm:$0xff]  ;;  %v8065_v29 = vcombine.low %v2048_v25, %v2052_v26  ;;  %v8072_v38 = vcombine.high %v2055_v33, %v2059_v30  ;;  %v2067_v41 = vld [vmem:[#allocation5 + $0x260] sm:$0xff] }
 0x898   : > { %2845 = vmatpush1.bf16.msra.mxu1 %v8017_v42  ;;  %2805 = vmatprep.subr.bf16.mxu0 %v8024_v43  ;;  %v8074_v39 = vcombine.high %v2056_v34, %v2060_v36  ;;  %v2064_v42 = vld [vmem:[#allocation5 + $0x248] sm:$0xff]  ;;  %v8073_v45 = vcombine.low %v2056_v34, %v2060_v36  ;;  %v8080_v46 = vcombine.high %v2063_v40, %v2067_v41  ;;  %v2091_v13 = vld [vmem:[#allocation5 + $0x320] sm:$0xff] }
 0x899   : > { %1948 = vadd.xlane.f32.xlu0 %v1947_v20  ;;  %2846 = vmatprep.subr.bf16.mxu1 %v8026_v44  ;;  %v8056_v20 = vcombine.high %v2039_v10, %v2043_v11  ;;  %v2068_v43 = vld [vmem:[#allocation5 + $0x268] sm:$0xff]  ;;  %v8071_v44 = vcombine.low %v2055_v33, %v2059_v30  ;;  %v2095_v25 = vld [vmem:[#allocation5 + $0x340] sm:$0xff] }
 0x89a   : > { %v8082_v47 = vcombine.high %v2064_v42, %v2068_v43  ;;  %v8081_v55 = vcombine.low %v2064_v42, %v2068_v43  ;;  %v2084_v10 = vld [vmem:[#allocation5 + $0x2e8] sm:$0xff]  ;;  %v2099_v26 = vld [vmem:[#allocation5 + $0x360] sm:$0xff] }
 0x89b   : > { %2806 = vmatpush1.bf16.msra.mxu0 %v8023_v51  ;;  %v2075_v51 = vld [vmem:[#allocation5 + $0x2a0] sm:$0xff] }
 0x89c   : > { %2847 = vmatpush1.bf16.msra.mxu1 %v8025_v52  ;;  %2807 = vmatprep.subr.bf16.mxu0 %v8032_v53  ;;  %v2072_v52 = vld [vmem:[#allocation5 + $0x288] sm:$0xff]  ;;  %v8088_v56 = vcombine.high %v2071_v49, %v2075_v51  ;;  %v8087_v58 = vcombine.low %v2071_v49, %v2075_v51  ;;  %v2103_v34 = vld [vmem:[#allocation5 + $0x380] sm:$0xff] }
 0x89d   : > { %2848 = vmatprep.subr.bf16.mxu1 %v8034_v54  ;;  %v2076_v53 = vld [vmem:[#allocation5 + $0x2a8] sm:$0xff]  ;;  %v8079_v54 = vcombine.low %v2063_v40, %v2067_v41  ;;  %v2107_v36 = vld [vmem:[#allocation5 + $0x3a0] sm:$0xff] }
 0x89e   : > { %v8090_v57 = vcombine.high %v2072_v52, %v2076_v53  ;;  %v2111_v42 = vld [vmem:[#allocation5 + $0x3c0] sm:$0xff] }
 0x89f   : > { %2808 = vmatpush1.bf16.msra.mxu0 %v8031_v59  ;;  %v8089_v59 = vcombine.low %v2072_v52, %v2076_v53  ;;  %v2115_v43 = vld [vmem:[#allocation5 + $0x3e0] sm:$0xff]  ;;  %v1993_v52 = vld [vmem:[#allocation5 + $0x10] sm:$0xff] }
 0x8a0   : > { %2849 = vmatpush1.bf16.msra.mxu1 %v8033_v60  ;;  %2809 = vmatprep.subr.bf16.mxu0 %v8040_v61  ;;  %v1997_v53 = vld [vmem:[#allocation5 + $0x30] sm:$0xff] }
 0x8a1   : > { %2850 = vmatprep.subr.bf16.mxu1 %v8042_v62 }
 0x8a3   : > { %2810 = vmatpush1.bf16.msra.mxu0 %v8039_v6  ;;  %v2079_v6 = vld [vmem:[#allocation5 + $0x2c0] sm:$0xff] }
 0x8a4   : > { %2851 = vmatpush1.bf16.msra.mxu1 %v8041_v7  ;;  %2811 = vmatprep.subr.bf16.mxu0 %v8048_v8  ;;  %v2083_v7 = vld [vmem:[#allocation5 + $0x2e0] sm:$0xff]  ;;  %v2080_v8 = vld [vmem:[#allocation5 + $0x2c8] sm:$0xff] }
 0x8a5   : > { %2852 = vmatprep.subr.bf16.mxu1 %v8050_v9  ;;  %v8096_v9 = vcombine.high %v2079_v6, %v2083_v7  ;;  %v8095_v11 = vcombine.low %v2079_v6, %v2083_v7  ;;  %v8097_v12 = vcombine.low %v2080_v8, %v2084_v10 }
 0x8a7   : > { %2812 = vmatpush1.bf16.msra.mxu0 %v8047_v14  ;;  %v2088_v14 = vld [vmem:[#allocation5 + $0x308] sm:$0xff] }
 0x8a8   : > { %2853 = vmatpush1.bf16.msra.mxu1 %v8049_v2  ;;  %2813 = vmatprep.subr.bf16.mxu0 %v8056_v20  ;;  %v2092_v20 = vld [vmem:[#allocation5 + $0x328] sm:$0xff] }
 0x8a9   : > { %2854 = vmatprep.subr.bf16.mxu1 %v8058_v22  ;;  %v8105_v23 = vcombine.low %v2088_v14, %v2092_v20  ;;  %v8106_v24 = vcombine.high %v2088_v14, %v2092_v20  ;;  %v2005_v20 = vld [vmem:[#allocation5 + $0x70] sm:$0xff] }
 0x8ab   : > { %2814 = vmatpush1.bf16.msra.mxu0 %v8055_v27  ;;  %v2096_v27 = vld [vmem:[#allocation5 + $0x348] sm:$0xff] }
 0x8ac   : > { %2855 = vmatpush1.bf16.msra.mxu1 %v8057_v28  ;;  %2815 = vmatprep.subr.bf16.mxu0 %v8064_v31  ;;  %v8112_v28 = vcombine.high %v2095_v25, %v2099_v26  ;;  %v2100_v31 = vld [vmem:[#allocation5 + $0x368] sm:$0xff] }
 0x8ad   : > { %2856 = vmatprep.subr.bf16.mxu1 %v8066_v32  ;;  %v8111_v32 = vcombine.low %v2095_v25, %v2099_v26  ;;  %v8113_v33 = vcombine.low %v2096_v27, %v2100_v31  ;;  %v8114_v30 = vcombine.high %v2096_v27, %v2100_v31  ;;  %v2013_v27 = vld [vmem:[#allocation5 + $0xb0] sm:$0xff]  ;;  %v2014_v31 = vld [vmem:[#allocation5 + $0xb8] sm:$0xff] }
 0x8af   : > { %2816 = vmatpush1.bf16.msra.mxu0 %v8063_v37  ;;  %v2104_v37 = vld [vmem:[#allocation5 + $0x388] sm:$0xff] }
 0x8b0   : > { %2857 = vmatpush1.bf16.msra.mxu1 %v8065_v29  ;;  %2817 = vmatprep.subr.bf16.mxu0 %v8072_v38  ;;  %v8120_v29 = vcombine.high %v2103_v34, %v2107_v36  ;;  %v2108_v38 = vld [vmem:[#allocation5 + $0x3a8] sm:$0xff] }
 0x8b1   : > { %2858 = vmatprep.subr.bf16.mxu1 %v8074_v39  ;;  %v8119_v39 = vcombine.low %v2103_v34, %v2107_v36  ;;  %v8121_v40 = vcombine.low %v2104_v37, %v2108_v38  ;;  %v8122_v41 = vcombine.high %v2104_v37, %v2108_v38  ;;  %v2017_v36 = vld [vmem:[#allocation5 + $0xd0] sm:$0xff]  ;;  %v2022_v38 = vld [vmem:[#allocation5 + $0xf8] sm:$0xff] }
 0x8b2   : > { %v2021_v37 = vld [vmem:[#allocation5 + $0xf0] sm:$0xff] }
 0x8b3   : > { %2818 = vmatpush1.bf16.msra.mxu0 %v8071_v44  ;;  %v2112_v44 = vld [vmem:[#allocation5 + $0x3c8] sm:$0xff] }
 0x8b4   : > { %2859 = vmatpush1.bf16.msra.mxu1 %v8073_v45  ;;  %2819 = vmatprep.subr.bf16.mxu0 %v8080_v46  ;;  %v8128_v45 = vcombine.high %v2111_v42, %v2115_v43  ;;  %v2116_v46 = vld [vmem:[#allocation5 + $0x3e8] sm:$0xff] }
 0x8b5   : > { %2860 = vmatprep.subr.bf16.mxu1 %v8082_v47  ;;  %v8127_v47 = vcombine.low %v2111_v42, %v2115_v43  ;;  %v8130_v49 = vcombine.high %v2112_v44, %v2116_v46  ;;  %v8129_v51 = vcombine.low %v2112_v44, %v2116_v46  ;;  %v2025_v43 = vld [vmem:[#allocation5 + $0x110] sm:$0xff]  ;;  %v2030_v46 = vld [vmem:[#allocation5 + $0x138] sm:$0xff] }
 0x8b6   : > { %v2029_v44 = vld [vmem:[#allocation5 + $0x130] sm:$0xff] }
 0x8b7   : > { %2820 = vmatpush1.bf16.msra.mxu0 %v8079_v54  ;;  %v1994_v54 = vld [vmem:[#allocation5 + $0x18] sm:$0xff] }
 0x8b8   : > { %2861 = vmatpush1.bf16.msra.mxu1 %v8081_v55  ;;  %2821 = vmatprep.subr.bf16.mxu0 %v8088_v56  ;;  %v8012_v55 = vcombine.high %v1993_v52, %v1997_v53  ;;  %v1998_v56 = vld [vmem:[#allocation5 + $0x38] sm:$0xff] }
 0x8b9   : > { %2862 = vmatprep.subr.bf16.mxu1 %v8090_v57  ;;  %v8011_v57 = vcombine.low %v1993_v52, %v1997_v53  ;;  %v2033_v53 = vld [vmem:[#allocation5 + $0x150] sm:$0xff] }
 0x8bb   : > { %2822 = vmatpush1.bf16.msra.mxu0 %v8087_v58  ;;  %v8013_v58 = vcombine.low %v1994_v54, %v1998_v56 }
 0x8bc   : > { %2863 = vmatpush1.bf16.msra.mxu1 %v8089_v59  ;;  %2823 = vmatprep.subr.bf16.mxu0 %v8096_v9  ;;  %v8014_v59 = vcombine.high %v1994_v54, %v1998_v56  ;;  %v2037_v54 = vld [vmem:[#allocation5 + $0x170] sm:$0xff]  ;;  %v2038_v56 = vld [vmem:[#allocation5 + $0x178] sm:$0xff] }
 0x8bf   : > { %2824 = vmatpush1.bf16.msra.mxu0 %v8095_v11 }
 0x926   : > { %v1949_v60 = vpop.xlane.xlu0 %1948 }
 0x927   : > { %v1950_v61 = vmul.f32 0.00390625, %v1949_v60 }
 0x929   : > { %v10504_v62 = vsub.f32 %v10496_v18, %v1950_v61  ;;  %v10507_v63 = vsub.f32 %v10499_v19, %v1950_v61  ;;  %v8098_v18 = vcombine.high %v2080_v8, %v2084_v10  ;;  %v2087_v19 = vld [vmem:[#allocation5 + $0x300] sm:$0xff] }
 0x92a   : > { %v8104_v2 = vcombine.high %v2087_v19, %v2091_v13  ;;  %v8103_v22 = vcombine.low %v2087_v19, %v2091_v13 }
 0x92b   : > { %v1953_v3 = vmul.f32 %v10504_v62, %v10504_v62  ;;  %v1954_v4 = vmul.f32 %v10507_v63, %v10507_v63  ;;  %2864 = vmatprep.subr.bf16.mxu1 %v8098_v18 }
 0x92c   : > { %2865 = vmatpush1.bf16.msra.mxu1 %v8097_v12  ;;  %2825 = vmatprep.subr.bf16.mxu0 %v8104_v2  ;;  %v2001_v2 = vld [vmem:[#allocation5 + $0x50] sm:$0xff] }
 0x92d   : > { %v1955_v5 = vadd.f32 %v1954_v4, %v1953_v3  ;;  %2866 = vmatprep.subr.bf16.mxu1 %v8106_v24  ;;  %2826 = vmatpush1.bf16.msra.mxu0 %v8103_v22  ;;  %v1945_v4 = vld [vmem:[%s10993_s8] sm:$0x3]  ;;  %v2002_v22 = vld [vmem:[#allocation5 + $0x58] sm:$0xff]  ;;  %v8020_v25 = vcombine.high %v2001_v2, %v2005_v20 }
 0x92e   : > { %2827 = vmatprep.subr.bf16.mxu0 %v8112_v28  ;;  %v1971_v6 = vrot.slane %v1945_v4, %v10302_v16  ;;  %v1967_v7 = vrot.slane %v1945_v4, %v10305_v17  ;;  %v2010_v28 = vld [vmem:[#allocation5 + $0x98] sm:$0xff] }
 0x92f   : > { %1956 = vadd.xlane.f32.xlu1 %v1955_v5  ;;  %v1946_v5 = vld [vmem:[%s10994_s9] sm:$0x3]  ;;  %v8030_v34 = vcombine.high %v2010_v28, %v2014_v31  ;;  %v2042_v4 = vld [vmem:[#allocation5 + $0x198] sm:$0xff] }
 0x930   : > { %2867 = vmatpush1.bf16.msra.mxu1 %v8105_v23  ;;  %v1984_v11 = vrot.slane %v1946_v5, %v10302_v16  ;;  %v1980_v12 = vrot.slane %v1946_v5, %v10305_v17  ;;  %v2006_v23 = vld [vmem:[#allocation5 + $0x78] sm:$0xff] }
 0x931   : > { %2868 = vmatprep.subr.bf16.mxu1 %v8114_v30  ;;  %2828 = vmatpush1.bf16.msra.mxu0 %v8111_v32  ;;  %v8022_v26 = vcombine.high %v2002_v22, %v2006_v23  ;;  %v8019_v32 = vcombine.low %v2001_v2, %v2005_v20  ;;  %v2046_v5 = vld [vmem:[#allocation5 + $0x1b8] sm:$0xff] }
 0x932   : > { %2829 = vmatprep.subr.bf16.mxu0 %v8120_v29  ;;  %v2018_v29 = vld [vmem:[#allocation5 + $0xd8] sm:$0xff]  ;;  %v8061_v2 = vcombine.low %v2042_v4, %v2046_v5 }
 0x933   : > { %v8038_v42 = vcombine.high %v2018_v29, %v2022_v38 }
 0x934   : > { %2869 = vmatpush1.bf16.msra.mxu1 %v8113_v33  ;;  %v8021_v33 = vcombine.low %v2002_v22, %v2006_v23  ;;  %v2057_v23 = vld [vmem:[#allocation5 + $0x210] sm:$0xff] }
 0x935   : > { %2870 = vmatprep.subr.bf16.mxu1 %v8122_v41  ;;  %2830 = vmatpush1.bf16.msra.mxu0 %v8119_v39  ;;  %v8036_v41 = vcombine.high %v2017_v36, %v2021_v37 }
 0x936   : > { %2831 = vmatprep.subr.bf16.mxu0 %v8128_v45  ;;  %v2026_v45 = vld [vmem:[#allocation5 + $0x118] sm:$0xff] }
 0x937   : > { %v8046_v52 = vcombine.high %v2026_v45, %v2030_v46 }
 0x938   : > { %2871 = vmatpush1.bf16.msra.mxu1 %v8121_v40  ;;  %v8029_v40 = vcombine.low %v2010_v28, %v2014_v31 }
 0x939   : > { %2872 = vmatprep.subr.bf16.mxu1 %v8130_v49  ;;  %2832 = vmatpush1.bf16.msra.mxu0 %v8127_v47  ;;  %v8035_v47 = vcombine.low %v2017_v36, %v2021_v37  ;;  %v8037_v49 = vcombine.low %v2018_v29, %v2022_v38 }
 0x93a   : > { %2883 = vmatprep.subr.bf16.mxu0 %v8012_v55  ;;  %v2034_v55 = vld [vmem:[#allocation5 + $0x158] sm:$0xff] }
 0x93c   : > { %2873 = vmatpush1.bf16.msra.mxu1 %v8129_v51  ;;  %v8044_v51 = vcombine.high %v2025_v43, %v2029_v44 }
 0x93d   : > { %2924 = vmatprep.subr.bf16.mxu1 %v8014_v59  ;;  %v8052_v59 = vcombine.high %v2033_v53, %v2037_v54 }
 0x9bc   : > { %v1957_v60 = vpop.xlane.xlu1 %1956 }
 0x9bd   : > { %v1958_v61 = vmul.f32 0.00390625, %v1957_v60  ;;  %v8054_v60 = vcombine.high %v2034_v55, %v2038_v56 }
 0x9bf   : > { %v1959_v3 = vadd.f32 1e-12, %v1958_v61  ;;  %v2041_v61 = vld [vmem:[#allocation5 + $0x190] sm:$0xff] }
 0x9c1   : > { %9757 = vrsqrt.f32 %v1959_v3  ;;  %v2045_v3 = vld [vmem:[#allocation5 + $0x1b0] sm:$0xff] }
 0x9cb   : > { %v9758_v8 = vpop.eup %9757 }
 0x9cc   : > { %v1961_v9 = vmul.f32 %v9758_v8, %v10504_v62  ;;  %v1962_v10 = vmul.f32 %v9758_v8, %v10507_v63  ;;  %v2009_v63 = vld [vmem:[#allocation5 + $0x90] sm:$0xff]  ;;  %v8060_v8 = vcombine.high %v2041_v61, %v2045_v3 }
 0x9cd   : > { %v8028_v30 = vcombine.high %v2009_v63, %v2013_v27  ;;  %v8027_v39 = vcombine.low %v2009_v63, %v2013_v27  ;;  %v2058_v63 = vld [vmem:[#allocation5 + $0x218] sm:$0xff] }
 0x9ce   : > { %v1975_v18 = vmul.f32 %v1971_v6, %v1962_v10  ;;  %v1974_v19 = vmul.f32 %v1967_v7, %v1961_v9  ;;  %v8051_v6 = vcombine.low %v2033_v53, %v2037_v54  ;;  %v8053_v7 = vcombine.low %v2034_v55, %v2038_v56  ;;  %v2049_v10 = vld [vmem:[#allocation5 + $0x1d0] sm:$0xff] }
 0x9cf   : > { %v8062_v9 = vcombine.high %v2042_v4, %v2046_v5 }
 0x9d0   : > { %v10525_v13 = vadd.f32 %v1984_v11, %v1975_v18  ;;  %v10527_v14 = vadd.f32 %v1980_v12, %v1974_v19  ;;  %v2053_v11 = vld [vmem:[#allocation5 + $0x1f0] sm:$0xff]  ;;  %v2050_v12 = vld [vmem:[#allocation5 + $0x1d8] sm:$0xff]  ;;  %v8059_v19 = vcombine.low %v2041_v61, %v2045_v3 }
 0x9d1   : > { %v2054_v18 = vld [vmem:[#allocation5 + $0x1f8] sm:$0xff]  ;;  %v8068_v20 = vcombine.high %v2049_v10, %v2053_v11 }
 0x9d2   : > { %v1990_v24 = vpack.c.bf16 %v10525_v13, %v10525_v13  ;;  %v10533_v62 = vpack.c.bf16 %v10527_v14, %v10527_v14  ;;  %v8070_v22 = vcombine.high %v2050_v12, %v2054_v18  ;;  %v8069_v27 = vcombine.low %v2050_v12, %v2054_v18 }
 0x9d4   : > { %2833 = vmatprep.mubr.bf16.mxu0 %v1990_v24  ;;  %2874 = vmatprep.mubr.bf16.mxu1 %v1990_v24 }
 0x9d5   : > { %2834 = vmatmul.mubr.bf16.vlgmr.msra.gmra.mrb[8].mxu0 %v10533_v62  ;;  %2875 = vmatmul.mubr.bf16.vlgmr.msra.gmra.mrb[24].mxu1 %v10533_v62 }
 0x9d6   : > { %2884 = vmatpush1.bf16.msra.mxu0 %v8011_v57  ;;  %2925 = vmatpush1.bf16.msra.mxu1 %v8013_v58  ;;  %v8043_v57 = vcombine.low %v2025_v43, %v2029_v44  ;;  %v8045_v58 = vcombine.low %v2026_v45, %v2030_v46 }
 0x9d7   : > { %2915 = vmatprep.mubr.bf16.mxu0 %v1990_v24  ;;  %2956 = vmatprep.mubr.bf16.mxu1 %v1990_v24  ;;  %v2061_v24 = vld [vmem:[#allocation5 + $0x230] sm:$0xff] }
 0x9d8   : > { %2885 = vmatprep.subr.bf16.mxu0 %v8020_v25  ;;  %2926 = vmatprep.subr.bf16.mxu1 %v8022_v26  ;;  %v2062_v25 = vld [vmem:[#allocation5 + $0x238] sm:$0xff]  ;;  %v8067_v26 = vcombine.low %v2049_v10, %v2053_v11  ;;  %v8076_v28 = vcombine.high %v2057_v23, %v2061_v24  ;;  %v8075_v36 = vcombine.low %v2057_v23, %v2061_v24 }
 0x9d9   : > { %v8078_v31 = vcombine.high %v2058_v63, %v2062_v25  ;;  %v8077_v37 = vcombine.low %v2058_v63, %v2062_v25 }
 0x9da   : > { %2886 = vmatpush1.bf16.msra.mxu0 %v8019_v32  ;;  %2927 = vmatpush1.bf16.msra.mxu1 %v8021_v33  ;;  %v2065_v32 = vld [vmem:[#allocation5 + $0x250] sm:$0xff] }
 0x9db   : > { %2887 = vmatprep.subr.bf16.mxu0 %v8028_v30  ;;  %2928 = vmatprep.subr.bf16.mxu1 %v8030_v34  ;;  %v2069_v33 = vld [vmem:[#allocation5 + $0x270] sm:$0xff]  ;;  %v2066_v30 = vld [vmem:[#allocation5 + $0x258] sm:$0xff] }
 0x9dc   : > { %v2070_v34 = vld [vmem:[#allocation5 + $0x278] sm:$0xff]  ;;  %v8084_v29 = vcombine.high %v2065_v32, %v2069_v33  ;;  %v8083_v43 = vcombine.low %v2065_v32, %v2069_v33 }
 0x9dd   : > { %v8086_v38 = vcombine.high %v2066_v30, %v2070_v34  ;;  %v8085_v44 = vcombine.low %v2066_v30, %v2070_v34 }
 0x9de   : > { %2888 = vmatpush1.bf16.msra.mxu0 %v8027_v39  ;;  %2929 = vmatpush1.bf16.msra.mxu1 %v8029_v40  ;;  %v2073_v39 = vld [vmem:[#allocation5 + $0x290] sm:$0xff] }
 0x9df   : > { %2889 = vmatprep.subr.bf16.mxu0 %v8036_v41  ;;  %2930 = vmatprep.subr.bf16.mxu1 %v8038_v42  ;;  %v2077_v40 = vld [vmem:[#allocation5 + $0x2b0] sm:$0xff]  ;;  %v2074_v41 = vld [vmem:[#allocation5 + $0x298] sm:$0xff] }
 0x9e0   : > { %v2078_v42 = vld [vmem:[#allocation5 + $0x2b8] sm:$0xff]  ;;  %v8092_v45 = vcombine.high %v2073_v39, %v2077_v40  ;;  %v8091_v53 = vcombine.low %v2073_v39, %v2077_v40  ;;  %v9107_v39 = vld [vmem:[#allocation7] ss:$8 sps:$4 sm:$0xff]  }
 0x9e1   : > { %v8094_v46 = vcombine.high %v2074_v41, %v2078_v42  ;;  %v8093_v54 = vcombine.low %v2074_v41, %v2078_v42  ;;  %v9110_v40 = vld [vmem:[#allocation7 + $0x100] ss:$8 sps:$4 sm:$0xff]   ;;  %v9115_v41 = vld [vmem:[#allocation7 + $0x14] ss:$8 sps:$4 sm:$0xff]  }
 0x9e2   : > { %2890 = vmatpush1.bf16.msra.mxu0 %v8035_v47  ;;  %2931 = vmatpush1.bf16.msra.mxu1 %v8037_v49  ;;  %v2081_v47 = vld [vmem:[#allocation5 + $0x2d0] sm:$0xff] }
 0x9e3   : > { %2891 = vmatprep.subr.bf16.mxu0 %v8044_v51  ;;  %2932 = vmatprep.subr.bf16.mxu1 %v8046_v52  ;;  %v2085_v49 = vld [vmem:[#allocation5 + $0x2f0] sm:$0xff]  ;;  %v2082_v51 = vld [vmem:[#allocation5 + $0x2d8] sm:$0xff] }
 0x9e4   : > { %v2086_v52 = vld [vmem:[#allocation5 + $0x2f8] sm:$0xff]  ;;  %v8100_v55 = vcombine.high %v2081_v47, %v2085_v49  ;;  %v8099_v61 = vcombine.low %v2081_v47, %v2085_v49  ;;  %v9119_v47 = vld [vmem:[#allocation7 + $0x20] ss:$8 sps:$4 sm:$0xff]  }
 0x9e5   : > { %v8102_v56 = vcombine.high %v2082_v51, %v2086_v52  ;;  %v8101_v3 = vcombine.low %v2082_v51, %v2086_v52  ;;  %v9118_v42 = vld [vmem:[#allocation7 + $0x114] ss:$8 sps:$4 sm:$0xff]   ;;  %v9122_v49 = vld [vmem:[#allocation7 + $0x120] ss:$8 sps:$4 sm:$0xff]  }
 0x9e6   : > { %2892 = vmatpush1.bf16.msra.mxu0 %v8043_v57  ;;  %2933 = vmatpush1.bf16.msra.mxu1 %v8045_v58  ;;  %v2089_v57 = vld [vmem:[#allocation5 + $0x310] sm:$0xff] }
 0x9e7   : > { %2893 = vmatprep.subr.bf16.mxu0 %v8052_v59  ;;  %2934 = vmatprep.subr.bf16.mxu1 %v8054_v60  ;;  %v2093_v58 = vld [vmem:[#allocation5 + $0x330] sm:$0xff]  ;;  %v2090_v59 = vld [vmem:[#allocation5 + $0x318] sm:$0xff] }
 0x9e8   : > { %v2094_v60 = vld [vmem:[#allocation5 + $0x338] sm:$0xff]  ;;  %v8108_v4 = vcombine.high %v2089_v57, %v2093_v58  ;;  %v8107_v10 = vcombine.low %v2089_v57, %v2093_v58  ;;  %v9134_v57 = vld [vmem:[#allocation7 + $0x140] ss:$8 sps:$4 sm:$0xff]  }
 0x9e9   : > { %v8110_v5 = vcombine.high %v2090_v59, %v2094_v60  ;;  %v8109_v11 = vcombine.low %v2090_v59, %v2094_v60  ;;  %v9127_v51 = vld [vmem:[#allocation7 + $0x34] ss:$8 sps:$4 sm:$0xff]   ;;  %v9137_v60 = vld [vmem:[#allocation7 + $0x50] ss:$8 sps:$4 sm:$0xff]  }
 0x9ea   : > { %2894 = vmatpush1.bf16.msra.mxu0 %v8051_v6  ;;  %2935 = vmatpush1.bf16.msra.mxu1 %v8053_v7  ;;  %v2097_v6 = vld [vmem:[#allocation5 + $0x350] sm:$0xff] }
 0x9eb   : > { %2895 = vmatprep.subr.bf16.mxu0 %v8060_v8  ;;  %2936 = vmatprep.subr.bf16.mxu1 %v8062_v9  ;;  %v2101_v7 = vld [vmem:[#allocation5 + $0x370] sm:$0xff]  ;;  %v2098_v8 = vld [vmem:[#allocation5 + $0x358] sm:$0xff] }
 0x9ec   : > { %v2102_v9 = vld [vmem:[#allocation5 + $0x378] sm:$0xff]  ;;  %v8116_v12 = vcombine.high %v2097_v6, %v2101_v7  ;;  %v8115_v23 = vcombine.low %v2097_v6, %v2101_v7  ;;  %v9146_v6 = vld [vmem:[#allocation7 + $0x160] ss:$8 sps:$4 sm:$0xff]  }
 0x9ed   : > { %v8118_v18 = vcombine.high %v2098_v8, %v2102_v9  ;;  %v8117_v24 = vcombine.low %v2098_v8, %v2102_v9  ;;  %v9130_v52 = vld [vmem:[#allocation7 + $0x134] ss:$8 sps:$4 sm:$0xff]   ;;  %v9149_v9 = vld [vmem:[#allocation7 + $0x70] ss:$8 sps:$4 sm:$0xff]  }
 0x9ee   : > { %2896 = vmatpush1.bf16.msra.mxu0 %v8059_v19  ;;  %2937 = vmatpush1.bf16.msra.mxu1 %v8061_v2  ;;  %v2105_v19 = vld [vmem:[#allocation5 + $0x390] sm:$0xff] }
 0x9ef   : > { %2897 = vmatprep.subr.bf16.mxu0 %v8068_v20  ;;  %2938 = vmatprep.subr.bf16.mxu1 %v8070_v22  ;;  %v2109_v2 = vld [vmem:[#allocation5 + $0x3b0] sm:$0xff]  ;;  %v2106_v20 = vld [vmem:[#allocation5 + $0x398] sm:$0xff] }
 0x9f0   : > { %v2110_v22 = vld [vmem:[#allocation5 + $0x3b8] sm:$0xff]  ;;  %v8124_v63 = vcombine.high %v2105_v19, %v2109_v2  ;;  %v8123_v32 = vcombine.low %v2105_v19, %v2109_v2  ;;  %v9158_v19 = vld [vmem:[#allocation7 + $0x180] ss:$8 sps:$4 sm:$0xff]  }
 0x9f1   : > { %v8126_v25 = vcombine.high %v2106_v20, %v2110_v22  ;;  %v8125_v33 = vcombine.low %v2106_v20, %v2110_v22  ;;  %v9139_v58 = vld [vmem:[#allocation7 + $0x54] ss:$8 sps:$4 sm:$0xff]   ;;  %v9161_v22 = vld [vmem:[#allocation7 + $0x90] ss:$8 sps:$4 sm:$0xff]  }
 0x9f2   : > { %2898 = vmatpush1.bf16.msra.mxu0 %v8067_v26  ;;  %2939 = vmatpush1.bf16.msra.mxu1 %v8069_v27  ;;  %v2113_v26 = vld [vmem:[#allocation5 + $0x3d0] sm:$0xff] }
 0x9f3   : > { %2899 = vmatprep.subr.bf16.mxu0 %v8076_v28  ;;  %2940 = vmatprep.subr.bf16.mxu1 %v8078_v31  ;;  %v2117_v27 = vld [vmem:[#allocation5 + $0x3f0] sm:$0xff]  ;;  %v2114_v28 = vld [vmem:[#allocation5 + $0x3d8] sm:$0xff] }
 0x9f4   : > { %v2118_v31 = vld [vmem:[#allocation5 + $0x3f8] sm:$0xff]  ;;  %v8132_v30 = vcombine.high %v2113_v26, %v2117_v27 }
 0x9f5   : > { %v8134_v34 = vcombine.high %v2114_v28, %v2118_v31  ;;  %v9142_v59 = vld [vmem:[#allocation7 + $0x154] ss:$8 sps:$4 sm:$0xff]  }
 0x9f6   : > { %2900 = vmatpush1.bf16.msra.mxu0 %v8075_v36  ;;  %2941 = vmatpush1.bf16.msra.mxu1 %v8077_v37  ;;  %v8131_v36 = vcombine.low %v2113_v26, %v2117_v27  ;;  %v8133_v37 = vcombine.low %v2114_v28, %v2118_v31  ;;  %v9151_v7 = vld [vmem:[#allocation7 + $0x74] ss:$8 sps:$4 sm:$0xff]   ;;  %v9170_v26 = vld [vmem:[#allocation7 + $0x1a0] ss:$8 sps:$4 sm:$0xff]   ;;  %v9173_v31 = vld [vmem:[#allocation7 + $0xb0] ss:$8 sps:$4 sm:$0xff]  }
 0x9f7   : > { %2901 = vmatprep.subr.bf16.mxu0 %v8084_v29  ;;  %2942 = vmatprep.subr.bf16.mxu1 %v8086_v38  ;;  %v9109_v29 = vld [vmem:[#allocation7 + $0x4] ss:$8 sps:$4 sm:$0xff]   ;;  %v9154_v8 = vld [vmem:[#allocation7 + $0x174] ss:$8 sps:$4 sm:$0xff]  }
 0x9f8   : > { %v9112_v38 = vld [vmem:[#allocation7 + $0x104] ss:$8 sps:$4 sm:$0xff]   ;;  %v9163_v2 = vld [vmem:[#allocation7 + $0x94] ss:$8 sps:$4 sm:$0xff]  }
 0x9f9   : > { %v9166_v20 = vld [vmem:[#allocation7 + $0x194] ss:$8 sps:$4 sm:$0xff]  }
 0x9fa   : > { %2902 = vmatpush1.bf16.msra.mxu0 %v8083_v43  ;;  %2943 = vmatpush1.bf16.msra.mxu1 %v8085_v44  ;;  %v9113_v43 = vld [vmem:[#allocation7 + $0x10] ss:$8 sps:$4 sm:$0xff]   ;;  %v9175_v27 = vld [vmem:[#allocation7 + $0xb4] ss:$8 sps:$4 sm:$0xff]  }
 0x9fb   : > { %2903 = vmatprep.subr.bf16.mxu0 %v8092_v45  ;;  %2944 = vmatprep.subr.bf16.mxu1 %v8094_v46  ;;  %v9116_v44 = vld [vmem:[#allocation7 + $0x110] ss:$8 sps:$4 sm:$0xff]   ;;  %v9121_v45 = vld [vmem:[#allocation7 + $0x24] ss:$8 sps:$4 sm:$0xff]   ;;  %v9178_v28 = vld [vmem:[#allocation7 + $0x1b4] ss:$8 sps:$4 sm:$0xff]  }
 0x9fc   : > { %v9124_v46 = vld [vmem:[#allocation7 + $0x124] ss:$8 sps:$4 sm:$0xff]  }
 0x9fe   : > { %2904 = vmatpush1.bf16.msra.mxu0 %v8091_v53  ;;  %2945 = vmatpush1.bf16.msra.mxu1 %v8093_v54  ;;  %v9125_v53 = vld [vmem:[#allocation7 + $0x30] ss:$8 sps:$4 sm:$0xff]   ;;  %v9133_v54 = vld [vmem:[#allocation7 + $0x44] ss:$8 sps:$4 sm:$0xff]  }
 0x9ff   : > { %2905 = vmatprep.subr.bf16.mxu0 %v8100_v55  ;;  %2946 = vmatprep.subr.bf16.mxu1 %v8102_v56  ;;  %v9136_v55 = vld [vmem:[#allocation7 + $0x144] ss:$8 sps:$4 sm:$0xff]   ;;  %v9131_v56 = vld [vmem:[#allocation7 + $0x40] ss:$8 sps:$4 sm:$0xff]  }
 0xa02   : > { %2906 = vmatpush1.bf16.msra.mxu0 %v8099_v61  ;;  %2947 = vmatpush1.bf16.msra.mxu1 %v8101_v3  ;;  %v9140_v61 = vld [vmem:[#allocation7 + $0x150] ss:$8 sps:$4 sm:$0xff]   ;;  %v9145_v3 = vld [vmem:[#allocation7 + $0x64] ss:$8 sps:$4 sm:$0xff]  }
 0xa03   : > { %2907 = vmatprep.subr.bf16.mxu0 %v8108_v4  ;;  %2948 = vmatprep.subr.bf16.mxu1 %v8110_v5  ;;  %v9148_v4 = vld [vmem:[#allocation7 + $0x164] ss:$8 sps:$4 sm:$0xff]   ;;  %v9143_v5 = vld [vmem:[#allocation7 + $0x60] ss:$8 sps:$4 sm:$0xff]  }
 0xa06   : > { %2908 = vmatpush1.bf16.msra.mxu0 %v8107_v10  ;;  %2949 = vmatpush1.bf16.msra.mxu1 %v8109_v11  ;;  %v9152_v10 = vld [vmem:[#allocation7 + $0x170] ss:$8 sps:$4 sm:$0xff]   ;;  %v9157_v11 = vld [vmem:[#allocation7 + $0x84] ss:$8 sps:$4 sm:$0xff]  }
 0xa07   : > { %2909 = vmatprep.subr.bf16.mxu0 %v8116_v12  ;;  %2950 = vmatprep.subr.bf16.mxu1 %v8118_v18  ;;  %v9160_v12 = vld [vmem:[#allocation7 + $0x184] ss:$8 sps:$4 sm:$0xff]   ;;  %v9155_v18 = vld [vmem:[#allocation7 + $0x80] ss:$8 sps:$4 sm:$0xff]  }
 0xa0a   : > { %2910 = vmatpush1.bf16.msra.mxu0 %v8115_v23  ;;  %2951 = vmatpush1.bf16.msra.mxu1 %v8117_v24  ;;  %v9164_v23 = vld [vmem:[#allocation7 + $0x190] ss:$8 sps:$4 sm:$0xff]   ;;  %v9169_v24 = vld [vmem:[#allocation7 + $0xa4] ss:$8 sps:$4 sm:$0xff]  }
 0xa0b   : > { %2911 = vmatprep.subr.bf16.mxu0 %v8124_v63  ;;  %2952 = vmatprep.subr.bf16.mxu1 %v8126_v25  ;;  %v9172_v63 = vld [vmem:[#allocation7 + $0x1a4] ss:$8 sps:$4 sm:$0xff]   ;;  %v9167_v25 = vld [vmem:[#allocation7 + $0xa0] ss:$8 sps:$4 sm:$0xff]  }
 0xa0e   : > { %2912 = vmatpush1.bf16.msra.mxu0 %v8123_v32  ;;  %2953 = vmatpush1.bf16.msra.mxu1 %v8125_v33  ;;  %v9176_v32 = vld [vmem:[#allocation7 + $0x1b0] ss:$8 sps:$4 sm:$0xff]   ;;  %v9181_v33 = vld [vmem:[#allocation7 + $0xc4] ss:$8 sps:$4 sm:$0xff]  }
 0xa0f   : > { %2913 = vmatprep.subr.bf16.mxu0 %v8132_v30  ;;  %2954 = vmatprep.subr.bf16.mxu1 %v8134_v34  ;;  %v9184_v30 = vld [vmem:[#allocation7 + $0x1c4] ss:$8 sps:$4 sm:$0xff]   ;;  %v9179_v34 = vld [vmem:[#allocation7 + $0xc0] ss:$8 sps:$4 sm:$0xff]  }
 0xa12   : > { %2914 = vmatpush1.bf16.msra.mxu0 %v8131_v36  ;;  %2955 = vmatpush1.bf16.msra.mxu1 %v8133_v37  ;;  %v9182_v36 = vld [vmem:[#allocation7 + $0x1c0] ss:$8 sps:$4 sm:$0xff]   ;;  %v9187_v37 = vld [vmem:[#allocation7 + $0xd4] ss:$8 sps:$4 sm:$0xff]  }
 0xa13   : > { %3825 = vmatprep.subr.bf16.mxu0 %v9109_v29  ;;  %3866 = vmatprep.subr.bf16.mxu1 %v9112_v38  ;;  %v9190_v29 = vld [vmem:[#allocation7 + $0x1d4] ss:$8 sps:$4 sm:$0xff]   ;;  %v9185_v38 = vld [vmem:[#allocation7 + $0xd0] ss:$8 sps:$4 sm:$0xff]  }
 0xa15   : > { %2916 = vmatmul.mubr.bf16.vlgmr.msra.gmra.mrb[12].mxu0 %v10533_v62  ;;  %2957 = vmatmul.mubr.bf16.vlgmr.msra.gmra.mrb[28].mxu1 %v10533_v62  ;;  %v9128_v62 = vld [vmem:[#allocation7 + $0x130] ss:$8 sps:$4 sm:$0xff]  }
 0xa16   : > { %3826 = vmatpush1.bf16.msra.mxu0 %v9107_v39  ;;  %3867 = vmatpush1.bf16.msra.mxu1 %v9110_v40  ;;  %v9188_v39 = vld [vmem:[#allocation7 + $0x1d0] ss:$8 sps:$4 sm:$0xff]   ;;  %v9193_v40 = vld [vmem:[#allocation7 + $0xe4] ss:$8 sps:$4 sm:$0xff]  }
 0xa17   : > { %3827 = vmatprep.subr.bf16.mxu0 %v9115_v41  ;;  %3868 = vmatprep.subr.bf16.mxu1 %v9118_v42  ;;  %v9196_v41 = vld [vmem:[#allocation7 + $0x1e4] ss:$8 sps:$4 sm:$0xff]   ;;  %v9191_v42 = vld [vmem:[#allocation7 + $0xe0] ss:$8 sps:$4 sm:$0xff]  }
 0xa1a   : > { %3828 = vmatpush1.bf16.msra.mxu0 %v9113_v43  ;;  %3869 = vmatpush1.bf16.msra.mxu1 %v9116_v44  ;;  %v9194_v43 = vld [vmem:[#allocation7 + $0x1e0] ss:$8 sps:$4 sm:$0xff]   ;;  %v9199_v44 = vld [vmem:[#allocation7 + $0xf4] ss:$8 sps:$4 sm:$0xff]  }
 0xa1b   : > { %3829 = vmatprep.subr.bf16.mxu0 %v9121_v45  ;;  %3870 = vmatprep.subr.bf16.mxu1 %v9124_v46  ;;  %v9202_v45 = vld [vmem:[#allocation7 + $0x1f4] ss:$8 sps:$4 sm:$0xff]   ;;  %v9197_v46 = vld [vmem:[#allocation7 + $0xf0] ss:$8 sps:$4 sm:$0xff]  }
 0xa1e   : > { %3830 = vmatpush1.bf16.msra.mxu0 %v9119_v47  ;;  %3871 = vmatpush1.bf16.msra.mxu1 %v9122_v49  ;;  %v9200_v47 = vld [vmem:[#allocation7 + $0x1f0] ss:$8 sps:$4 sm:$0xff]   ;;  %v9205_v49 = vld [vmem:[#allocation7 + $0x204] ss:$8 sps:$4 sm:$0xff]  }
 0xa1f   : > { %3831 = vmatprep.subr.bf16.mxu0 %v9127_v51  ;;  %3872 = vmatprep.subr.bf16.mxu1 %v9130_v52  ;;  %v9208_v51 = vld [vmem:[#allocation7 + $0x304] ss:$8 sps:$4 sm:$0xff]  }
 0xa20   : > { %v10542_v52 = vld [vmem:[%s10996_s11] sm:$0xff] }
 0xa22   : > { %3832 = vmatpush1.bf16.msra.mxu0 %v9125_v53  ;;  %3873 = vmatpush1.bf16.msra.mxu1 %v9128_v62  ;;  %v2124_v53 = vrot.slane %v10542_v52, %v10305_v17  ;;  %v2132_v62 = vrot.slane %v10542_v52, %v10336_v1 }
 0xa23   : > { %3833 = vmatprep.subr.bf16.mxu0 %v9133_v54  ;;  %3874 = vmatprep.subr.bf16.mxu1 %v9136_v55  ;;  %v2128_v54 = vrot.slane %v10542_v52, %v10302_v16  ;;  %v2136_v55 = vrot.slane %v10542_v52, %v10368_v48 }
 0xa26   : > { %3834 = vmatpush1.bf16.msra.mxu0 %v9131_v56  ;;  %3875 = vmatpush1.bf16.msra.mxu1 %v9134_v57 }
 0xa27   : > { %3835 = vmatprep.subr.bf16.mxu0 %v9139_v58  ;;  %3876 = vmatprep.subr.bf16.mxu1 %v9142_v59 }
 0xa2a   : > { %3836 = vmatpush1.bf16.msra.mxu0 %v9137_v60  ;;  %3877 = vmatpush1.bf16.msra.mxu1 %v9140_v61 }
 0xa2b   : > { %3837 = vmatprep.subr.bf16.mxu0 %v9145_v3  ;;  %3878 = vmatprep.subr.bf16.mxu1 %v9148_v4 }
 0xa2e   : > { %3838 = vmatpush1.bf16.msra.mxu0 %v9143_v5  ;;  %3879 = vmatpush1.bf16.msra.mxu1 %v9146_v6 }
 0xa2f   : > { %3839 = vmatprep.subr.bf16.mxu0 %v9151_v7  ;;  %3880 = vmatprep.subr.bf16.mxu1 %v9154_v8 }
 0xa32   : > { %3840 = vmatpush1.bf16.msra.mxu0 %v9149_v9  ;;  %3881 = vmatpush1.bf16.msra.mxu1 %v9152_v10 }
 0xa33   : > { %3841 = vmatprep.subr.bf16.mxu0 %v9157_v11  ;;  %3882 = vmatprep.subr.bf16.mxu1 %v9160_v12 }
 0xa36   : > { %3842 = vmatpush1.bf16.msra.mxu0 %v9155_v18  ;;  %3883 = vmatpush1.bf16.msra.mxu1 %v9158_v19 }
 0xa37   : > { %3843 = vmatprep.subr.bf16.mxu0 %v9163_v2  ;;  %3884 = vmatprep.subr.bf16.mxu1 %v9166_v20 }
 0xa3a   : > { %3844 = vmatpush1.bf16.msra.mxu0 %v9161_v22  ;;  %3885 = vmatpush1.bf16.msra.mxu1 %v9164_v23 }
 0xa3b   : > { %3845 = vmatprep.subr.bf16.mxu0 %v9169_v24  ;;  %3886 = vmatprep.subr.bf16.mxu1 %v9172_v63 }
 0xa3e   : > { %3846 = vmatpush1.bf16.msra.mxu0 %v9167_v25  ;;  %3887 = vmatpush1.bf16.msra.mxu1 %v9170_v26 }
 0xa3f   : > { %3847 = vmatprep.subr.bf16.mxu0 %v9175_v27  ;;  %3888 = vmatprep.subr.bf16.mxu1 %v9178_v28 }
 0xa42   : > { %3848 = vmatpush1.bf16.msra.mxu0 %v9173_v31  ;;  %3889 = vmatpush1.bf16.msra.mxu1 %v9176_v32 }
 0xa43   : > { %3849 = vmatprep.subr.bf16.mxu0 %v9181_v33  ;;  %3890 = vmatprep.subr.bf16.mxu1 %v9184_v30 }
 0xa46   : > { %3850 = vmatpush1.bf16.msra.mxu0 %v9179_v34  ;;  %3891 = vmatpush1.bf16.msra.mxu1 %v9182_v36 }
 0xa47   : > { %3851 = vmatprep.subr.bf16.mxu0 %v9187_v37  ;;  %3892 = vmatprep.subr.bf16.mxu1 %v9190_v29 }
 0xa4a   : > { %3852 = vmatpush1.bf16.msra.mxu0 %v9185_v38  ;;  %3893 = vmatpush1.bf16.msra.mxu1 %v9188_v39 }
 0xa4b   : > { %3853 = vmatprep.subr.bf16.mxu0 %v9193_v40  ;;  %3894 = vmatprep.subr.bf16.mxu1 %v9196_v41 }
 0xa4e   : > { %3854 = vmatpush1.bf16.msra.mxu0 %v9191_v42  ;;  %3895 = vmatpush1.bf16.msra.mxu1 %v9194_v43 }
 0xa4f   : > { %3855 = vmatprep.subr.bf16.mxu0 %v9199_v44  ;;  %3896 = vmatprep.subr.bf16.mxu1 %v9202_v45 }
 0xa52   : > { %3856 = vmatpush1.bf16.msra.mxu0 %v9197_v46  ;;  %3897 = vmatpush1.bf16.msra.mxu1 %v9200_v47 }
 0xa53   : > { %3907 = vmatprep.subr.bf16.mxu0 %v9205_v49  ;;  %3948 = vmatprep.subr.bf16.mxu1 %v9208_v51 }
 0xaa8   : > { %v2835_v56 = vpop.f32.mrb[8].mxu0  ;;  %v2876_v57 = vpop.f32.mrb[24].mxu1 }
 0xaa9   : > { %v2836_v58 = vadd.f32 %v2835_v56, %v2124_v53  ;;  %v2877_v59 = vadd.f32 %v2876_v57, %v2132_v62  ;;  %v2837_v60 = vpop.f32.mrb[9].mxu0  ;;  %v2878_v61 = vpop.f32.mrb[25].mxu1  ;;  %v9203_v53 = vld [vmem:[#allocation7 + $0x200] ss:$8 sps:$4 sm:$0xff]   ;;  %v9211_v57 = vld [vmem:[#allocation7 + $0x214] ss:$8 sps:$4 sm:$0xff]  }
 0xaaa   : > { %v2838_v3 = vadd.f32 %v2837_v60, %v2128_v54  ;;  %v2879_v4 = vadd.f32 %v2878_v61, %v2136_v55  ;;  %v2839_v5 = vpop.f32.mrb[10].mxu0  ;;  %v2880_v6 = vpop.f32.mrb[26].mxu1  ;;  %v9206_v55 = vld [vmem:[#allocation7 + $0x300] ss:$8 sps:$4 sm:$0xff]   ;;  %v9214_v60 = vld [vmem:[#allocation7 + $0x314] ss:$8 sps:$4 sm:$0xff]  }
 0xaab   : > { %v2973_v7 = vmul.f32 0.044715, %v2836_v58  ;;  %v2975_v8 = vmul.f32 0.044715, %v2877_v59  ;;  %v2840_v9 = vpop.f32.mrb[11].mxu0  ;;  %v2881_v10 = vpop.f32.mrb[27].mxu1 }
 0xaac   : > { %v2974_v11 = vmul.f32 0.044715, %v2838_v3  ;;  %v2976_v12 = vmul.f32 0.044715, %v2879_v4  ;;  %v2965_v37 = vmul.f32 0.5, %v2836_v58  ;;  %v2966_v39 = vmul.f32 0.5, %v2838_v3 }
 0xaad   : > { %v2981_v18 = vmul.f32 %v2973_v7, %v2836_v58  ;;  %v2983_v19 = vmul.f32 %v2975_v8, %v2877_v59  ;;  %v2968_v42 = vmul.f32 0.5, %v2879_v4  ;;  %v2967_v46 = vmul.f32 0.5, %v2877_v59  ;;  %v9209_v61 = vld [vmem:[#allocation7 + $0x210] ss:$8 sps:$4 sm:$0xff]   ;;  %v9215_v5 = vld [vmem:[#allocation7 + $0x220] ss:$8 sps:$4 sm:$0xff]  }
 0xaae   : > { %v2982_v2 = vmul.f32 %v2974_v11, %v2838_v3  ;;  %v2984_v20 = vmul.f32 %v2976_v12, %v2879_v4  ;;  %v9218_v6 = vld [vmem:[#allocation7 + $0x320] ss:$8 sps:$4 sm:$0xff]   ;;  %v9223_v7 = vld [vmem:[#allocation7 + $0x234] ss:$8 sps:$4 sm:$0xff]   ;;  %v9221_v9 = vld [vmem:[#allocation7 + $0x230] ss:$8 sps:$4 sm:$0xff]  }
 0xaaf   : > { %v2989_v22 = vmul.f32 %v2981_v18, %v2836_v58  ;;  %v2991_v23 = vmul.f32 %v2983_v19, %v2877_v59  ;;  %v9226_v8 = vld [vmem:[#allocation7 + $0x334] ss:$8 sps:$4 sm:$0xff]   ;;  %v9224_v10 = vld [vmem:[#allocation7 + $0x330] ss:$8 sps:$4 sm:$0xff]   ;;  %v9229_v11 = vld [vmem:[#allocation7 + $0x244] ss:$8 sps:$4 sm:$0xff]  }
 0xab0   : > { %v2990_v24 = vmul.f32 %v2982_v2, %v2838_v3  ;;  %v2992_v63 = vmul.f32 %v2984_v20, %v2879_v4  ;;  %v9232_v12 = vld [vmem:[#allocation7 + $0x344] ss:$8 sps:$4 sm:$0xff]   ;;  %v9227_v18 = vld [vmem:[#allocation7 + $0x240] ss:$8 sps:$4 sm:$0xff]   ;;  %v9235_v2 = vld [vmem:[#allocation7 + $0x254] ss:$8 sps:$4 sm:$0xff]  }
 0xab1   : > { %v2997_v25 = vadd.f32 %v2989_v22, %v2836_v58  ;;  %v2999_v26 = vadd.f32 %v2991_v23, %v2877_v59  ;;  %v9212_v59 = vld [vmem:[#allocation7 + $0x310] ss:$8 sps:$4 sm:$0xff]   ;;  %v9230_v19 = vld [vmem:[#allocation7 + $0x340] ss:$8 sps:$4 sm:$0xff]   ;;  %v9238_v20 = vld [vmem:[#allocation7 + $0x354] ss:$8 sps:$4 sm:$0xff]  }
 0xab2   : > { %v2998_v27 = vadd.f32 %v2990_v24, %v2838_v3  ;;  %v3000_v28 = vadd.f32 %v2992_v63, %v2879_v4  ;;  %v9217_v3 = vld [vmem:[#allocation7 + $0x224] ss:$8 sps:$4 sm:$0xff]   ;;  %v9233_v22 = vld [vmem:[#allocation7 + $0x250] ss:$8 sps:$4 sm:$0xff]  }
 0xab3   : > { %v3005_v31 = vmul.f32 0.7978846, %v2997_v25  ;;  %v3007_v30 = vmul.f32 0.7978846, %v2999_v26  ;;  %v9220_v4 = vld [vmem:[#allocation7 + $0x324] ss:$8 sps:$4 sm:$0xff]  }
 0xab4   : > { %v3006_v32 = vmul.f32 0.7978846, %v2998_v27  ;;  %v3008_v33 = vmul.f32 0.7978846, %v3000_v28  ;;  %v9236_v23 = vld [vmem:[#allocation7 + $0x350] ss:$8 sps:$4 sm:$0xff]  }
 0xab5   : > { %9759 = vtanh.f32 %v3005_v31  ;;  %v9241_v24 = vld [vmem:[#allocation7 + $0x264] ss:$8 sps:$4 sm:$0xff]   ;;  %v9239_v25 = vld [vmem:[#allocation7 + $0x260] ss:$8 sps:$4 sm:$0xff]   ;;  %v9247_v27 = vld [vmem:[#allocation7 + $0x274] ss:$8 sps:$4 sm:$0xff]  }
 0xab6   : > { %9761 = vtanh.f32 %v3006_v32  ;;  %v9244_v63 = vld [vmem:[#allocation7 + $0x364] ss:$8 sps:$4 sm:$0xff]   ;;  %v9242_v26 = vld [vmem:[#allocation7 + $0x360] ss:$8 sps:$4 sm:$0xff]   ;;  %v9250_v28 = vld [vmem:[#allocation7 + $0x374] ss:$8 sps:$4 sm:$0xff]  }
 0xab7   : > { %9763 = vtanh.f32 %v3008_v33  ;;  %v9245_v31 = vld [vmem:[#allocation7 + $0x270] ss:$8 sps:$4 sm:$0xff]   ;;  %v2147_v32 = vsub.s32 6, %v10299_v15 }
 0xab8   : > { %9765 = vtanh.f32 %v3007_v30  ;;  %v9248_v33 = vld [vmem:[#allocation7 + $0x370] ss:$8 sps:$4 sm:$0xff]   ;;  %v9253_v30 = vld [vmem:[#allocation7 + $0x284] ss:$8 sps:$4 sm:$0xff]  }
 0xabf   : > { %v9760_v34 = vpop.eup %9759 }
 0xac0   : > { %v9762_v36 = vpop.eup %9761  ;;  %v3021_v29 = vadd.f32 1.0, %v9760_v34  ;;  %v2151_v34 = vsub.s32 7, %v10299_v15 }
 0xac1   : > { %v9764_v38 = vpop.eup %9763  ;;  %v3022_v40 = vadd.f32 1.0, %v9762_v36  ;;  %v9256_v36 = vld [vmem:[#allocation7 + $0x384] ss:$8 sps:$4 sm:$0xff]  }
 0xac2   : > { %v9766_v41 = vpop.eup %9765  ;;  %v3024_v43 = vadd.f32 1.0, %v9764_v38  ;;  %v3029_v44 = vmul.f32 %v3021_v29, %v2965_v37  ;;  %v2140_v37 = vrot.slane %v10542_v52, %v10351_v21  ;;  %v2148_v29 = vrot.slane %v10542_v52, %v2147_v32  ;;  %v9251_v38 = vld [vmem:[#allocation7 + $0x280] ss:$8 sps:$4 sm:$0xff]  }
 0xac3   : > { %v3030_v45 = vmul.f32 %v3022_v40, %v2966_v39  ;;  %v3023_v47 = vadd.f32 1.0, %v9766_v41  ;;  %v9254_v39 = vld [vmem:[#allocation7 + $0x380] ss:$8 sps:$4 sm:$0xff]   ;;  %v2144_v40 = vrot.slane %v10542_v52, %v10373_v50  ;;  %v2152_v41 = vrot.slane %v10542_v52, %v2151_v34 }
 0xac4   : > { %v3032_v49 = vmul.f32 %v3024_v43, %v2968_v42  ;;  %v3037_v56 = vpack.c.bf16 %v3029_v44, %v3029_v44  ;;  %v9259_v42 = vld [vmem:[#allocation7 + $0x294] ss:$8 sps:$4 sm:$0xff]  }
 0xac5   : > { %v3038_v51 = vpack.c.bf16 %v3030_v45, %v3030_v45  ;;  %v3031_v62 = vmul.f32 %v3023_v47, %v2967_v46  ;;  %v9262_v43 = vld [vmem:[#allocation7 + $0x394] ss:$8 sps:$4 sm:$0xff]  }
 0xac6   : > { %v3040_v54 = vpack.c.bf16 %v3032_v49, %v3032_v49 }
 0xac7   : > { %3857 = vmatprep.mubr.bf16.mxu0 %v3038_v51  ;;  %v3039_v58 = vpack.c.bf16 %v3031_v62, %v3031_v62  ;;  %v9260_v62 = vld [vmem:[#allocation7 + $0x390] ss:$8 sps:$4 sm:$0xff]  }
 0xac8   : > { %3898 = vmatprep.mubr.bf16.mxu1 %v3040_v54  ;;  %3858 = vmatmul.mubr.bf16.vlgmr.msra.gmra.mrb[16].mxu0 %v3037_v56 }
 0xac9   : > { %3899 = vmatmul.mubr.bf16.vlgmr.msra.gmra.mrb[32].mxu1 %v3039_v58  ;;  %3908 = vmatpush1.bf16.msra.mxu0 %v9203_v53  ;;  %v9257_v53 = vld [vmem:[#allocation7 + $0x290] ss:$8 sps:$4 sm:$0xff]   ;;  %v9268_v58 = vld [vmem:[#allocation7 + $0x3a4] ss:$8 sps:$4 sm:$0xff]  }
 0xaca   : > { %3949 = vmatpush1.bf16.msra.mxu1 %v9206_v55  ;;  %3909 = vmatprep.subr.bf16.mxu0 %v9211_v57  ;;  %v9265_v57 = vld [vmem:[#allocation7 + $0x2a4] ss:$8 sps:$4 sm:$0xff]  }
 0xacb   : > { %3950 = vmatprep.subr.bf16.mxu1 %v9214_v60 }
 0xacd   : > { %3910 = vmatpush1.bf16.msra.mxu0 %v9209_v61 }
 0xace   : > { %3951 = vmatpush1.bf16.msra.mxu1 %v9212_v59  ;;  %3911 = vmatprep.subr.bf16.mxu0 %v9217_v3 }
 0xacf   : > { %3952 = vmatprep.subr.bf16.mxu1 %v9220_v4 }
 0xad1   : > { %3912 = vmatpush1.bf16.msra.mxu0 %v9215_v5 }
 0xad2   : > { %3953 = vmatpush1.bf16.msra.mxu1 %v9218_v6  ;;  %3913 = vmatprep.subr.bf16.mxu0 %v9223_v7 }
 0xad3   : > { %3954 = vmatprep.subr.bf16.mxu1 %v9226_v8  ;;  %v9263_v8 = vld [vmem:[#allocation7 + $0x2a0] ss:$8 sps:$4 sm:$0xff]  }
 0xad5   : > { %3914 = vmatpush1.bf16.msra.mxu0 %v9221_v9 }
 0xad6   : > { %3955 = vmatpush1.bf16.msra.mxu1 %v9224_v10  ;;  %3915 = vmatprep.subr.bf16.mxu0 %v9229_v11  ;;  %v9266_v11 = vld [vmem:[#allocation7 + $0x3a0] ss:$8 sps:$4 sm:$0xff]  }
 0xad7   : > { %3956 = vmatprep.subr.bf16.mxu1 %v9232_v12  ;;  %v9271_v12 = vld [vmem:[#allocation7 + $0x2b4] ss:$8 sps:$4 sm:$0xff]  }
 0xad9   : > { %3916 = vmatpush1.bf16.msra.mxu0 %v9227_v18 }
 0xada   : > { %3957 = vmatpush1.bf16.msra.mxu1 %v9230_v19  ;;  %3917 = vmatprep.subr.bf16.mxu0 %v9235_v2  ;;  %v9274_v2 = vld [vmem:[#allocation7 + $0x3b4] ss:$8 sps:$4 sm:$0xff]  }
 0xadb   : > { %3958 = vmatprep.subr.bf16.mxu1 %v9238_v20 }
 0xadd   : > { %3918 = vmatpush1.bf16.msra.mxu0 %v9233_v22 }
 0xade   : > { %3959 = vmatpush1.bf16.msra.mxu1 %v9236_v23  ;;  %3919 = vmatprep.subr.bf16.mxu0 %v9241_v24 }
 0xadf   : > { %3960 = vmatprep.subr.bf16.mxu1 %v9244_v63  ;;  %v9269_v63 = vld [vmem:[#allocation7 + $0x2b0] ss:$8 sps:$4 sm:$0xff]  }
 0xae1   : > { %3920 = vmatpush1.bf16.msra.mxu0 %v9239_v25  ;;  %v9272_v25 = vld [vmem:[#allocation7 + $0x3b0] ss:$8 sps:$4 sm:$0xff]  }
 0xae2   : > { %3961 = vmatpush1.bf16.msra.mxu1 %v9242_v26  ;;  %3921 = vmatprep.subr.bf16.mxu0 %v9247_v27  ;;  %v9277_v26 = vld [vmem:[#allocation7 + $0x2c4] ss:$8 sps:$4 sm:$0xff]  }
 0xae3   : > { %3962 = vmatprep.subr.bf16.mxu1 %v9250_v28 }
 0xae5   : > { %3922 = vmatpush1.bf16.msra.mxu0 %v9245_v31  ;;  %v9280_v31 = vld [vmem:[#allocation7 + $0x3c4] ss:$8 sps:$4 sm:$0xff]  }
 0xae6   : > { %3963 = vmatpush1.bf16.msra.mxu1 %v9248_v33  ;;  %3923 = vmatprep.subr.bf16.mxu0 %v9253_v30 }
 0xae7   : > { %3964 = vmatprep.subr.bf16.mxu1 %v9256_v36 }
 0xae8   : > { %v2917_v44 = vpop.f32.mrb[12].mxu0  ;;  %v2958_v45 = vpop.f32.mrb[28].mxu1 }
 0xae9   : > { %v10564_v46 = vadd.f32 %v2917_v44, %v2140_v37  ;;  %v10566_v47 = vadd.f32 %v2958_v45, %v2148_v29  ;;  %v2919_v49 = vpop.f32.mrb[13].mxu0  ;;  %v2960_v51 = vpop.f32.mrb[29].mxu1  ;;  %3924 = vmatpush1.bf16.msra.mxu0 %v9251_v38  ;;  %v9275_v29 = vld [vmem:[#allocation7 + $0x2c0] ss:$8 sps:$4 sm:$0xff]   ;;  %v9292_v44 = vld [vmem:[#allocation7 + $0x3e4] ss:$8 sps:$4 sm:$0xff]  }
 0xaea   : > { %v10568_v54 = vadd.f32 %v2919_v49, %v2144_v40  ;;  %v10570_v55 = vadd.f32 %v2960_v51, %v2152_v41  ;;  %3965 = vmatpush1.bf16.msra.mxu1 %v9254_v39  ;;  %v2921_v52 = vpop.f32.mrb[14].mxu0  ;;  %v2962_v56 = vpop.f32.mrb[30].mxu1  ;;  %3925 = vmatprep.subr.bf16.mxu0 %v9259_v42  ;;  %v9278_v38 = vld [vmem:[#allocation7 + $0x3c0] ss:$8 sps:$4 sm:$0xff]   ;;  %v9283_v39 = vld [vmem:[#allocation7 + $0x2d4] ss:$8 sps:$4 sm:$0xff]  }
 0xaeb   : > { %v2977_v60 = vmul.f32 0.044715, %v10564_v46  ;;  %v2979_v61 = vmul.f32 0.044715, %v10566_v47  ;;  %v2922_v59 = vpop.f32.mrb[15].mxu0  ;;  %v2963_v3 = vpop.f32.mrb[31].mxu1  ;;  %3966 = vmatprep.subr.bf16.mxu1 %v9262_v43 }
 0xaec   : > { %v2978_v4 = vmul.f32 0.044715, %v10568_v54  ;;  %v2980_v5 = vmul.f32 0.044715, %v10570_v55  ;;  %v9286_v40 = vld [vmem:[#allocation7 + $0x3d4] ss:$8 sps:$4 sm:$0xff]  }
 0xaed   : > { %v2985_v6 = vmul.f32 %v2977_v60, %v10564_v46  ;;  %v2987_v7 = vmul.f32 %v2979_v61, %v10566_v47  ;;  %3926 = vmatpush1.bf16.msra.mxu0 %v9257_v53  ;;  %v9281_v41 = vld [vmem:[#allocation7 + $0x2d0] ss:$8 sps:$4 sm:$0xff]   ;;  %v9289_v43 = vld [vmem:[#allocation7 + $0x2e4] ss:$8 sps:$4 sm:$0xff]   ;;  %v9287_v45 = vld [vmem:[#allocation7 + $0x2e0] ss:$8 sps:$4 sm:$0xff]  }
 0xaee   : > { %v2986_v9 = vmul.f32 %v2978_v4, %v10568_v54  ;;  %v2988_v10 = vmul.f32 %v2980_v5, %v10570_v55  ;;  %3967 = vmatpush1.bf16.msra.mxu1 %v9260_v62  ;;  %3927 = vmatprep.subr.bf16.mxu0 %v9265_v57  ;;  %v9284_v42 = vld [vmem:[#allocation7 + $0x3d0] ss:$8 sps:$4 sm:$0xff]   ;;  %v9290_v49 = vld [vmem:[#allocation7 + $0x3e0] ss:$8 sps:$4 sm:$0xff]   ;;  %v9295_v51 = vld [vmem:[#allocation7 + $0x2f4] ss:$8 sps:$4 sm:$0xff]  }
 0xaef   : > { %v2993_v18 = vmul.f32 %v2985_v6, %v10564_v46  ;;  %v2995_v19 = vmul.f32 %v2987_v7, %v10566_v47  ;;  %3968 = vmatprep.subr.bf16.mxu1 %v9268_v58  ;;  %v9298_v62 = vld [vmem:[#allocation7 + $0x3f4] ss:$8 sps:$4 sm:$0xff]   ;;  %v2969_v56 = vmul.f32 0.5, %v10564_v46  ;;  %v9293_v60 = vld [vmem:[#allocation7 + $0x2f0] ss:$8 sps:$4 sm:$0xff]   ;;  %v2970_v61 = vmul.f32 0.5, %v10568_v54 }
 0xaf0   : > { %v2994_v20 = vmul.f32 %v2986_v9, %v10568_v54  ;;  %v2996_v22 = vmul.f32 %v2988_v10, %v10570_v55  ;;  %v9296_v4 = vld [vmem:[#allocation7 + $0x3f0] ss:$8 sps:$4 sm:$0xff]   ;;  %v2972_v5 = vmul.f32 0.5, %v10570_v55  ;;  %v2971_v9 = vmul.f32 0.5, %v10566_v47 }
 0xaf1   : > { %v3001_v23 = vadd.f32 %v2993_v18, %v10564_v46  ;;  %v3003_v24 = vadd.f32 %v2995_v19, %v10566_v47  ;;  %3928 = vmatpush1.bf16.msra.mxu0 %v9263_v8 }
 0xaf2   : > { %3969 = vmatpush1.bf16.msra.mxu1 %v9266_v11  ;;  %3929 = vmatprep.subr.bf16.mxu0 %v9271_v12  ;;  %v3002_v27 = vadd.f32 %v2994_v20, %v10568_v54  ;;  %v3004_v28 = vadd.f32 %v2996_v22, %v10570_v55  ;;  %v3173_v55 = vld [vmem:[%s10998_s13] sm:$0x3] }
 0xaf3   : > { %3970 = vmatprep.subr.bf16.mxu1 %v9274_v2  ;;  %v3009_v33 = vmul.f32 0.7978846, %v3001_v23  ;;  %v3011_v37 = vmul.f32 0.7978846, %v3003_v24  ;;  %v3178_v2 = vrot.slane %v3173_v55, %v10305_v17  ;;  %v3182_v47 = vrot.slane %v3173_v55, %v10302_v16  ;;  %v9332_v55 = vld [vmem:[#allocation2 + $0x3f8] ss:$24 sps:$4 sm:$0xff]  }
 0xaf4   : > { %v3010_v30 = vmul.f32 0.7978846, %v3002_v27  ;;  %v3012_v36 = vmul.f32 0.7978846, %v3004_v28 }
 0xaf5   : > { %3930 = vmatpush1.bf16.msra.mxu0 %v9269_v63  ;;  %9767 = vtanh.f32 %v3009_v33 }
 0xaf6   : > { %3971 = vmatpush1.bf16.msra.mxu1 %v9272_v25  ;;  %3931 = vmatprep.subr.bf16.mxu0 %v9277_v26  ;;  %9769 = vtanh.f32 %v3010_v30 }
 0xaf7   : > { %3972 = vmatprep.subr.bf16.mxu1 %v9280_v31  ;;  %9771 = vtanh.f32 %v3012_v36 }
 0xaf8   : > { %9773 = vtanh.f32 %v3011_v37 }
 0xaf9   : > { %3932 = vmatpush1.bf16.msra.mxu0 %v9275_v29 }
 0xafa   : > { %3973 = vmatpush1.bf16.msra.mxu1 %v9278_v38  ;;  %3933 = vmatprep.subr.bf16.mxu0 %v9283_v39 }
 0xafb   : > { %3974 = vmatprep.subr.bf16.mxu1 %v9286_v40 }
 0xafd   : > { %3934 = vmatpush1.bf16.msra.mxu0 %v9281_v41 }
 0xafe   : > { %3975 = vmatpush1.bf16.msra.mxu1 %v9284_v42  ;;  %3935 = vmatprep.subr.bf16.mxu0 %v9289_v43 }
 0xaff   : > { %v9768_v53 = vpop.eup %9767  ;;  %3976 = vmatprep.subr.bf16.mxu1 %v9292_v44 }
 0xb00   : > { %v9770_v52 = vpop.eup %9769  ;;  %v3025_v57 = vadd.f32 1.0, %v9768_v53 }
 0xb01   : > { %v9772_v58 = vpop.eup %9771  ;;  %3936 = vmatpush1.bf16.msra.mxu0 %v9287_v45  ;;  %v3026_v59 = vadd.f32 1.0, %v9770_v52  ;;  %v9299_v52 = vld [vmem:[#allocation2 + $0x300] ss:$24 sps:$4 sm:$0xff]  }
 0xb02   : > { %v9774_v3 = vpop.eup %9773  ;;  %3977 = vmatpush1.bf16.msra.mxu1 %v9290_v49  ;;  %3937 = vmatprep.subr.bf16.mxu0 %v9295_v51  ;;  %v3028_v6 = vadd.f32 1.0, %v9772_v58  ;;  %v3033_v7 = vmul.f32 %v3025_v57, %v2969_v56  ;;  %v9301_v56 = vld [vmem:[#allocation2 + $0x304] ss:$24 sps:$4 sm:$0xff]   ;;  %v9302_v57 = vld [vmem:[#allocation2 + $0x308] ss:$24 sps:$4 sm:$0xff]  }
 0xb03   : > { %3978 = vmatprep.subr.bf16.mxu1 %v9298_v62  ;;  %v3034_v8 = vmul.f32 %v3026_v59, %v2970_v61  ;;  %v3027_v46 = vadd.f32 1.0, %v9774_v3  ;;  %v9304_v58 = vld [vmem:[#allocation2 + $0x30c] ss:$24 sps:$4 sm:$0xff]   ;;  %v9310_v61 = vld [vmem:[#allocation2 + $0x33c] ss:$24 sps:$4 sm:$0xff]  }
 0xb04   : > { %v3036_v10 = vmul.f32 %v3028_v6, %v2972_v5  ;;  %v3041_v18 = vpack.c.bf16 %v3033_v7, %v3033_v7  ;;  %v9305_v59 = vld [vmem:[#allocation2 + $0x330] ss:$24 sps:$4 sm:$0xff]   ;;  %v9313_v3 = vld [vmem:[#allocation2 + $0x364] ss:$24 sps:$4 sm:$0xff]   ;;  %v9319_v6 = vld [vmem:[#allocation2 + $0x394] ss:$24 sps:$4 sm:$0xff]  }
 0xb05   : > { %3938 = vmatpush1.bf16.msra.mxu0 %v9293_v60  ;;  %v3042_v11 = vpack.c.bf16 %v3034_v8, %v3034_v8  ;;  %v3035_v12 = vmul.f32 %v3027_v46, %v2971_v9  ;;  %v9307_v60 = vld [vmem:[#allocation2 + $0x334] ss:$24 sps:$4 sm:$0xff]   ;;  %v9314_v5 = vld [vmem:[#allocation2 + $0x368] ss:$24 sps:$4 sm:$0xff]   ;;  %v9320_v9 = vld [vmem:[#allocation2 + $0x398] ss:$24 sps:$4 sm:$0xff]  }
 0xb06   : > { %3979 = vmatpush1.bf16.msra.mxu1 %v9296_v4  ;;  %v3044_v54 = vpack.c.bf16 %v3036_v10, %v3036_v10  ;;  %4647 = vmatprep.subr.bf16.mxu0 %v9301_v56  ;;  %v9311_v4 = vld [vmem:[#allocation2 + $0x360] ss:$24 sps:$4 sm:$0xff]   ;;  %v9322_v7 = vld [vmem:[#allocation2 + $0x39c] ss:$24 sps:$4 sm:$0xff]   ;;  %v9317_v8 = vld [vmem:[#allocation2 + $0x390] ss:$24 sps:$4 sm:$0xff]  }
 0xb07   : > { %3939 = vmatprep.mubr.bf16.mxu0 %v3042_v11  ;;  %v3043_v19 = vpack.c.bf16 %v3035_v12, %v3035_v12  ;;  %4688 = vmatprep.subr.bf16.mxu1 %v9304_v58  ;;  %v9325_v46 = vld [vmem:[#allocation2 + $0x3c4] ss:$24 sps:$4 sm:$0xff]   ;;  %v9323_v11 = vld [vmem:[#allocation2 + $0x3c0] ss:$24 sps:$4 sm:$0xff]   ;;  %v9365_v56 = vld [vmem:[#allocation2 + $0x510] ss:$24 sps:$4 sm:$0xff]  }
 0xb08   : > { %3980 = vmatprep.mubr.bf16.mxu1 %v3044_v54  ;;  %3940 = vmatmul.mubr.bf16.vlgmr.msra.gmra.mrb[20].mxu0 %v3041_v18  ;;  %v9328_v10 = vld [vmem:[#allocation2 + $0x3cc] ss:$24 sps:$4 sm:$0xff]   ;;  %v9326_v12 = vld [vmem:[#allocation2 + $0x3c8] ss:$24 sps:$4 sm:$0xff]   ;;  %v9334_v18 = vld [vmem:[#allocation2 + $0x3fc] ss:$24 sps:$4 sm:$0xff]  }
 0xb09   : > { %3981 = vmatmul.mubr.bf16.vlgmr.msra.gmra.mrb[36].mxu1 %v3043_v19  ;;  %4648 = vmatpush1.bf16.msra.mxu0 %v9299_v52  ;;  %v9331_v54 = vld [vmem:[#allocation2 + $0x3f4] ss:$24 sps:$4 sm:$0xff]   ;;  %v9329_v19 = vld [vmem:[#allocation2 + $0x3f0] ss:$24 sps:$4 sm:$0xff]  }
 0xb0a   : > { %4689 = vmatpush1.bf16.msra.mxu1 %v9302_v57  ;;  %4649 = vmatprep.subr.bf16.mxu0 %v9307_v60  ;;  %v9367_v52 = vld [vmem:[#allocation2 + $0x514] ss:$24 sps:$4 sm:$0xff]   ;;  %v9368_v58 = vld [vmem:[#allocation2 + $0x518] ss:$24 sps:$4 sm:$0xff]   ;;  %v9373_v60 = vld [vmem:[#allocation2 + $0x544] ss:$24 sps:$4 sm:$0xff]  }
 0xb0b   : > { %4690 = vmatprep.subr.bf16.mxu1 %v9310_v61  ;;  %v9370_v57 = vld [vmem:[#allocation2 + $0x51c] ss:$24 sps:$4 sm:$0xff]   ;;  %v9376_v61 = vld [vmem:[#allocation2 + $0x54c] ss:$24 sps:$4 sm:$0xff]  }
 0xb0d   : > { %4650 = vmatpush1.bf16.msra.mxu0 %v9305_v59  ;;  %v9379_v59 = vld [vmem:[#allocation2 + $0x574] ss:$24 sps:$4 sm:$0xff]  }
 0xb0e   : > { %4651 = vmatprep.subr.bf16.mxu0 %v9313_v3  ;;  %v9382_v3 = vld [vmem:[#allocation2 + $0x57c] ss:$24 sps:$4 sm:$0xff]  }
 0xb11   : > { %4652 = vmatpush1.bf16.msra.mxu0 %v9311_v4  ;;  %v9383_v4 = vld [vmem:[#allocation2 + $0x5a0] ss:$24 sps:$4 sm:$0xff]  }
 0xb12   : > { %4653 = vmatprep.subr.bf16.mxu0 %v9319_v6  ;;  %v9386_v6 = vld [vmem:[#allocation2 + $0x5a8] ss:$24 sps:$4 sm:$0xff]  }
 0xb15   : > { %4654 = vmatpush1.bf16.msra.mxu0 %v9317_v8  ;;  %v9391_v8 = vld [vmem:[#allocation2 + $0x5d4] ss:$24 sps:$4 sm:$0xff]  }
 0xb16   : > { %4655 = vmatprep.subr.bf16.mxu0 %v9325_v46  ;;  %v9389_v46 = vld [vmem:[#allocation2 + $0x5d0] ss:$24 sps:$4 sm:$0xff]  }
 0xb19   : > { %4656 = vmatpush1.bf16.msra.mxu0 %v9323_v11  ;;  %v9397_v11 = vld [vmem:[#allocation2 + $0x314] ss:$24 sps:$4 sm:$0xff]  }
 0xb1a   : > { %4657 = vmatprep.subr.bf16.mxu0 %v9331_v54 }
 0xb1d   : > { %4658 = vmatpush1.bf16.msra.mxu0 %v9329_v19  ;;  %v3991_v19 = vld [vmem:[%s10999_s14] sm:$0x3] }
 0xb9b   : > { %v3859_v20 = vpop.f32.mrb[16].mxu0 }
 0xb9c   : > { %v3860_v22 = vadd.f32 %v3859_v20, %v3178_v2  ;;  %v3900_v23 = vpop.f32.mrb[32].mxu1  ;;  %v3861_v24 = vpop.f32.mrb[17].mxu0  ;;  %v9337_v2 = vld [vmem:[#allocation2 + $0x424] ss:$24 sps:$4 sm:$0xff]   ;;  %v9335_v20 = vld [vmem:[#allocation2 + $0x420] ss:$24 sps:$4 sm:$0xff]  }
 0xb9d   : > { %v3862_v63 = vadd.f32 %v3861_v24, %v3182_v47  ;;  %v3902_v25 = vpop.f32.mrb[33].mxu1  ;;  %v3863_v26 = vpop.f32.mrb[18].mxu0  ;;  %v9340_v47 = vld [vmem:[#allocation2 + $0x42c] ss:$24 sps:$4 sm:$0xff]   ;;  %4659 = vmatprep.subr.bf16.mxu0 %v9337_v2  ;;  %v9346_v24 = vld [vmem:[#allocation2 + $0x45c] ss:$24 sps:$4 sm:$0xff]   ;;  %v4013_v2 = vrot.slane %v3991_v19, %v10305_v17 }
 0xb9e   : > { %v3901_v27 = vadd.f32 %v3900_v23, %v3860_v22  ;;  %v3904_v28 = vpop.f32.mrb[34].mxu1  ;;  %v3864_v31 = vpop.f32.mrb[19].mxu0  ;;  %v9338_v22 = vld [vmem:[#allocation2 + $0x428] ss:$24 sps:$4 sm:$0xff]   ;;  %v9343_v23 = vld [vmem:[#allocation2 + $0x454] ss:$24 sps:$4 sm:$0xff]   ;;  %4660 = vmatpush1.bf16.msra.mxu0 %v9335_v20 }
 0xb9f   : > { %v3903_v33 = vadd.f32 %v3902_v25, %v3862_v63  ;;  %v3905_v30 = vpop.f32.mrb[35].mxu1  ;;  %v9341_v63 = vld [vmem:[#allocation2 + $0x450] ss:$24 sps:$4 sm:$0xff]   ;;  %4661 = vmatprep.subr.bf16.mxu0 %v9343_v23  ;;  %v9349_v26 = vld [vmem:[#allocation2 + $0x484] ss:$24 sps:$4 sm:$0xff]  }
 0xba0   : > { %v9344_v25 = vld [vmem:[#allocation2 + $0x458] ss:$24 sps:$4 sm:$0xff]   ;;  %v9350_v31 = vld [vmem:[#allocation2 + $0x488] ss:$24 sps:$4 sm:$0xff]   ;;  %v9358_v30 = vld [vmem:[#allocation2 + $0x4bc] ss:$24 sps:$4 sm:$0xff]  }
 0xba1   : > { %v9347_v28 = vld [vmem:[#allocation2 + $0x480] ss:$24 sps:$4 sm:$0xff]  }
 0xba2   : > { %4662 = vmatpush1.bf16.msra.mxu0 %v9341_v63 }
 0xba3   : > { %4663 = vmatprep.subr.bf16.mxu0 %v9349_v26 }
 0xba6   : > { %4664 = vmatpush1.bf16.msra.mxu0 %v9347_v28 }
 0xbdb   : > { %v3941_v36 = vpop.f32.mrb[20].mxu0 }
 0xbdc   : > { %v3942_v37 = vadd.f32 %v3941_v36, %v3901_v27  ;;  %v3982_v29 = vpop.f32.mrb[36].mxu1  ;;  %v3943_v38 = vpop.f32.mrb[21].mxu0  ;;  %v9352_v27 = vld [vmem:[#allocation2 + $0x48c] ss:$24 sps:$4 sm:$0xff]   ;;  %v9353_v36 = vld [vmem:[#allocation2 + $0x4b0] ss:$24 sps:$4 sm:$0xff]  }
 0xbdd   : > { %v3944_v39 = vadd.f32 %v3943_v38, %v3903_v33  ;;  %v3984_v40 = vpop.f32.mrb[37].mxu1  ;;  %v3945_v41 = vpop.f32.mrb[22].mxu0  ;;  %v9355_v33 = vld [vmem:[#allocation2 + $0x4b4] ss:$24 sps:$4 sm:$0xff]   ;;  %v9359_v38 = vld [vmem:[#allocation2 + $0x4e0] ss:$24 sps:$4 sm:$0xff]  }
 0xbde   : > { %v3983_v42 = vadd.f32 %v3982_v29, %v3942_v37  ;;  %v3986_v43 = vpop.f32.mrb[38].mxu1  ;;  %v3946_v44 = vpop.f32.mrb[23].mxu0  ;;  %4665 = vmatprep.subr.bf16.mxu0 %v9355_v33  ;;  %v9356_v37 = vld [vmem:[#allocation2 + $0x4b8] ss:$24 sps:$4 sm:$0xff]   ;;  %v9361_v29 = vld [vmem:[#allocation2 + $0x4e4] ss:$24 sps:$4 sm:$0xff]  }
 0xbdf   : > { %v3985_v45 = vadd.f32 %v3984_v40, %v3944_v39  ;;  %v3987_v49 = vpop.f32.mrb[39].mxu1  ;;  %4666 = vmatpush1.bf16.msra.mxu0 %v9353_v36  ;;  %v9395_v33 = vld [vmem:[#allocation2 + $0x310] ss:$24 sps:$4 sm:$0xff]   ;;  %v9400_v36 = vld [vmem:[#allocation2 + $0x344] ss:$24 sps:$4 sm:$0xff]  }
 0xbe0   : > { %v10598_v51 = vadd.f32 %v3983_v42, %v10527_v14  ;;  %v9308_v14 = vld [vmem:[#allocation2 + $0x338] ss:$24 sps:$4 sm:$0xff]   ;;  %4667 = vmatprep.subr.bf16.mxu0 %v9361_v29  ;;  %v9364_v49 = vld [vmem:[#allocation2 + $0x4ec] ss:$24 sps:$4 sm:$0xff]  }
 0xbe1   : > { %v10601_v53 = vadd.f32 %v3985_v45, %v10525_v13  ;;  %v9316_v13 = vld [vmem:[#allocation2 + $0x36c] ss:$24 sps:$4 sm:$0xff]   ;;  %4691 = vmatpush1.bf16.msra.mxu1 %v9308_v14  ;;  %v9377_v14 = vld [vmem:[#allocation2 + $0x570] ss:$24 sps:$4 sm:$0xff]  }
 0xbe2   : > { %4692 = vmatprep.subr.bf16.mxu1 %v9316_v13  ;;  %v9380_v13 = vld [vmem:[#allocation2 + $0x578] ss:$24 sps:$4 sm:$0xff]   ;;  %v9403_v29 = vld [vmem:[#allocation2 + $0x374] ss:$24 sps:$4 sm:$0xff]  }
 0xbe3   : > { %v3993_v62 = vadd.f32 %v10601_v53, %v10598_v51  ;;  %4668 = vmatpush1.bf16.msra.mxu0 %v9359_v38  ;;  %v9401_v38 = vld [vmem:[#allocation2 + $0x370] ss:$24 sps:$4 sm:$0xff]  }
 0xbe4   : > { %4669 = vmatprep.subr.bf16.mxu0 %v9367_v52  ;;  %v9416_v52 = vld [vmem:[#allocation2 + $0x460] ss:$24 sps:$4 sm:$0xff]  }
 0xbe5   : > { %3994 = vadd.xlane.f32.xlu0 %v3993_v62  ;;  %4693 = vmatpush1.bf16.msra.mxu1 %v9314_v5  ;;  %v9362_v62 = vld [vmem:[#allocation2 + $0x4e8] ss:$24 sps:$4 sm:$0xff]   ;;  %v9385_v5 = vld [vmem:[#allocation2 + $0x5a4] ss:$24 sps:$4 sm:$0xff]  }
 0xbe6   : > { %4694 = vmatprep.subr.bf16.mxu1 %v9322_v7  ;;  %v9388_v7 = vld [vmem:[#allocation2 + $0x5ac] ss:$24 sps:$4 sm:$0xff]  }
 0xbe7   : > { %4670 = vmatpush1.bf16.msra.mxu0 %v9365_v56  ;;  %v9421_v56 = vld [vmem:[#allocation2 + $0x494] ss:$24 sps:$4 sm:$0xff]  }
 0xbe8   : > { %4671 = vmatprep.subr.bf16.mxu0 %v9373_v60  ;;  %v9422_v60 = vld [vmem:[#allocation2 + $0x4c0] ss:$24 sps:$4 sm:$0xff]  }
 0xbe9   : > { %4695 = vmatpush1.bf16.msra.mxu1 %v9320_v9  ;;  %v9394_v9 = vld [vmem:[#allocation2 + $0x5dc] ss:$24 sps:$4 sm:$0xff]  }
 0xbea   : > { %4696 = vmatprep.subr.bf16.mxu1 %v9328_v10  ;;  %v9392_v10 = vld [vmem:[#allocation2 + $0x5d8] ss:$24 sps:$4 sm:$0xff]  }
 0xbed   : > { %4697 = vmatpush1.bf16.msra.mxu1 %v9326_v12 }
 0xbee   : > { %4698 = vmatprep.subr.bf16.mxu1 %v9334_v18 }
 0xbf1   : > { %4699 = vmatpush1.bf16.msra.mxu1 %v9332_v55  ;;  %v3992_v55 = vld [vmem:[%s11000_s15] sm:$0x3] }
 0xbf2   : > { %4700 = vmatprep.subr.bf16.mxu1 %v9340_v47  ;;  %v4017_v47 = vrot.slane %v3991_v19, %v10302_v16  ;;  %v4030_v63 = vrot.slane %v3992_v55, %v10302_v16 }
 0xbf5   : > { %4701 = vmatpush1.bf16.msra.mxu1 %v9338_v22 }
 0xbf6   : > { %4702 = vmatprep.subr.bf16.mxu1 %v9346_v24  ;;  %v4026_v24 = vrot.slane %v3992_v55, %v10305_v17 }
 0xbf9   : > { %4703 = vmatpush1.bf16.msra.mxu1 %v9344_v25 }
 0xbfa   : > { %4704 = vmatprep.subr.bf16.mxu1 %v9352_v27 }
 0xbfd   : > { %4705 = vmatpush1.bf16.msra.mxu1 %v9350_v31 }
 0xbfe   : > { %4706 = vmatprep.subr.bf16.mxu1 %v9358_v30 }
 0xc01   : > { %4707 = vmatpush1.bf16.msra.mxu1 %v9356_v37  ;;  %v9398_v37 = vld [vmem:[#allocation2 + $0x340] ss:$24 sps:$4 sm:$0xff]  }
 0xc02   : > { %4708 = vmatprep.subr.bf16.mxu1 %v9364_v49  ;;  %v9413_v49 = vld [vmem:[#allocation2 + $0x430] ss:$24 sps:$4 sm:$0xff]  }
 0xc05   : > { %4709 = vmatpush1.bf16.msra.mxu1 %v9362_v62  ;;  %v9418_v62 = vld [vmem:[#allocation2 + $0x464] ss:$24 sps:$4 sm:$0xff]  }
 0xc06   : > { %4710 = vmatprep.subr.bf16.mxu1 %v9370_v57  ;;  %v9419_v57 = vld [vmem:[#allocation2 + $0x490] ss:$24 sps:$4 sm:$0xff]  }
 0xc09   : > { %4711 = vmatpush1.bf16.msra.mxu1 %v9368_v58  ;;  %v9424_v58 = vld [vmem:[#allocation2 + $0x4c4] ss:$24 sps:$4 sm:$0xff]  }
 0xc0a   : > { %4712 = vmatprep.subr.bf16.mxu1 %v9376_v61  ;;  %v9425_v61 = vld [vmem:[#allocation2 + $0x4f0] ss:$24 sps:$4 sm:$0xff]  }
 0xc72   : > { %v3995_v39 = vpop.xlane.xlu0 %3994 }
 0xc73   : > { %v3996_v40 = vmul.f32 0.00390625, %v3995_v39  ;;  %v9406_v39 = vld [vmem:[#allocation2 + $0x3a4] ss:$24 sps:$4 sm:$0xff]  }
 0xc75   : > { %v3997_v41 = vsub.f32 %v10598_v51, %v3996_v40  ;;  %v3998_v42 = vsub.f32 %v10601_v53, %v3996_v40  ;;  %v9371_v51 = vld [vmem:[#allocation2 + $0x540] ss:$24 sps:$4 sm:$0xff]  }
 0xc76   : > { %v9374_v53 = vld [vmem:[#allocation2 + $0x548] ss:$24 sps:$4 sm:$0xff]   ;;  %4672 = vmatpush1.bf16.msra.mxu0 %v9371_v51  ;;  %v9427_v51 = vld [vmem:[#allocation2 + $0x4f4] ss:$24 sps:$4 sm:$0xff]  }
 0xc77   : > { %v3999_v43 = vmul.f32 %v3997_v41, %v3997_v41  ;;  %v4000_v44 = vmul.f32 %v3998_v42, %v3998_v42  ;;  %4713 = vmatpush1.bf16.msra.mxu1 %v9374_v53  ;;  %4673 = vmatprep.subr.bf16.mxu0 %v9379_v59  ;;  %v9404_v40 = vld [vmem:[#allocation2 + $0x3a0] ss:$24 sps:$4 sm:$0xff]   ;;  %v9430_v53 = vld [vmem:[#allocation2 + $0x524] ss:$24 sps:$4 sm:$0xff]  }
 0xc78   : > { %4714 = vmatprep.subr.bf16.mxu1 %v9382_v3  ;;  %v9428_v59 = vld [vmem:[#allocation2 + $0x520] ss:$24 sps:$4 sm:$0xff]   ;;  %v9431_v3 = vld [vmem:[#allocation2 + $0x550] ss:$24 sps:$4 sm:$0xff]  }
 0xc79   : > { %v4001_v45 = vadd.f32 %v4000_v44, %v3999_v43  ;;  %v9412_v43 = vld [vmem:[#allocation2 + $0x404] ss:$24 sps:$4 sm:$0xff]   ;;  %v9410_v44 = vld [vmem:[#allocation2 + $0x400] ss:$24 sps:$4 sm:$0xff]  }
 0xc7a   : > { %4674 = vmatpush1.bf16.msra.mxu0 %v9377_v14  ;;  %v9433_v14 = vld [vmem:[#allocation2 + $0x554] ss:$24 sps:$4 sm:$0xff]  }
 0xc7b   : > { %4002 = vadd.xlane.f32.xlu1 %v4001_v45  ;;  %4715 = vmatpush1.bf16.msra.mxu1 %v9380_v13  ;;  %v9415_v45 = vld [vmem:[#allocation2 + $0x434] ss:$24 sps:$4 sm:$0xff]   ;;  %v9436_v13 = vld [vmem:[#allocation2 + $0x584] ss:$24 sps:$4 sm:$0xff]  }
 0xc7c   : > { %4675 = vmatprep.subr.bf16.mxu0 %v9385_v5  ;;  %4716 = vmatprep.subr.bf16.mxu1 %v9388_v7  ;;  %v9439_v5 = vld [vmem:[#allocation2 + $0x5b4] ss:$24 sps:$4 sm:$0xff]   ;;  %v9442_v7 = vld [vmem:[#allocation2 + $0x5e4] ss:$24 sps:$4 sm:$0xff]  }
 0xc7e   : > { %4676 = vmatpush1.bf16.msra.mxu0 %v9383_v4  ;;  %v9434_v4 = vld [vmem:[#allocation2 + $0x580] ss:$24 sps:$4 sm:$0xff]  }
 0xc7f   : > { %4717 = vmatpush1.bf16.msra.mxu1 %v9386_v6  ;;  %4677 = vmatprep.subr.bf16.mxu0 %v9391_v8  ;;  %v9437_v6 = vld [vmem:[#allocation2 + $0x5b0] ss:$24 sps:$4 sm:$0xff]   ;;  %v9440_v8 = vld [vmem:[#allocation2 + $0x5e0] ss:$24 sps:$4 sm:$0xff]  }
 0xc80   : > { %4718 = vmatprep.subr.bf16.mxu1 %v9394_v9  ;;  %v8263_v9 = vld [vmem:[%s10990_s5 + $0x6] sm:$0x3f] }
 0xc82   : > { %4678 = vmatpush1.bf16.msra.mxu0 %v9389_v46  ;;  %v4148_v46 = vrot.slane %v8263_v9, %v10336_v1 }
 0xc83   : > { %4719 = vmatpush1.bf16.msra.mxu1 %v9392_v10  ;;  %4729 = vmatprep.subr.bf16.mxu0 %v9397_v11  ;;  %v4140_v10 = vrot.slane %v8263_v9, %v10305_v17 }
 0xc84   : > { %8803 = vmatprep.subr.bf16.mxu1 %v10007_v0 }
 0xd08   : > { %v4003_v12 = vpop.xlane.xlu1 %4002 }
 0xd09   : > { %v4004_v54 = vmul.f32 0.00390625, %v4003_v12 }
 0xd0b   : > { %v4005_v18 = vadd.f32 1e-12, %v4004_v54 }
 0xd0d   : > { %9775 = vrsqrt.f32 %v4005_v18 }
 0xd17   : > { %v9776_v20 = vpop.eup %9775 }
 0xd18   : > { %v4007_v22 = vmul.f32 %v9776_v20, %v3997_v41  ;;  %v4008_v23 = vmul.f32 %v9776_v20, %v3998_v42  ;;  %v9409_v41 = vld [vmem:[#allocation2 + $0x3d4] ss:$24 sps:$4 sm:$0xff]   ;;  %v9407_v42 = vld [vmem:[#allocation2 + $0x3d0] ss:$24 sps:$4 sm:$0xff]  }
 0xd1a   : > { %v4021_v25 = vmul.f32 %v4017_v47, %v4008_v23  ;;  %v4020_v26 = vmul.f32 %v4013_v2, %v4007_v22 }
 0xd1c   : > { %v10618_v27 = vadd.f32 %v4030_v63, %v4021_v25  ;;  %v10620_v28 = vadd.f32 %v4026_v24, %v4020_v26  ;;  %v4156_v25 = vrot.slane %v8263_v9, %v10351_v21 }
 0xd1e   : > { %v4036_v31 = vpack.c.bf16 %v10618_v27, %v10618_v27  ;;  %v10626_v30 = vpack.c.bf16 %v10620_v28, %v10620_v28 }
 0xd20   : > { %4679 = vmatprep.mubr.bf16.mxu0 %v4036_v31  ;;  %4720 = vmatprep.mubr.bf16.mxu1 %v4036_v31 }
 0xd21   : > { %4680 = vmatmul.mubr.bf16.vlgmr.msra.gmra.mrb[24].mxu0 %v10626_v30  ;;  %4721 = vmatmul.mubr.bf16.vlgmr.msra.gmra.mrb[40].mxu1 %v10626_v30 }
 0xd22   : > { %4730 = vmatpush1.bf16.msra.mxu0 %v9395_v33  ;;  %4761 = vmatprep.mubr.bf16.mxu0 %v4036_v31 }
 0xd23   : > { %4731 = vmatprep.subr.bf16.mxu0 %v9400_v36  ;;  %8805 = vmatprep.mubr.msk.bf16.mxu1 %vm10008_vm0, %v10007_v0 }
 0xd26   : > { %4732 = vmatpush1.bf16.msra.mxu0 %v9398_v37 }
 0xd27   : > { %4733 = vmatprep.subr.bf16.mxu0 %v9403_v29 }
 0xd2a   : > { %4734 = vmatpush1.bf16.msra.mxu0 %v9401_v38 }
 0xd2b   : > { %4735 = vmatprep.subr.bf16.mxu0 %v9406_v39 }
 0xd2e   : > { %4736 = vmatpush1.bf16.msra.mxu0 %v9404_v40 }
 0xd2f   : > { %4737 = vmatprep.subr.bf16.mxu0 %v9409_v41 }
 0xd32   : > { %4738 = vmatpush1.bf16.msra.mxu0 %v9407_v42 }
 0xd33   : > { %4739 = vmatprep.subr.bf16.mxu0 %v9412_v43 }
 0xd36   : > { %4740 = vmatpush1.bf16.msra.mxu0 %v9410_v44 }
 0xd37   : > { %4741 = vmatprep.subr.bf16.mxu0 %v9415_v45 }
 0xd3a   : > { %4742 = vmatpush1.bf16.msra.mxu0 %v9413_v49 }
 0xd3b   : > { %4743 = vmatprep.subr.bf16.mxu0 %v9418_v62 }
 0xd3e   : > { %4744 = vmatpush1.bf16.msra.mxu0 %v9416_v52 }
 0xd3f   : > { %4745 = vmatprep.subr.bf16.mxu0 %v9421_v56 }
 0xd42   : > { %4746 = vmatpush1.bf16.msra.mxu0 %v9419_v57  ;;  %v4152_v57 = vrot.slane %v8263_v9, %v10368_v48 }
 0xd43   : > { %4747 = vmatprep.subr.bf16.mxu0 %v9424_v58  ;;  %v4144_v58 = vrot.slane %v8263_v9, %v10302_v16 }
 0xd46   : > { %4748 = vmatpush1.bf16.msra.mxu0 %v9422_v60 }
 0xd47   : > { %4749 = vmatprep.subr.bf16.mxu0 %v9427_v51 }
 0xd4a   : > { %4750 = vmatpush1.bf16.msra.mxu0 %v9425_v61  ;;  %v4160_v61 = vrot.slane %v8263_v9, %v10373_v50 }
 0xd4b   : > { %4751 = vmatprep.subr.bf16.mxu0 %v9430_v53 }
 0xd4e   : > { %4752 = vmatpush1.bf16.msra.mxu0 %v9428_v59 }
 0xd4f   : > { %4753 = vmatprep.subr.bf16.mxu0 %v9433_v14 }
 0xd52   : > { %4754 = vmatpush1.bf16.msra.mxu0 %v9431_v3 }
 0xd53   : > { %4755 = vmatprep.subr.bf16.mxu0 %v9436_v13 }
 0xd56   : > { %4756 = vmatpush1.bf16.msra.mxu0 %v9434_v4 }
 0xd57   : > { %4757 = vmatprep.subr.bf16.mxu0 %v9439_v5 }
 0xd5a   : > { %4758 = vmatpush1.bf16.msra.mxu0 %v9437_v6 }
 0xd5b   : > { %4759 = vmatprep.subr.bf16.mxu0 %v9442_v7 }
 0xd5e   : > { %4760 = vmatpush1.bf16.msra.mxu0 %v9440_v8 }
 0xd61   : > { %4762 = vmatmul.mubr.bf16.vlgmr.msra.gmra.mrb[28].mxu0 %v10626_v30 }
 0xdf4   : > { %v4681_v11 = vpop.f32.mrb[24].mxu0  ;;  %v4722_v12 = vpop.f32.mrb[40].mxu1 }
 0xdf5   : > { %v4723_v54 = vadd.f32 %v4722_v12, %v4148_v46  ;;  %v4683_v18 = vpop.f32.mrb[25].mxu0  ;;  %v4724_v19 = vpop.f32.mrb[41].mxu1  ;;  %v4682_v55 = vadd.f32 %v4681_v11, %v4140_v10 }
 0xdf6   : > { %v4685_v2 = vpop.f32.mrb[26].mxu0  ;;  %v4726_v47 = vpop.f32.mrb[42].mxu1  ;;  %v4725_v51 = vadd.f32 %v4724_v19, %v4152_v57  ;;  %v4684_v59 = vadd.f32 %v4683_v18, %v4144_v58  ;;  %v9481_v57 = vld [vmem:[%s10991_s6 + $0x1c4] ss:$8 sps:$4 sm:$0xff]   ;;  %v9479_v58 = vld [vmem:[%s10991_s6 + $0x1c0] ss:$8 sps:$4 sm:$0xff]  }
 0xdf7   : > { %v4772_v20 = vpack.c.bf16 %v4723_v54, %v4723_v54  ;;  %v4686_v22 = vpop.f32.mrb[27].mxu0  ;;  %v4727_v23 = vpop.f32.mrb[43].mxu1  ;;  %v4770_v24 = vmul.f32 0.088388346, %v4682_v55 }
 0xdf8   : > { %v4874_v3 = vpack.c.bf16 %v4725_v51, %v4725_v51  ;;  %v4872_v4 = vmul.f32 0.088388346, %v4684_v59  ;;  %v9445_v23 = vld [vmem:[%s10991_s6 + $0x104] ss:$8 sps:$4 sm:$0xff]   ;;  %v9482_v51 = vld [vmem:[%s10991_s6 + $0x1d0] ss:$8 sps:$4 sm:$0xff]  }
 0xdf9   : > { %8804 = vmatpush3.bf16.xpose.msra.mxu1 %v4772_v20  ;;  %v4771_v63 = vpack.c.bf16 %v4770_v24, %v4770_v24  ;;  %v9448_v24 = vld [vmem:[%s10991_s6 + $0x114] ss:$8 sps:$4 sm:$0xff]   ;;  %5182 = vmatprep.subr.bf16.mxu0 %v9445_v23  ;;  %v5274_v23 = vld [vmem:[#allocation5 + $0x400] sm:$0xff] }
 0xdfa   : > { %8809 = vmatprep.subr.bf16.mxu1 %v10007_v0  ;;  %v4873_v6 = vpack.c.bf16 %v4872_v4, %v4872_v4  ;;  %v9488_v4 = vld [vmem:[%s10991_s6 + $0x1f0] ss:$8 sps:$4 sm:$0xff]  }
 0xe00   : > { %8806 = vmatmul.mubr.bf16.vlgmr.msra.gmra.mrb[44].mxu1 %v4771_v63  ;;  %v9446_v63 = vld [vmem:[%s10991_s6 + $0x110] ss:$8 sps:$4 sm:$0xff]  }
 0xe01   : > { %8811 = vmatprep.mubr.msk.bf16.mxu1 %vm10008_vm0, %v10007_v0 }
 0xe34   : > { %v4763_v26 = vpop.f32.mrb[28].mxu0 }
 0xe35   : > { %v4764_v31 = vadd.f32 %v4763_v26, %v4156_v25  ;;  %v4765_v33 = vpop.f32.mrb[29].mxu0  ;;  %v9451_v25 = vld [vmem:[%s10991_s6 + $0x124] ss:$8 sps:$4 sm:$0xff]   ;;  %v9449_v26 = vld [vmem:[%s10991_s6 + $0x120] ss:$8 sps:$4 sm:$0xff]  }
 0xe36   : > { %v4767_v30 = vpop.f32.mrb[30].mxu0  ;;  %v4766_v13 = vadd.f32 %v4765_v33, %v4160_v61  ;;  %v9452_v33 = vld [vmem:[%s10991_s6 + $0x130] ss:$8 sps:$4 sm:$0xff]   ;;  %v9487_v61 = vld [vmem:[%s10991_s6 + $0x1e4] ss:$8 sps:$4 sm:$0xff]  }
 0xe37   : > { %v4773_v36 = vpack.c.bf16 %v4764_v31, %v4764_v31  ;;  %v4768_v37 = vpop.f32.mrb[31].mxu0  ;;  %v9454_v31 = vld [vmem:[%s10991_s6 + $0x134] ss:$8 sps:$4 sm:$0xff]   ;;  %v9457_v30 = vld [vmem:[%s10991_s6 + $0x144] ss:$8 sps:$4 sm:$0xff]  }
 0xe38   : > { %v4875_v5 = vpack.c.bf16 %v4766_v13, %v4766_v13  ;;  %v9460_v37 = vld [vmem:[%s10991_s6 + $0x154] ss:$8 sps:$4 sm:$0xff]  }
 0xe39   : > { %v4830_v29 = vsel %vm1550_vm1, %v4773_v36, 0  ;;  %v9455_v36 = vld [vmem:[%s10991_s6 + $0x140] ss:$8 sps:$4 sm:$0xff]  }
 0xe3a   : > { %8810 = vmatpush3.bf16.msra.mxu1 %v4830_v29  ;;  %v4932_v7 = vsel %vm1550_vm1, %v4875_v5, 0  ;;  %v9458_v29 = vld [vmem:[%s10991_s6 + $0x150] ss:$8 sps:$4 sm:$0xff]   ;;  %v9490_v5 = vld [vmem:[%s10991_s6 + $0x1f4] ss:$8 sps:$4 sm:$0xff]  }
 0xe3b   : > { %8815 = vmatprep.subr.bf16.mxu1 %v10007_v0 }
 0xed3   : > { %v4808_v38 = vpop.f32.mrb[44].mxu1 }
 0xed4   : > { %v4809_v39 = vadd.f32 %v4808_v38, %v10362_v35  ;;  %v8807_v40 = vpop.f32.mrb[45].mxu1  ;;  %v9463_v38 = vld [vmem:[%s10991_s6 + $0x164] ss:$8 sps:$4 sm:$0xff]  }
 0xed5   : > { %v4811_v41 = vpop.f32.mrb[46].mxu1  ;;  %v9466_v40 = vld [vmem:[%s10991_s6 + $0x174] ss:$8 sps:$4 sm:$0xff]  }
 0xed6   : > { %v8808_v42 = vpop.f32.mrb[47].mxu1  ;;  %v4814_v43 = vsel %vm1534_vm2, %v4809_v39, -inf  ;;  %v9464_v41 = vld [vmem:[%s10991_s6 + $0x170] ss:$8 sps:$4 sm:$0xff]  }
 0xed7   : > { %4815 = vmax.xlane.f32.xlu0 %v4814_v43  ;;  %v9469_v42 = vld [vmem:[%s10991_s6 + $0x184] ss:$8 sps:$4 sm:$0xff]   ;;  %v9467_v43 = vld [vmem:[%s10991_s6 + $0x180] ss:$8 sps:$4 sm:$0xff]  }
 0xf64   : > { %v4816_v44 = vpop.xlane.xlu0 %4815 }
 0xf65   : > { %v4817_v45 = vsub.f32 %v4809_v39, %v4816_v44  ;;  %v9461_v39 = vld [vmem:[%s10991_s6 + $0x160] ss:$8 sps:$4 sm:$0xff]   ;;  %v9472_v44 = vld [vmem:[%s10991_s6 + $0x194] ss:$8 sps:$4 sm:$0xff]  }
 0xf67   : > { %v4818_v49 = vmul.f32 1.442695, %v4817_v45  ;;  %v9470_v45 = vld [vmem:[%s10991_s6 + $0x190] ss:$8 sps:$4 sm:$0xff]  }
 0xf69   : > { %9777 = vpow2.f32 %v4818_v49  ;;  %v9475_v49 = vld [vmem:[%s10991_s6 + $0x1a4] ss:$8 sps:$4 sm:$0xff]  }
 0xf73   : > { %v9778_v62 = vpop.eup %9777 }
 0xf74   : > { %v4820_v52 = vsel %vm1534_vm2, %v9778_v62, 0.0 }
 0xf75   : > { %4821 = vadd.xlane.f32.xlu1 %v4820_v52  ;;  %v9478_v52 = vld [vmem:[%s10991_s6 + $0x1b4] ss:$8 sps:$4 sm:$0xff]  }
0x1002   : > { %v4822_v56 = vpop.xlane.xlu1 %4821 }
0x1003   : > { %9779 = vrcp.f32 %v4822_v56  ;;  %v9476_v56 = vld [vmem:[%s10991_s6 + $0x1b0] ss:$8 sps:$4 sm:$0xff]  }
0x100d   : > { %v9780_v60 = vpop.eup %9779 }
0x100e   : > { %v4824_v53 = vmul.f32 %v9780_v60, %v9778_v62  ;;  %v9473_v62 = vld [vmem:[%s10991_s6 + $0x1a0] ss:$8 sps:$4 sm:$0xff]   ;;  %v9484_v60 = vld [vmem:[%s10991_s6 + $0x1d4] ss:$8 sps:$4 sm:$0xff]  }
0x1010   : > { %v4825_v14 = vpack.c.bf16 %v4824_v53, %v4824_v53  ;;  %v9485_v53 = vld [vmem:[%s10991_s6 + $0x1e0] ss:$8 sps:$4 sm:$0xff]  }
0x1012   : > { %8812 = vmatmul.mubr.msk.bf16.vlgmr.msra.gmra.mrb[48].mxu1 %vm1534_vm2, %v4825_v14 }
0x1013   : > { %8816 = vmatpush3.bf16.xpose.msra.mxu1 %v4874_v3  ;;  %8817 = vmatprep.mubr.msk.bf16.mxu1 %vm10008_vm0, %v10007_v0 }
0x1014   : > { %8821 = vmatprep.subr.bf16.mxu1 %v10007_v0 }
0x101a   : > { %8818 = vmatmul.mubr.bf16.vlgmr.msra.gmra.mrb[52].mxu1 %v4873_v6 }
0x101b   : > { %8822 = vmatpush3.bf16.msra.mxu1 %v4932_v7  ;;  %8823 = vmatprep.mubr.msk.bf16.mxu1 %vm10008_vm0, %v10007_v0 }
0x10e5   : > { %v10657_v8 = vpop.f32.mrb[48].mxu1 }
0x10e6   : > { %v8813_v9 = vpop.f32.mrb[49].mxu1 }
0x10e7   : > { %v4869_v46 = vpop.f32.mrb[50].mxu1 }
0x10e8   : > { %v8814_v10 = vpop.f32.mrb[51].mxu1  ;;  %v4974_v46 = vpack.c.bf16 %v10657_v8, %v10657_v8 }
0x10ed   : > { %v4910_v11 = vpop.f32.mrb[52].mxu1 }
0x10ee   : > { %v4911_v12 = vadd.f32 %v4910_v11, %v10362_v35  ;;  %v8819_v54 = vpop.f32.mrb[53].mxu1  ;;  %v9443_v35 = vld [vmem:[%s10991_s6 + $0x100] ss:$8 sps:$4 sm:$0xff]  }
0x10ef   : > { %v4913_v18 = vpop.f32.mrb[54].mxu1  ;;  %5183 = vmatpush1.bf16.msra.mxu0 %v9443_v35 }
0x10f0   : > { %v8820_v19 = vpop.f32.mrb[55].mxu1  ;;  %v4916_v55 = vsel %vm1534_vm2, %v4911_v12, -inf  ;;  %5184 = vmatprep.subr.bf16.mxu0 %v9448_v24  ;;  %v5278_v24 = vld [vmem:[#allocation5 + $0x420] sm:$0xff] }
0x10f1   : > { %4917 = vmax.xlane.f32.xlu0 %v4916_v55 }
0x10f3   : > { %5185 = vmatpush1.bf16.msra.mxu0 %v9446_v63  ;;  %v5275_v63 = vld [vmem:[#allocation5 + $0x408] sm:$0xff] }
0x10f4   : > { %5186 = vmatprep.subr.bf16.mxu0 %v9451_v25  ;;  %v8430_v25 = vcombine.low %v5274_v23, %v5278_v24 }
0x10f7   : > { %5187 = vmatpush1.bf16.msra.mxu0 %v9449_v26  ;;  %v8431_v26 = vcombine.high %v5274_v23, %v5278_v24  ;;  %v5330_v24 = vld [vmem:[#allocation5 + $0x5c0] sm:$0xff] }
0x10f8   : > { %5188 = vmatprep.subr.bf16.mxu0 %v9454_v31  ;;  %v5279_v31 = vld [vmem:[#allocation5 + $0x428] sm:$0xff] }
0x10f9   : > { %6085 = vmatprep.subr.bf16.mxu1 %v8431_v26  ;;  %v5335_v26 = vld [vmem:[#allocation5 + $0x5e8] sm:$0xff] }
0x10fb   : > { %5189 = vmatpush1.bf16.msra.mxu0 %v9452_v33  ;;  %v5282_v33 = vld [vmem:[#allocation5 + $0x440] sm:$0xff] }
0x10fc   : > { %5190 = vmatprep.subr.bf16.mxu0 %v9457_v30  ;;  %v5286_v30 = vld [vmem:[#allocation5 + $0x460] sm:$0xff] }
0x10ff   : > { %5191 = vmatpush1.bf16.msra.mxu0 %v9455_v36  ;;  %v8432_v36 = vcombine.low %v5275_v63, %v5279_v31 }
0x1100   : > { %5192 = vmatprep.subr.bf16.mxu0 %v9460_v37  ;;  %v8433_v37 = vcombine.high %v5275_v63, %v5279_v31  ;;  %v5334_v63 = vld [vmem:[#allocation5 + $0x5e0] sm:$0xff] }
0x1103   : > { %5193 = vmatpush1.bf16.msra.mxu0 %v9458_v29  ;;  %v5283_v29 = vld [vmem:[#allocation5 + $0x448] sm:$0xff] }
0x1104   : > { %5194 = vmatprep.subr.bf16.mxu0 %v9463_v38  ;;  %v5287_v38 = vld [vmem:[#allocation5 + $0x468] sm:$0xff] }
0x1107   : > { %5195 = vmatpush1.bf16.msra.mxu0 %v9461_v39  ;;  %v5290_v39 = vld [vmem:[#allocation5 + $0x480] sm:$0xff] }
0x1108   : > { %5196 = vmatprep.subr.bf16.mxu0 %v9466_v40  ;;  %v5294_v40 = vld [vmem:[#allocation5 + $0x4a0] sm:$0xff] }
0x110b   : > { %5197 = vmatpush1.bf16.msra.mxu0 %v9464_v41  ;;  %v5291_v41 = vld [vmem:[#allocation5 + $0x488] sm:$0xff] }
0x110c   : > { %5198 = vmatprep.subr.bf16.mxu0 %v9469_v42  ;;  %v5295_v42 = vld [vmem:[#allocation5 + $0x4a8] sm:$0xff] }
0x110f   : > { %5199 = vmatpush1.bf16.msra.mxu0 %v9467_v43  ;;  %v8438_v43 = vcombine.low %v5282_v33, %v5286_v30 }
0x1110   : > { %5200 = vmatprep.subr.bf16.mxu0 %v9472_v44  ;;  %v8440_v44 = vcombine.low %v5283_v29, %v5287_v38 }
0x1113   : > { %5201 = vmatpush1.bf16.msra.mxu0 %v9470_v45  ;;  %v8447_v45 = vcombine.high %v5290_v39, %v5294_v40 }
0x1114   : > { %5202 = vmatprep.subr.bf16.mxu0 %v9475_v49  ;;  %v8449_v49 = vcombine.high %v5291_v41, %v5295_v42 }
0x1117   : > { %5203 = vmatpush1.bf16.msra.mxu0 %v9473_v62  ;;  %v5298_v62 = vld [vmem:[#allocation5 + $0x4c0] sm:$0xff] }
0x1118   : > { %5204 = vmatprep.subr.bf16.mxu0 %v9478_v52  ;;  %v5302_v52 = vld [vmem:[#allocation5 + $0x4e0] sm:$0xff] }
0x111b   : > { %5205 = vmatpush1.bf16.msra.mxu0 %v9476_v56  ;;  %v5299_v56 = vld [vmem:[#allocation5 + $0x4c8] sm:$0xff] }
0x111c   : > { %5206 = vmatprep.subr.bf16.mxu0 %v9481_v57  ;;  %v5303_v57 = vld [vmem:[#allocation5 + $0x4e8] sm:$0xff] }
0x111f   : > { %5207 = vmatpush1.bf16.msra.mxu0 %v9479_v58  ;;  %v8446_v58 = vcombine.low %v5290_v39, %v5294_v40  ;;  %v8486_v39 = vcombine.low %v5330_v24, %v5334_v63 }
0x1120   : > { %5208 = vmatprep.subr.bf16.mxu0 %v9484_v60  ;;  %v8448_v60 = vcombine.low %v5291_v41, %v5295_v42  ;;  %v5346_v42 = vld [vmem:[#allocation5 + $0x640] sm:$0xff] }
0x1123   : > { %5209 = vmatpush1.bf16.msra.mxu0 %v9482_v51  ;;  %v8455_v51 = vcombine.high %v5298_v62, %v5302_v52 }
0x1124   : > { %5210 = vmatprep.subr.bf16.mxu0 %v9487_v61  ;;  %v8457_v61 = vcombine.high %v5299_v56, %v5303_v57 }
0x1127   : > { %5211 = vmatpush1.bf16.msra.mxu0 %v9485_v53  ;;  %v5306_v53 = vld [vmem:[#allocation5 + $0x500] sm:$0xff] }
0x1128   : > { %5212 = vmatprep.subr.bf16.mxu0 %v9490_v5 }
0x112b   : > { %5213 = vmatpush1.bf16.msra.mxu0 %v9488_v4  ;;  %v8456_v4 = vcombine.low %v5299_v56, %v5303_v57  ;;  %v5354_v57 = vld [vmem:[#allocation5 + $0x680] sm:$0xff] }
0x112c   : > { %6126 = vmatprep.subr.bf16.mxu0 %v8433_v37  ;;  %v5338_v37 = vld [vmem:[#allocation5 + $0x600] sm:$0xff] }
0x117e   : > { %v4918_v2 = vpop.xlane.xlu0 %4917 }
0x117f   : > { %v4919_v47 = vsub.f32 %v4911_v12, %v4918_v2  ;;  %v8394_v12 = vld [vmem:[%s10992_s7 + $0x2] sm:$0x3] }
0x1180   : > { %v5015_v54 = vrot.slane %v8394_v12, %v10305_v17  ;;  %v5019_v18 = vrot.slane %v8394_v12, %v10302_v16 }
0x1181   : > { %v4920_v20 = vmul.f32 1.442695, %v4919_v47 }
0x1183   : > { %9781 = vpow2.f32 %v4920_v20 }
0x118d   : > { %v10661_v22 = vpop.eup %9781 }
0x118e   : > { %v4922_v0 = vsel %vm1534_vm2, %v10661_v22, 0.0 }
0x118f   : > { %4923 = vadd.xlane.f32.xlu1 %v4922_v0 }
0x121c   : > { %v4924_v59 = vpop.xlane.xlu1 %4923 }
0x121d   : > { %9783 = vrcp.f32 %v4924_v59  ;;  %v5310_v59 = vld [vmem:[#allocation5 + $0x520] sm:$0xff] }
0x121e   : > { %v8463_v5 = vcombine.high %v5306_v53, %v5310_v59 }
0x1227   : > { %v9784_v14 = vpop.eup %9783 }
0x1228   : > { %v4926_v3 = vmul.f32 %v9784_v14, %v10661_v22  ;;  %v5307_v14 = vld [vmem:[#allocation5 + $0x508] sm:$0xff] }
0x122a   : > { %v4927_v13 = vpack.c.bf16 %v4926_v3, %v4926_v3  ;;  %v5311_v3 = vld [vmem:[#allocation5 + $0x528] sm:$0xff] }
0x122b   : > { %v8464_v12 = vcombine.low %v5307_v14, %v5311_v3 }
0x122c   : > { %8824 = vmatmul.mubr.msk.bf16.vlgmr.msra.gmra.mrb[56].mxu1 %vm1534_vm2, %v4927_v13  ;;  %v8454_v13 = vcombine.low %v5298_v62, %v5302_v52 }
0x122d   : > { %6086 = vmatpush1.bf16.msra.mxu1 %v8430_v25  ;;  %v5331_v25 = vld [vmem:[#allocation5 + $0x5c8] sm:$0xff] }
0x12ff   : > { %v4968_v6 = vpop.f32.mrb[56].mxu1 }
0x1300   : > { %v4975_v7 = vpack.c.bf16 %v4968_v6, %v4968_v6  ;;  %v8825_v9 = vpop.f32.mrb[57].mxu1  ;;  %v8465_v6 = vcombine.high %v5307_v14, %v5311_v3 }
0x1301   : > { %v4971_v10 = vpop.f32.mrb[58].mxu1  ;;  %v5318_v9 = vld [vmem:[#allocation5 + $0x560] sm:$0xff] }
0x1302   : > { %v8826_v11 = vpop.f32.mrb[59].mxu1  ;;  %5214 = vmatprep.mubr.bf16.mxu0 %v4975_v7  ;;  %v5314_v7 = vld [vmem:[#allocation5 + $0x540] sm:$0xff]  ;;  %v5319_v10 = vld [vmem:[#allocation5 + $0x568] sm:$0xff] }
0x1303   : > { %5215 = vmatmul.mubr.bf16.vlgmr.msra.gmra.mrb[32].mxu0 %v4974_v46  ;;  %v5315_v46 = vld [vmem:[#allocation5 + $0x548] sm:$0xff]  ;;  %v8462_v11 = vcombine.low %v5306_v53, %v5310_v59 }
0x1304   : > { %6127 = vmatpush1.bf16.msra.mxu0 %v8432_v36  ;;  %v8489_v36 = vcombine.high %v5331_v25, %v5335_v26 }
0x13d6   : > { %v5216_v19 = vpop.f32.mrb[32].mxu0 }
0x13d7   : > { %v5217_v55 = vadd.f32 %v5216_v19, %v5015_v54  ;;  %v5218_v2 = vpop.f32.mrb[33].mxu0  ;;  %v8471_v54 = vcombine.high %v5314_v7, %v5318_v9  ;;  %v5322_v19 = vld [vmem:[#allocation5 + $0x580] sm:$0xff] }
0x13d8   : > { %v5219_v47 = vadd.f32 %v5218_v2, %v5019_v18  ;;  %v5220_v20 = vpop.f32.mrb[34].mxu0  ;;  %v8473_v18 = vcombine.high %v5315_v46, %v5319_v10  ;;  %v5323_v2 = vld [vmem:[#allocation5 + $0x588] sm:$0xff] }
0x13d9   : > { %v10771_v22 = vadd.f32 %v5217_v55, %v10620_v28  ;;  %v5221_v8 = vpop.f32.mrb[35].mxu0  ;;  %v8439_v28 = vcombine.high %v5282_v33, %v5286_v30  ;;  %v5326_v55 = vld [vmem:[#allocation5 + $0x5a0] sm:$0xff]  ;;  %v8470_v20 = vcombine.low %v5314_v7, %v5318_v9  ;;  %v8487_v30 = vcombine.high %v5330_v24, %v5334_v63 }
0x13da   : > { %v10774_v0 = vadd.f32 %v5219_v47, %v10618_v27  ;;  %v8441_v27 = vcombine.high %v5283_v29, %v5287_v38  ;;  %v5327_v47 = vld [vmem:[#allocation5 + $0x5a8] sm:$0xff]  ;;  %v8472_v8 = vcombine.low %v5315_v46, %v5319_v10  ;;  %v8478_v31 = vcombine.low %v5322_v19, %v5326_v55 }
0x13db   : > { %6087 = vmatprep.subr.bf16.mxu1 %v8439_v28  ;;  %v8481_v23 = vcombine.high %v5323_v2, %v5327_v47  ;;  %v8480_v33 = vcombine.low %v5323_v2, %v5327_v47  ;;  %v5342_v28 = vld [vmem:[#allocation5 + $0x620] sm:$0xff]  ;;  %v5339_v29 = vld [vmem:[#allocation5 + $0x608] sm:$0xff] }
0x13dc   : > { %v5229_v35 = vadd.f32 %v10774_v0, %v10771_v22  ;;  %6128 = vmatprep.subr.bf16.mxu0 %v8441_v27  ;;  %6088 = vmatpush1.bf16.msra.mxu1 %v8438_v43  ;;  %v5343_v38 = vld [vmem:[#allocation5 + $0x628] sm:$0xff]  ;;  %v8488_v27 = vcombine.low %v5331_v25, %v5335_v26  ;;  %v8495_v40 = vcombine.high %v5338_v37, %v5342_v28  ;;  %v5350_v43 = vld [vmem:[#allocation5 + $0x660] sm:$0xff] }
0x13dd   : > { %6129 = vmatpush1.bf16.msra.mxu0 %v8440_v44  ;;  %6089 = vmatprep.subr.bf16.mxu1 %v8447_v45  ;;  %v8497_v41 = vcombine.high %v5339_v29, %v5343_v38  ;;  %v5347_v44 = vld [vmem:[#allocation5 + $0x648] sm:$0xff]  ;;  %v8496_v62 = vcombine.low %v5339_v29, %v5343_v38  ;;  %v8503_v52 = vcombine.high %v5346_v42, %v5350_v43  ;;  %v5374_v47 = vld [vmem:[#allocation5 + $0x720] sm:$0xff] }
0x13de   : > { %5230 = vadd.xlane.f32.xlu0 %v5229_v35  ;;  %6130 = vmatprep.subr.bf16.mxu0 %v8449_v49  ;;  %v8479_v35 = vcombine.high %v5322_v19, %v5326_v55  ;;  %v5351_v45 = vld [vmem:[#allocation5 + $0x668] sm:$0xff]  ;;  %v8494_v49 = vcombine.low %v5338_v37, %v5342_v28  ;;  %v5378_v25 = vld [vmem:[#allocation5 + $0x740] sm:$0xff] }
0x13df   : > { %v8505_v56 = vcombine.high %v5347_v44, %v5351_v45  ;;  %v8504_v53 = vcombine.low %v5347_v44, %v5351_v45  ;;  %v5367_v19 = vld [vmem:[#allocation5 + $0x6e8] sm:$0xff]  ;;  %v5382_v26 = vld [vmem:[#allocation5 + $0x760] sm:$0xff] }
0x13e0   : > { %6090 = vmatpush1.bf16.msra.mxu1 %v8446_v58  ;;  %v5358_v58 = vld [vmem:[#allocation5 + $0x6a0] sm:$0xff] }
0x13e1   : > { %6131 = vmatpush1.bf16.msra.mxu0 %v8448_v60  ;;  %6091 = vmatprep.subr.bf16.mxu1 %v8455_v51  ;;  %v5355_v60 = vld [vmem:[#allocation5 + $0x688] sm:$0xff]  ;;  %v8511_v59 = vcombine.high %v5354_v57, %v5358_v58  ;;  %v8510_v3 = vcombine.low %v5354_v57, %v5358_v58  ;;  %v5386_v29 = vld [vmem:[#allocation5 + $0x780] sm:$0xff] }
0x13e2   : > { %6132 = vmatprep.subr.bf16.mxu0 %v8457_v61  ;;  %v5359_v51 = vld [vmem:[#allocation5 + $0x6a8] sm:$0xff]  ;;  %v8502_v61 = vcombine.low %v5346_v42, %v5350_v43  ;;  %v5390_v38 = vld [vmem:[#allocation5 + $0x7a0] sm:$0xff] }
0x13e3   : > { %v8513_v14 = vcombine.high %v5355_v60, %v5359_v51  ;;  %v5394_v42 = vld [vmem:[#allocation5 + $0x7c0] sm:$0xff] }
0x13e4   : > { %6092 = vmatpush1.bf16.msra.mxu1 %v8454_v13  ;;  %v8512_v13 = vcombine.low %v5355_v60, %v5359_v51  ;;  %v5398_v43 = vld [vmem:[#allocation5 + $0x7e0] sm:$0xff]  ;;  %v5276_v60 = vld [vmem:[#allocation5 + $0x410] sm:$0xff] }
0x13e5   : > { %6133 = vmatpush1.bf16.msra.mxu0 %v8456_v4  ;;  %6093 = vmatprep.subr.bf16.mxu1 %v8463_v5  ;;  %v8550_v57 = vcombine.low %v5394_v42, %v5398_v43  ;;  %v5280_v51 = vld [vmem:[#allocation5 + $0x430] sm:$0xff] }
0x13e6   : > { %6134 = vmatprep.subr.bf16.mxu0 %v8465_v6 }
0x13e8   : > { %6094 = vmatpush1.bf16.msra.mxu1 %v8462_v11  ;;  %v5362_v11 = vld [vmem:[#allocation5 + $0x6c0] sm:$0xff] }
0x13e9   : > { %6135 = vmatpush1.bf16.msra.mxu0 %v8464_v12  ;;  %6095 = vmatprep.subr.bf16.mxu1 %v8471_v54  ;;  %v5366_v12 = vld [vmem:[#allocation5 + $0x6e0] sm:$0xff]  ;;  %v5363_v54 = vld [vmem:[#allocation5 + $0x6c8] sm:$0xff] }
0x13ea   : > { %6136 = vmatprep.subr.bf16.mxu0 %v8473_v18  ;;  %v8519_v18 = vcombine.high %v5362_v11, %v5366_v12  ;;  %v8518_v55 = vcombine.low %v5362_v11, %v5366_v12  ;;  %v8520_v2 = vcombine.low %v5363_v54, %v5367_v19 }
0x13ec   : > { %6096 = vmatpush1.bf16.msra.mxu1 %v8470_v20  ;;  %v5371_v20 = vld [vmem:[#allocation5 + $0x708] sm:$0xff] }
0x13ed   : > { %6137 = vmatpush1.bf16.msra.mxu0 %v8472_v8  ;;  %6097 = vmatprep.subr.bf16.mxu1 %v8479_v35  ;;  %v5375_v35 = vld [vmem:[#allocation5 + $0x728] sm:$0xff] }
0x13ee   : > { %6138 = vmatprep.subr.bf16.mxu0 %v8481_v23  ;;  %v8528_v24 = vcombine.low %v5371_v20, %v5375_v35  ;;  %v8529_v63 = vcombine.high %v5371_v20, %v5375_v35  ;;  %v5288_v35 = vld [vmem:[#allocation5 + $0x470] sm:$0xff] }
0x13f0   : > { %6098 = vmatpush1.bf16.msra.mxu1 %v8478_v31  ;;  %v5379_v31 = vld [vmem:[#allocation5 + $0x748] sm:$0xff] }
0x13f1   : > { %6139 = vmatpush1.bf16.msra.mxu0 %v8480_v33  ;;  %6099 = vmatprep.subr.bf16.mxu1 %v8487_v30  ;;  %v8535_v33 = vcombine.high %v5378_v25, %v5382_v26  ;;  %v5383_v30 = vld [vmem:[#allocation5 + $0x768] sm:$0xff] }
0x13f2   : > { %6140 = vmatprep.subr.bf16.mxu0 %v8489_v36  ;;  %v8534_v36 = vcombine.low %v5378_v25, %v5382_v26  ;;  %v8536_v37 = vcombine.low %v5379_v31, %v5383_v30  ;;  %v8537_v28 = vcombine.high %v5379_v31, %v5383_v30  ;;  %v5296_v31 = vld [vmem:[#allocation5 + $0x4b0] sm:$0xff]  ;;  %v5297_v30 = vld [vmem:[#allocation5 + $0x4b8] sm:$0xff] }
0x13f4   : > { %6100 = vmatpush1.bf16.msra.mxu1 %v8486_v39  ;;  %v5387_v39 = vld [vmem:[#allocation5 + $0x788] sm:$0xff] }
0x13f5   : > { %6141 = vmatpush1.bf16.msra.mxu0 %v8488_v27  ;;  %6101 = vmatprep.subr.bf16.mxu1 %v8495_v40  ;;  %v8542_v27 = vcombine.low %v5386_v29, %v5390_v38  ;;  %v8543_v40 = vcombine.high %v5386_v29, %v5390_v38  ;;  %v5300_v38 = vld [vmem:[#allocation5 + $0x4d0] sm:$0xff] }
0x13f6   : > { %6142 = vmatprep.subr.bf16.mxu0 %v8497_v41  ;;  %v5391_v41 = vld [vmem:[#allocation5 + $0x7a8] sm:$0xff] }
0x13f7   : > { %v8544_v44 = vcombine.low %v5387_v39, %v5391_v41  ;;  %v8545_v45 = vcombine.high %v5387_v39, %v5391_v41  ;;  %v5304_v39 = vld [vmem:[#allocation5 + $0x4f0] sm:$0xff] }
0x13f8   : > { %6102 = vmatpush1.bf16.msra.mxu1 %v8494_v49  ;;  %v8551_v49 = vcombine.high %v5394_v42, %v5398_v43  ;;  %v8459_v43 = vcombine.high %v5300_v38, %v5304_v39 }
0x13f9   : > { %6143 = vmatpush1.bf16.msra.mxu0 %v8496_v62  ;;  %6103 = vmatprep.subr.bf16.mxu1 %v8503_v52  ;;  %v5395_v62 = vld [vmem:[#allocation5 + $0x7c8] sm:$0xff] }
0x13fa   : > { %6144 = vmatprep.subr.bf16.mxu0 %v8505_v56  ;;  %v5399_v52 = vld [vmem:[#allocation5 + $0x7e8] sm:$0xff] }
0x13fb   : > { %v8553_v56 = vcombine.high %v5395_v62, %v5399_v52  ;;  %v8552_v58 = vcombine.low %v5395_v62, %v5399_v52  ;;  %v5309_v62 = vld [vmem:[#allocation5 + $0x518] sm:$0xff] }
0x13fc   : > { %6104 = vmatpush1.bf16.msra.mxu1 %v8502_v61  ;;  %v5277_v61 = vld [vmem:[#allocation5 + $0x418] sm:$0xff] }
0x13fd   : > { %6145 = vmatpush1.bf16.msra.mxu0 %v8504_v53  ;;  %6105 = vmatprep.subr.bf16.mxu1 %v8511_v59  ;;  %v8434_v53 = vcombine.low %v5276_v60, %v5280_v51  ;;  %v8435_v59 = vcombine.high %v5276_v60, %v5280_v51  ;;  %v5313_v52 = vld [vmem:[#allocation5 + $0x538] sm:$0xff]  ;;  %v5316_v51 = vld [vmem:[#allocation5 + $0x550] sm:$0xff] }
0x13fe   : > { %6146 = vmatprep.subr.bf16.mxu0 %v8513_v14  ;;  %v5281_v14 = vld [vmem:[#allocation5 + $0x438] sm:$0xff]  ;;  %v8469_v60 = vcombine.high %v5309_v62, %v5313_v52 }
0x1400   : > { %6106 = vmatpush1.bf16.msra.mxu1 %v8510_v3  ;;  %v8436_v3 = vcombine.low %v5277_v61, %v5281_v14 }
0x1401   : > { %6147 = vmatpush1.bf16.msra.mxu0 %v8512_v13  ;;  %6107 = vmatprep.subr.bf16.mxu1 %v8519_v18  ;;  %v8437_v13 = vcombine.high %v5277_v61, %v5281_v14  ;;  %v5320_v61 = vld [vmem:[#allocation5 + $0x570] sm:$0xff] }
0x1404   : > { %6108 = vmatpush1.bf16.msra.mxu1 %v8518_v55 }
0x146b   : > { %v5231_v4 = vpop.xlane.xlu0 %5230 }
0x146c   : > { %v5232_v5 = vmul.f32 0.00390625, %v5231_v4 }
0x146e   : > { %v10779_v6 = vsub.f32 %v10771_v22, %v5232_v5  ;;  %v10782_v7 = vsub.f32 %v10774_v0, %v5232_v5  ;;  %v8521_v22 = vcombine.high %v5363_v54, %v5367_v19  ;;  %v5370_v0 = vld [vmem:[#allocation5 + $0x700] sm:$0xff] }
0x146f   : > { %v8527_v8 = vcombine.high %v5370_v0, %v5374_v47  ;;  %v8526_v23 = vcombine.low %v5370_v0, %v5374_v47 }
0x1470   : > { %v5235_v9 = vmul.f32 %v10779_v6, %v10779_v6  ;;  %v5236_v46 = vmul.f32 %v10782_v7, %v10782_v7  ;;  %6148 = vmatprep.subr.bf16.mxu0 %v8521_v22 }
0x1471   : > { %6149 = vmatpush1.bf16.msra.mxu0 %v8520_v2  ;;  %6109 = vmatprep.subr.bf16.mxu1 %v8527_v8  ;;  %v5284_v8 = vld [vmem:[#allocation5 + $0x450] sm:$0xff] }
0x1472   : > { %v5237_v10 = vadd.f32 %v5236_v46, %v5235_v9  ;;  %6150 = vmatprep.subr.bf16.mxu0 %v8529_v63  ;;  %6110 = vmatpush1.bf16.msra.mxu1 %v8526_v23  ;;  %v8427_v46 = vld [vmem:[%s10993_s8 + $0x2] sm:$0x3]  ;;  %v5285_v23 = vld [vmem:[#allocation5 + $0x458] sm:$0xff]  ;;  %v8443_v25 = vcombine.high %v5284_v8, %v5288_v35 }
0x1473   : > { %6111 = vmatprep.subr.bf16.mxu1 %v8535_v33  ;;  %v5253_v11 = vrot.slane %v8427_v46, %v10302_v16  ;;  %v5249_v12 = vrot.slane %v8427_v46, %v10305_v17  ;;  %v5293_v33 = vld [vmem:[#allocation5 + $0x498] sm:$0xff] }
0x1474   : > { %5238 = vadd.xlane.f32.xlu1 %v5237_v10  ;;  %v8428_v10 = vld [vmem:[%s10994_s9 + $0x2] sm:$0x3]  ;;  %v8453_v29 = vcombine.high %v5293_v33, %v5297_v30  ;;  %v8452_v42 = vcombine.low %v5293_v33, %v5297_v30  ;;  %v5325_v46 = vld [vmem:[#allocation5 + $0x598] sm:$0xff] }
0x1475   : > { %6151 = vmatpush1.bf16.msra.mxu0 %v8528_v24  ;;  %v5266_v55 = vrot.slane %v8428_v10, %v10302_v16  ;;  %v5262_v2 = vrot.slane %v8428_v10, %v10305_v17  ;;  %v5289_v24 = vld [vmem:[#allocation5 + $0x478] sm:$0xff] }
0x1476   : > { %6152 = vmatprep.subr.bf16.mxu0 %v8537_v28  ;;  %6112 = vmatpush1.bf16.msra.mxu1 %v8534_v36  ;;  %v8445_v26 = vcombine.high %v5285_v23, %v5289_v24  ;;  %v8442_v36 = vcombine.low %v5284_v8, %v5288_v35  ;;  %v5329_v10 = vld [vmem:[#allocation5 + $0x5b8] sm:$0xff] }
0x1477   : > { %6113 = vmatprep.subr.bf16.mxu1 %v8543_v40  ;;  %v5305_v40 = vld [vmem:[#allocation5 + $0x4f8] sm:$0xff]  ;;  %v8484_v8 = vcombine.low %v5325_v46, %v5329_v10 }
0x1479   : > { %6153 = vmatpush1.bf16.msra.mxu0 %v8536_v37  ;;  %v8444_v37 = vcombine.low %v5285_v23, %v5289_v24  ;;  %v5340_v24 = vld [vmem:[#allocation5 + $0x610] sm:$0xff] }
0x147a   : > { %6154 = vmatprep.subr.bf16.mxu0 %v8545_v45  ;;  %6114 = vmatpush1.bf16.msra.mxu1 %v8542_v27  ;;  %v5301_v27 = vld [vmem:[#allocation5 + $0x4d8] sm:$0xff]  ;;  %v5308_v45 = vld [vmem:[#allocation5 + $0x510] sm:$0xff] }
0x147b   : > { %6115 = vmatprep.subr.bf16.mxu1 %v8551_v49  ;;  %v5312_v49 = vld [vmem:[#allocation5 + $0x530] sm:$0xff] }
0x147c   : > { %v8466_v14 = vcombine.low %v5308_v45, %v5312_v49 }
0x147d   : > { %6155 = vmatpush1.bf16.msra.mxu0 %v8544_v44  ;;  %v8461_v44 = vcombine.high %v5301_v27, %v5305_v40 }
0x147e   : > { %6156 = vmatprep.subr.bf16.mxu0 %v8553_v56  ;;  %6116 = vmatpush1.bf16.msra.mxu1 %v8550_v57  ;;  %v8458_v56 = vcombine.low %v5300_v38, %v5304_v39  ;;  %v8460_v57 = vcombine.low %v5301_v27, %v5305_v40 }
0x147f   : > { %6167 = vmatprep.subr.bf16.mxu1 %v8435_v59  ;;  %v5321_v59 = vld [vmem:[#allocation5 + $0x578] sm:$0xff] }
0x1481   : > { %6157 = vmatpush1.bf16.msra.mxu0 %v8552_v58  ;;  %v8467_v58 = vcombine.high %v5308_v45, %v5312_v49 }
0x1482   : > { %6208 = vmatprep.subr.bf16.mxu0 %v8437_v13  ;;  %v8475_v13 = vcombine.high %v5316_v51, %v5320_v61 }
0x1501   : > { %v5239_v4 = vpop.xlane.xlu1 %5238 }
0x1502   : > { %v5240_v5 = vmul.f32 0.00390625, %v5239_v4 }
0x1504   : > { %v5241_v9 = vadd.f32 1e-12, %v5240_v5  ;;  %v5324_v5 = vld [vmem:[#allocation5 + $0x590] sm:$0xff] }
0x1506   : > { %9785 = vrsqrt.f32 %v5241_v9  ;;  %v5328_v9 = vld [vmem:[#allocation5 + $0x5b0] sm:$0xff] }
0x1510   : > { %v9786_v54 = vpop.eup %9785 }
0x1511   : > { %v5243_v18 = vmul.f32 %v9786_v54, %v10779_v6  ;;  %v5244_v19 = vmul.f32 %v9786_v54, %v10782_v7  ;;  %v5292_v7 = vld [vmem:[#allocation5 + $0x490] sm:$0xff]  ;;  %v8483_v54 = vcombine.high %v5324_v5, %v5328_v9 }
0x1512   : > { %v8451_v28 = vcombine.high %v5292_v7, %v5296_v31  ;;  %v8450_v41 = vcombine.low %v5292_v7, %v5296_v31  ;;  %v5341_v7 = vld [vmem:[#allocation5 + $0x618] sm:$0xff] }
0x1513   : > { %v5257_v22 = vmul.f32 %v5253_v11, %v5244_v19  ;;  %v5256_v0 = vmul.f32 %v5249_v12, %v5243_v18  ;;  %v8474_v11 = vcombine.low %v5316_v51, %v5320_v61  ;;  %v8485_v18 = vcombine.high %v5325_v46, %v5329_v10  ;;  %v5332_v19 = vld [vmem:[#allocation5 + $0x5d0] sm:$0xff] }
0x1515   : > { %v10800_v47 = vadd.f32 %v5266_v55, %v5257_v22  ;;  %v10802_v20 = vadd.f32 %v5262_v2, %v5256_v0  ;;  %v5336_v55 = vld [vmem:[#allocation5 + $0x5f0] sm:$0xff]  ;;  %v5333_v2 = vld [vmem:[#allocation5 + $0x5d8] sm:$0xff]  ;;  %v8482_v0 = vcombine.low %v5324_v5, %v5328_v9 }
0x1516   : > { %v5337_v22 = vld [vmem:[#allocation5 + $0x5f8] sm:$0xff]  ;;  %v8491_v35 = vcombine.high %v5332_v19, %v5336_v55 }
0x1517   : > { %v5272_v63 = vpack.c.bf16 %v10800_v47, %v10800_v47  ;;  %v10808_v6 = vpack.c.bf16 %v10802_v20, %v10802_v20  ;;  %v8493_v23 = vcombine.high %v5333_v2, %v5337_v22  ;;  %v8492_v31 = vcombine.low %v5333_v2, %v5337_v22 }
0x1519   : > { %6117 = vmatprep.mubr.bf16.mxu1 %v5272_v63  ;;  %6158 = vmatprep.mubr.bf16.mxu0 %v5272_v63 }
0x151a   : > { %6118 = vmatmul.mubr.bf16.vlgmr.msra.gmra.mrb[60].mxu1 %v10808_v6  ;;  %6159 = vmatmul.mubr.bf16.vlgmr.msra.gmra.mrb[36].mxu0 %v10808_v6 }
0x151b   : > { %6168 = vmatpush1.bf16.msra.mxu1 %v8434_v53  ;;  %6209 = vmatpush1.bf16.msra.mxu0 %v8436_v3  ;;  %v5317_v53 = vld [vmem:[#allocation5 + $0x558] sm:$0xff]  ;;  %v8468_v3 = vcombine.low %v5309_v62, %v5313_v52 }
0x151c   : > { %6199 = vmatprep.mubr.bf16.mxu1 %v5272_v63  ;;  %6240 = vmatprep.mubr.bf16.mxu0 %v5272_v63  ;;  %v8477_v4 = vcombine.high %v5317_v53, %v5321_v59  ;;  %v8476_v12 = vcombine.low %v5317_v53, %v5321_v59  ;;  %v5344_v63 = vld [vmem:[#allocation5 + $0x630] sm:$0xff] }
0x151d   : > { %6169 = vmatprep.subr.bf16.mxu1 %v8443_v25  ;;  %6210 = vmatprep.subr.bf16.mxu0 %v8445_v26  ;;  %v5345_v25 = vld [vmem:[#allocation5 + $0x638] sm:$0xff]  ;;  %v8490_v26 = vcombine.low %v5332_v19, %v5336_v55  ;;  %v8499_v33 = vcombine.high %v5340_v24, %v5344_v63  ;;  %v8498_v38 = vcombine.low %v5340_v24, %v5344_v63 }
0x151e   : > { %v8501_v30 = vcombine.high %v5341_v7, %v5345_v25  ;;  %v8500_v39 = vcombine.low %v5341_v7, %v5345_v25 }
0x151f   : > { %6170 = vmatpush1.bf16.msra.mxu1 %v8442_v36  ;;  %6211 = vmatpush1.bf16.msra.mxu0 %v8444_v37  ;;  %v5348_v36 = vld [vmem:[#allocation5 + $0x650] sm:$0xff] }
0x1520   : > { %6171 = vmatprep.subr.bf16.mxu1 %v8451_v28  ;;  %6212 = vmatprep.subr.bf16.mxu0 %v8453_v29  ;;  %v5352_v37 = vld [vmem:[#allocation5 + $0x670] sm:$0xff]  ;;  %v5349_v28 = vld [vmem:[#allocation5 + $0x658] sm:$0xff] }
0x1521   : > { %v5353_v29 = vld [vmem:[#allocation5 + $0x678] sm:$0xff]  ;;  %v8507_v27 = vcombine.high %v5348_v36, %v5352_v37  ;;  %v8506_v45 = vcombine.low %v5348_v36, %v5352_v37 }
0x1522   : > { %v8509_v40 = vcombine.high %v5349_v28, %v5353_v29  ;;  %v8508_v49 = vcombine.low %v5349_v28, %v5353_v29 }
0x1523   : > { %6172 = vmatpush1.bf16.msra.mxu1 %v8450_v41  ;;  %6213 = vmatpush1.bf16.msra.mxu0 %v8452_v42  ;;  %v5356_v41 = vld [vmem:[#allocation5 + $0x690] sm:$0xff] }
0x1524   : > { %6173 = vmatprep.subr.bf16.mxu1 %v8459_v43  ;;  %6214 = vmatprep.subr.bf16.mxu0 %v8461_v44  ;;  %v5360_v42 = vld [vmem:[#allocation5 + $0x6b0] sm:$0xff]  ;;  %v5357_v43 = vld [vmem:[#allocation5 + $0x698] sm:$0xff] }
0x1525   : > { %v5361_v44 = vld [vmem:[#allocation5 + $0x6b8] sm:$0xff]  ;;  %v8515_v62 = vcombine.high %v5356_v41, %v5360_v42  ;;  %v8514_v51 = vcombine.low %v5356_v41, %v5360_v42  ;;  %v9491_v41 = vld [vmem:[#allocation7 + $0x400] ss:$8 sps:$4 sm:$0xff]  }
0x1526   : > { %v8517_v52 = vcombine.high %v5357_v43, %v5361_v44  ;;  %v8516_v61 = vcombine.low %v5357_v43, %v5361_v44  ;;  %v9494_v42 = vld [vmem:[#allocation7 + $0x500] ss:$8 sps:$4 sm:$0xff]   ;;  %v9499_v43 = vld [vmem:[#allocation7 + $0x414] ss:$8 sps:$4 sm:$0xff]  }
0x1527   : > { %6174 = vmatpush1.bf16.msra.mxu1 %v8458_v56  ;;  %6215 = vmatpush1.bf16.msra.mxu0 %v8460_v57  ;;  %v5364_v56 = vld [vmem:[#allocation5 + $0x6d0] sm:$0xff] }
0x1528   : > { %6175 = vmatprep.subr.bf16.mxu1 %v8467_v58  ;;  %6216 = vmatprep.subr.bf16.mxu0 %v8469_v60  ;;  %v5368_v57 = vld [vmem:[#allocation5 + $0x6f0] sm:$0xff]  ;;  %v5365_v58 = vld [vmem:[#allocation5 + $0x6d8] sm:$0xff] }
0x1529   : > { %v5369_v60 = vld [vmem:[#allocation5 + $0x6f8] sm:$0xff]  ;;  %v8523_v53 = vcombine.high %v5364_v56, %v5368_v57  ;;  %v8522_v5 = vcombine.low %v5364_v56, %v5368_v57  ;;  %v9503_v56 = vld [vmem:[#allocation7 + $0x420] ss:$8 sps:$4 sm:$0xff]  }
0x152a   : > { %v8525_v59 = vcombine.high %v5365_v58, %v5369_v60  ;;  %v8524_v9 = vcombine.low %v5365_v58, %v5369_v60  ;;  %v9502_v44 = vld [vmem:[#allocation7 + $0x514] ss:$8 sps:$4 sm:$0xff]   ;;  %v9506_v57 = vld [vmem:[#allocation7 + $0x520] ss:$8 sps:$4 sm:$0xff]  }
0x152b   : > { %6176 = vmatpush1.bf16.msra.mxu1 %v8466_v14  ;;  %6217 = vmatpush1.bf16.msra.mxu0 %v8468_v3  ;;  %v5372_v14 = vld [vmem:[#allocation5 + $0x710] sm:$0xff] }
0x152c   : > { %6177 = vmatprep.subr.bf16.mxu1 %v8475_v13  ;;  %6218 = vmatprep.subr.bf16.mxu0 %v8477_v4  ;;  %v5376_v3 = vld [vmem:[#allocation5 + $0x730] sm:$0xff]  ;;  %v5373_v13 = vld [vmem:[#allocation5 + $0x718] sm:$0xff] }
0x152d   : > { %v5377_v4 = vld [vmem:[#allocation5 + $0x738] sm:$0xff]  ;;  %v8531_v46 = vcombine.high %v5372_v14, %v5376_v3  ;;  %v8530_v19 = vcombine.low %v5372_v14, %v5376_v3  ;;  %v9518_v14 = vld [vmem:[#allocation7 + $0x540] ss:$8 sps:$4 sm:$0xff]  }
0x152e   : > { %v8533_v10 = vcombine.high %v5373_v13, %v5377_v4  ;;  %v8532_v55 = vcombine.low %v5373_v13, %v5377_v4  ;;  %v9511_v58 = vld [vmem:[#allocation7 + $0x434] ss:$8 sps:$4 sm:$0xff]   ;;  %v9521_v4 = vld [vmem:[#allocation7 + $0x450] ss:$8 sps:$4 sm:$0xff]  }
0x152f   : > { %6178 = vmatpush1.bf16.msra.mxu1 %v8474_v11  ;;  %6219 = vmatpush1.bf16.msra.mxu0 %v8476_v12  ;;  %v5380_v11 = vld [vmem:[#allocation5 + $0x750] sm:$0xff] }
0x1530   : > { %6179 = vmatprep.subr.bf16.mxu1 %v8483_v54  ;;  %6220 = vmatprep.subr.bf16.mxu0 %v8485_v18  ;;  %v5384_v12 = vld [vmem:[#allocation5 + $0x770] sm:$0xff]  ;;  %v5381_v54 = vld [vmem:[#allocation5 + $0x758] sm:$0xff] }
0x1531   : > { %v5385_v18 = vld [vmem:[#allocation5 + $0x778] sm:$0xff]  ;;  %v8539_v2 = vcombine.high %v5380_v11, %v5384_v12  ;;  %v8538_v24 = vcombine.low %v5380_v11, %v5384_v12  ;;  %v9530_v11 = vld [vmem:[#allocation7 + $0x560] ss:$8 sps:$4 sm:$0xff]  }
0x1532   : > { %v8541_v22 = vcombine.high %v5381_v54, %v5385_v18  ;;  %v8540_v63 = vcombine.low %v5381_v54, %v5385_v18  ;;  %v9514_v60 = vld [vmem:[#allocation7 + $0x534] ss:$8 sps:$4 sm:$0xff]   ;;  %v9533_v18 = vld [vmem:[#allocation7 + $0x470] ss:$8 sps:$4 sm:$0xff]  }
0x1533   : > { %6180 = vmatpush1.bf16.msra.mxu1 %v8482_v0  ;;  %6221 = vmatpush1.bf16.msra.mxu0 %v8484_v8  ;;  %v5388_v0 = vld [vmem:[#allocation5 + $0x790] sm:$0xff] }
0x1534   : > { %6181 = vmatprep.subr.bf16.mxu1 %v8491_v35  ;;  %6222 = vmatprep.subr.bf16.mxu0 %v8493_v23  ;;  %v5392_v8 = vld [vmem:[#allocation5 + $0x7b0] sm:$0xff]  ;;  %v5389_v35 = vld [vmem:[#allocation5 + $0x798] sm:$0xff] }
0x1535   : > { %v5393_v23 = vld [vmem:[#allocation5 + $0x7b8] sm:$0xff]  ;;  %v8547_v7 = vcombine.high %v5388_v0, %v5392_v8  ;;  %v8546_v36 = vcombine.low %v5388_v0, %v5392_v8  ;;  %v9542_v0 = vld [vmem:[#allocation7 + $0x580] ss:$8 sps:$4 sm:$0xff]  }
0x1536   : > { %v8549_v25 = vcombine.high %v5389_v35, %v5393_v23  ;;  %v8548_v37 = vcombine.low %v5389_v35, %v5393_v23  ;;  %v9523_v3 = vld [vmem:[#allocation7 + $0x454] ss:$8 sps:$4 sm:$0xff]   ;;  %v9545_v23 = vld [vmem:[#allocation7 + $0x490] ss:$8 sps:$4 sm:$0xff]  }
0x1537   : > { %6182 = vmatpush1.bf16.msra.mxu1 %v8490_v26  ;;  %6223 = vmatpush1.bf16.msra.mxu0 %v8492_v31  ;;  %v5396_v26 = vld [vmem:[#allocation5 + $0x7d0] sm:$0xff] }
0x1538   : > { %6183 = vmatprep.subr.bf16.mxu1 %v8499_v33  ;;  %6224 = vmatprep.subr.bf16.mxu0 %v8501_v30  ;;  %v5400_v31 = vld [vmem:[#allocation5 + $0x7f0] sm:$0xff]  ;;  %v5397_v33 = vld [vmem:[#allocation5 + $0x7d8] sm:$0xff] }
0x1539   : > { %v5401_v30 = vld [vmem:[#allocation5 + $0x7f8] sm:$0xff]  ;;  %v8555_v28 = vcombine.high %v5396_v26, %v5400_v31 }
0x153a   : > { %v8557_v29 = vcombine.high %v5397_v33, %v5401_v30  ;;  %v9526_v13 = vld [vmem:[#allocation7 + $0x554] ss:$8 sps:$4 sm:$0xff]  }
0x153b   : > { %6184 = vmatpush1.bf16.msra.mxu1 %v8498_v38  ;;  %6225 = vmatpush1.bf16.msra.mxu0 %v8500_v39  ;;  %v8554_v38 = vcombine.low %v5396_v26, %v5400_v31  ;;  %v8556_v39 = vcombine.low %v5397_v33, %v5401_v30  ;;  %v9535_v12 = vld [vmem:[#allocation7 + $0x474] ss:$8 sps:$4 sm:$0xff]   ;;  %v9554_v26 = vld [vmem:[#allocation7 + $0x5a0] ss:$8 sps:$4 sm:$0xff]   ;;  %v9557_v30 = vld [vmem:[#allocation7 + $0x4b0] ss:$8 sps:$4 sm:$0xff]  }
0x153c   : > { %6185 = vmatprep.subr.bf16.mxu1 %v8507_v27  ;;  %6226 = vmatprep.subr.bf16.mxu0 %v8509_v40  ;;  %v9493_v27 = vld [vmem:[#allocation7 + $0x404] ss:$8 sps:$4 sm:$0xff]   ;;  %v9538_v54 = vld [vmem:[#allocation7 + $0x574] ss:$8 sps:$4 sm:$0xff]  }
0x153d   : > { %v9496_v40 = vld [vmem:[#allocation7 + $0x504] ss:$8 sps:$4 sm:$0xff]   ;;  %v9547_v8 = vld [vmem:[#allocation7 + $0x494] ss:$8 sps:$4 sm:$0xff]  }
0x153e   : > { %v9550_v35 = vld [vmem:[#allocation7 + $0x594] ss:$8 sps:$4 sm:$0xff]  }
0x153f   : > { %6186 = vmatpush1.bf16.msra.mxu1 %v8506_v45  ;;  %6227 = vmatpush1.bf16.msra.mxu0 %v8508_v49  ;;  %v9497_v45 = vld [vmem:[#allocation7 + $0x410] ss:$8 sps:$4 sm:$0xff]   ;;  %v9559_v31 = vld [vmem:[#allocation7 + $0x4b4] ss:$8 sps:$4 sm:$0xff]  }
0x1540   : > { %6187 = vmatprep.subr.bf16.mxu1 %v8515_v62  ;;  %6228 = vmatprep.subr.bf16.mxu0 %v8517_v52  ;;  %v9500_v49 = vld [vmem:[#allocation7 + $0x510] ss:$8 sps:$4 sm:$0xff]   ;;  %v9505_v62 = vld [vmem:[#allocation7 + $0x424] ss:$8 sps:$4 sm:$0xff]   ;;  %v9562_v33 = vld [vmem:[#allocation7 + $0x5b4] ss:$8 sps:$4 sm:$0xff]  }
0x1541   : > { %v9508_v52 = vld [vmem:[#allocation7 + $0x524] ss:$8 sps:$4 sm:$0xff]  }
0x1543   : > { %6188 = vmatpush1.bf16.msra.mxu1 %v8514_v51  ;;  %6229 = vmatpush1.bf16.msra.mxu0 %v8516_v61  ;;  %v9509_v51 = vld [vmem:[#allocation7 + $0x430] ss:$8 sps:$4 sm:$0xff]   ;;  %v9517_v61 = vld [vmem:[#allocation7 + $0x444] ss:$8 sps:$4 sm:$0xff]  }
0x1544   : > { %6189 = vmatprep.subr.bf16.mxu1 %v8523_v53  ;;  %6230 = vmatprep.subr.bf16.mxu0 %v8525_v59  ;;  %v9520_v53 = vld [vmem:[#allocation7 + $0x544] ss:$8 sps:$4 sm:$0xff]   ;;  %v9515_v59 = vld [vmem:[#allocation7 + $0x440] ss:$8 sps:$4 sm:$0xff]  }
0x1547   : > { %6190 = vmatpush1.bf16.msra.mxu1 %v8522_v5  ;;  %6231 = vmatpush1.bf16.msra.mxu0 %v8524_v9  ;;  %v9524_v5 = vld [vmem:[#allocation7 + $0x550] ss:$8 sps:$4 sm:$0xff]   ;;  %v9529_v9 = vld [vmem:[#allocation7 + $0x464] ss:$8 sps:$4 sm:$0xff]  }
0x1548   : > { %6191 = vmatprep.subr.bf16.mxu1 %v8531_v46  ;;  %6232 = vmatprep.subr.bf16.mxu0 %v8533_v10  ;;  %v9532_v46 = vld [vmem:[#allocation7 + $0x564] ss:$8 sps:$4 sm:$0xff]   ;;  %v9527_v10 = vld [vmem:[#allocation7 + $0x460] ss:$8 sps:$4 sm:$0xff]  }
0x154b   : > { %6192 = vmatpush1.bf16.msra.mxu1 %v8530_v19  ;;  %6233 = vmatpush1.bf16.msra.mxu0 %v8532_v55  ;;  %v9536_v19 = vld [vmem:[#allocation7 + $0x570] ss:$8 sps:$4 sm:$0xff]   ;;  %v9541_v55 = vld [vmem:[#allocation7 + $0x484] ss:$8 sps:$4 sm:$0xff]  }
0x154c   : > { %6193 = vmatprep.subr.bf16.mxu1 %v8539_v2  ;;  %6234 = vmatprep.subr.bf16.mxu0 %v8541_v22  ;;  %v9544_v2 = vld [vmem:[#allocation7 + $0x584] ss:$8 sps:$4 sm:$0xff]   ;;  %v9539_v22 = vld [vmem:[#allocation7 + $0x480] ss:$8 sps:$4 sm:$0xff]  }
0x154f   : > { %6194 = vmatpush1.bf16.msra.mxu1 %v8538_v24  ;;  %6235 = vmatpush1.bf16.msra.mxu0 %v8540_v63  ;;  %v9548_v24 = vld [vmem:[#allocation7 + $0x590] ss:$8 sps:$4 sm:$0xff]   ;;  %v9553_v63 = vld [vmem:[#allocation7 + $0x4a4] ss:$8 sps:$4 sm:$0xff]  }
0x1550   : > { %6195 = vmatprep.subr.bf16.mxu1 %v8547_v7  ;;  %6236 = vmatprep.subr.bf16.mxu0 %v8549_v25  ;;  %v9556_v7 = vld [vmem:[#allocation7 + $0x5a4] ss:$8 sps:$4 sm:$0xff]   ;;  %v9551_v25 = vld [vmem:[#allocation7 + $0x4a0] ss:$8 sps:$4 sm:$0xff]  }
0x1553   : > { %6196 = vmatpush1.bf16.msra.mxu1 %v8546_v36  ;;  %6237 = vmatpush1.bf16.msra.mxu0 %v8548_v37  ;;  %v9560_v36 = vld [vmem:[#allocation7 + $0x5b0] ss:$8 sps:$4 sm:$0xff]   ;;  %v9565_v37 = vld [vmem:[#allocation7 + $0x4c4] ss:$8 sps:$4 sm:$0xff]  }
0x1554   : > { %6197 = vmatprep.subr.bf16.mxu1 %v8555_v28  ;;  %6238 = vmatprep.subr.bf16.mxu0 %v8557_v29  ;;  %v9568_v28 = vld [vmem:[#allocation7 + $0x5c4] ss:$8 sps:$4 sm:$0xff]   ;;  %v9563_v29 = vld [vmem:[#allocation7 + $0x4c0] ss:$8 sps:$4 sm:$0xff]  }
0x1557   : > { %6198 = vmatpush1.bf16.msra.mxu1 %v8554_v38  ;;  %6239 = vmatpush1.bf16.msra.mxu0 %v8556_v39  ;;  %v9566_v38 = vld [vmem:[#allocation7 + $0x5c0] ss:$8 sps:$4 sm:$0xff]   ;;  %v9571_v39 = vld [vmem:[#allocation7 + $0x4d4] ss:$8 sps:$4 sm:$0xff]  }
0x1558   : > { %7111 = vmatprep.subr.bf16.mxu1 %v9493_v27  ;;  %7152 = vmatprep.subr.bf16.mxu0 %v9496_v40  ;;  %v9574_v27 = vld [vmem:[#allocation7 + $0x5d4] ss:$8 sps:$4 sm:$0xff]   ;;  %v9569_v40 = vld [vmem:[#allocation7 + $0x4d0] ss:$8 sps:$4 sm:$0xff]  }
0x155a   : > { %6200 = vmatmul.mubr.bf16.vlgmr.msra.gmra.mrb[64].mxu1 %v10808_v6  ;;  %6241 = vmatmul.mubr.bf16.vlgmr.msra.gmra.mrb[40].mxu0 %v10808_v6  ;;  %v9512_v6 = vld [vmem:[#allocation7 + $0x530] ss:$8 sps:$4 sm:$0xff]  }
0x155b   : > { %7112 = vmatpush1.bf16.msra.mxu1 %v9491_v41  ;;  %7153 = vmatpush1.bf16.msra.mxu0 %v9494_v42  ;;  %v9572_v41 = vld [vmem:[#allocation7 + $0x5d0] ss:$8 sps:$4 sm:$0xff]   ;;  %v9577_v42 = vld [vmem:[#allocation7 + $0x4e4] ss:$8 sps:$4 sm:$0xff]  }
0x155c   : > { %7113 = vmatprep.subr.bf16.mxu1 %v9499_v43  ;;  %7154 = vmatprep.subr.bf16.mxu0 %v9502_v44  ;;  %v9580_v43 = vld [vmem:[#allocation7 + $0x5e4] ss:$8 sps:$4 sm:$0xff]   ;;  %v9575_v44 = vld [vmem:[#allocation7 + $0x4e0] ss:$8 sps:$4 sm:$0xff]  }
0x155f   : > { %7114 = vmatpush1.bf16.msra.mxu1 %v9497_v45  ;;  %7155 = vmatpush1.bf16.msra.mxu0 %v9500_v49  ;;  %v9578_v45 = vld [vmem:[#allocation7 + $0x5e0] ss:$8 sps:$4 sm:$0xff]   ;;  %v9583_v49 = vld [vmem:[#allocation7 + $0x4f4] ss:$8 sps:$4 sm:$0xff]  }
0x1560   : > { %7115 = vmatprep.subr.bf16.mxu1 %v9505_v62  ;;  %7156 = vmatprep.subr.bf16.mxu0 %v9508_v52  ;;  %v9586_v62 = vld [vmem:[#allocation7 + $0x5f4] ss:$8 sps:$4 sm:$0xff]   ;;  %v9581_v52 = vld [vmem:[#allocation7 + $0x4f0] ss:$8 sps:$4 sm:$0xff]  }
0x1563   : > { %7116 = vmatpush1.bf16.msra.mxu1 %v9503_v56  ;;  %7157 = vmatpush1.bf16.msra.mxu0 %v9506_v57  ;;  %v9584_v56 = vld [vmem:[#allocation7 + $0x5f0] ss:$8 sps:$4 sm:$0xff]   ;;  %v9589_v57 = vld [vmem:[#allocation7 + $0x604] ss:$8 sps:$4 sm:$0xff]  }
0x1564   : > { %7117 = vmatprep.subr.bf16.mxu1 %v9511_v58  ;;  %7158 = vmatprep.subr.bf16.mxu0 %v9514_v60  ;;  %v9592_v58 = vld [vmem:[#allocation7 + $0x704] ss:$8 sps:$4 sm:$0xff]  }
0x1565   : > { %v10817_v60 = vld [vmem:[%s10996_s11 + $0x8] sm:$0xff] }
0x1567   : > { %7118 = vmatpush1.bf16.msra.mxu1 %v9509_v51  ;;  %7159 = vmatpush1.bf16.msra.mxu0 %v9512_v6  ;;  %v5408_v51 = vrot.slane %v10817_v60, %v10305_v17  ;;  %v5416_v6 = vrot.slane %v10817_v60, %v10336_v1 }
0x1568   : > { %7119 = vmatprep.subr.bf16.mxu1 %v9517_v61  ;;  %7160 = vmatprep.subr.bf16.mxu0 %v9520_v53  ;;  %v5412_v61 = vrot.slane %v10817_v60, %v10302_v16  ;;  %v5420_v53 = vrot.slane %v10817_v60, %v10368_v48 }
0x156b   : > { %7120 = vmatpush1.bf16.msra.mxu1 %v9515_v59  ;;  %7161 = vmatpush1.bf16.msra.mxu0 %v9518_v14 }
0x156c   : > { %7121 = vmatprep.subr.bf16.mxu1 %v9523_v3  ;;  %7162 = vmatprep.subr.bf16.mxu0 %v9526_v13 }
0x156f   : > { %7122 = vmatpush1.bf16.msra.mxu1 %v9521_v4  ;;  %7163 = vmatpush1.bf16.msra.mxu0 %v9524_v5 }
0x1570   : > { %7123 = vmatprep.subr.bf16.mxu1 %v9529_v9  ;;  %7164 = vmatprep.subr.bf16.mxu0 %v9532_v46 }
0x1573   : > { %7124 = vmatpush1.bf16.msra.mxu1 %v9527_v10  ;;  %7165 = vmatpush1.bf16.msra.mxu0 %v9530_v11 }
0x1574   : > { %7125 = vmatprep.subr.bf16.mxu1 %v9535_v12  ;;  %7166 = vmatprep.subr.bf16.mxu0 %v9538_v54 }
0x1577   : > { %7126 = vmatpush1.bf16.msra.mxu1 %v9533_v18  ;;  %7167 = vmatpush1.bf16.msra.mxu0 %v9536_v19 }
0x1578   : > { %7127 = vmatprep.subr.bf16.mxu1 %v9541_v55  ;;  %7168 = vmatprep.subr.bf16.mxu0 %v9544_v2 }
0x157b   : > { %7128 = vmatpush1.bf16.msra.mxu1 %v9539_v22  ;;  %7169 = vmatpush1.bf16.msra.mxu0 %v9542_v0 }
0x157c   : > { %7129 = vmatprep.subr.bf16.mxu1 %v9547_v8  ;;  %7170 = vmatprep.subr.bf16.mxu0 %v9550_v35 }
0x157f   : > { %7130 = vmatpush1.bf16.msra.mxu1 %v9545_v23  ;;  %7171 = vmatpush1.bf16.msra.mxu0 %v9548_v24 }
0x1580   : > { %7131 = vmatprep.subr.bf16.mxu1 %v9553_v63  ;;  %7172 = vmatprep.subr.bf16.mxu0 %v9556_v7 }
0x1583   : > { %7132 = vmatpush1.bf16.msra.mxu1 %v9551_v25  ;;  %7173 = vmatpush1.bf16.msra.mxu0 %v9554_v26 }
0x1584   : > { %7133 = vmatprep.subr.bf16.mxu1 %v9559_v31  ;;  %7174 = vmatprep.subr.bf16.mxu0 %v9562_v33 }
0x1587   : > { %7134 = vmatpush1.bf16.msra.mxu1 %v9557_v30  ;;  %7175 = vmatpush1.bf16.msra.mxu0 %v9560_v36 }
0x1588   : > { %7135 = vmatprep.subr.bf16.mxu1 %v9565_v37  ;;  %7176 = vmatprep.subr.bf16.mxu0 %v9568_v28 }
0x158b   : > { %7136 = vmatpush1.bf16.msra.mxu1 %v9563_v29  ;;  %7177 = vmatpush1.bf16.msra.mxu0 %v9566_v38 }
0x158c   : > { %7137 = vmatprep.subr.bf16.mxu1 %v9571_v39  ;;  %7178 = vmatprep.subr.bf16.mxu0 %v9574_v27 }
0x158f   : > { %7138 = vmatpush1.bf16.msra.mxu1 %v9569_v40  ;;  %7179 = vmatpush1.bf16.msra.mxu0 %v9572_v41 }
0x1590   : > { %7139 = vmatprep.subr.bf16.mxu1 %v9577_v42  ;;  %7180 = vmatprep.subr.bf16.mxu0 %v9580_v43 }
0x1593   : > { %7140 = vmatpush1.bf16.msra.mxu1 %v9575_v44  ;;  %7181 = vmatpush1.bf16.msra.mxu0 %v9578_v45 }
0x1594   : > { %7141 = vmatprep.subr.bf16.mxu1 %v9583_v49  ;;  %7182 = vmatprep.subr.bf16.mxu0 %v9586_v62 }
0x1597   : > { %7142 = vmatpush1.bf16.msra.mxu1 %v9581_v52  ;;  %7183 = vmatpush1.bf16.msra.mxu0 %v9584_v56 }
0x1598   : > { %7193 = vmatprep.subr.bf16.mxu1 %v9589_v57  ;;  %7234 = vmatprep.subr.bf16.mxu0 %v9592_v58  ;;  %v9587_v57 = vld [vmem:[#allocation7 + $0x600] ss:$8 sps:$4 sm:$0xff]  }
0x15ed   : > { %v6119_v59 = vpop.f32.mrb[60].mxu1  ;;  %v6160_v14 = vpop.f32.mrb[36].mxu0 }
0x15ee   : > { %v6120_v3 = vadd.f32 %v6119_v59, %v5408_v51  ;;  %v6161_v13 = vadd.f32 %v6160_v14, %v5416_v6  ;;  %v6121_v4 = vpop.f32.mrb[61].mxu1  ;;  %v6162_v5 = vpop.f32.mrb[37].mxu0  ;;  %v9590_v6 = vld [vmem:[#allocation7 + $0x700] ss:$8 sps:$4 sm:$0xff]   ;;  %v9598_v14 = vld [vmem:[#allocation7 + $0x714] ss:$8 sps:$4 sm:$0xff]  }
0x15ef   : > { %v6122_v9 = vadd.f32 %v6121_v4, %v5412_v61  ;;  %v6163_v46 = vadd.f32 %v6162_v5, %v5420_v53  ;;  %v6123_v10 = vpop.f32.mrb[62].mxu1  ;;  %v6164_v11 = vpop.f32.mrb[38].mxu0  ;;  %v9595_v53 = vld [vmem:[#allocation7 + $0x614] ss:$8 sps:$4 sm:$0xff]   ;;  %v9601_v4 = vld [vmem:[#allocation7 + $0x624] ss:$8 sps:$4 sm:$0xff]  }
0x15f0   : > { %v6257_v12 = vmul.f32 0.044715, %v6120_v3  ;;  %v6259_v54 = vmul.f32 0.044715, %v6161_v13  ;;  %v6124_v18 = vpop.f32.mrb[63].mxu1  ;;  %v6165_v1 = vpop.f32.mrb[39].mxu0 }
0x15f1   : > { %v6258_v19 = vmul.f32 0.044715, %v6122_v9  ;;  %v6260_v55 = vmul.f32 0.044715, %v6163_v46  ;;  %v6249_v29 = vmul.f32 0.5, %v6120_v3  ;;  %v6250_v27 = vmul.f32 0.5, %v6122_v9 }
0x15f2   : > { %v6265_v2 = vmul.f32 %v6257_v12, %v6120_v3  ;;  %v6267_v22 = vmul.f32 %v6259_v54, %v6161_v13  ;;  %v6252_v42 = vmul.f32 0.5, %v6163_v46  ;;  %v6251_v49 = vmul.f32 0.5, %v6161_v13  ;;  %v9604_v5 = vld [vmem:[#allocation7 + $0x724] ss:$8 sps:$4 sm:$0xff]   ;;  %v9607_v10 = vld [vmem:[#allocation7 + $0x634] ss:$8 sps:$4 sm:$0xff]  }
0x15f3   : > { %v6266_v0 = vmul.f32 %v6258_v19, %v6122_v9  ;;  %v6268_v48 = vmul.f32 %v6260_v55, %v6163_v46  ;;  %v9610_v11 = vld [vmem:[#allocation7 + $0x734] ss:$8 sps:$4 sm:$0xff]   ;;  %v9605_v12 = vld [vmem:[#allocation7 + $0x630] ss:$8 sps:$4 sm:$0xff]   ;;  %v9613_v18 = vld [vmem:[#allocation7 + $0x644] ss:$8 sps:$4 sm:$0xff]  }
0x15f4   : > { %v6273_v8 = vmul.f32 %v6265_v2, %v6120_v3  ;;  %v6275_v35 = vmul.f32 %v6267_v22, %v6161_v13  ;;  %v9608_v54 = vld [vmem:[#allocation7 + $0x730] ss:$8 sps:$4 sm:$0xff]   ;;  %v9616_v1 = vld [vmem:[#allocation7 + $0x744] ss:$8 sps:$4 sm:$0xff]   ;;  %v9611_v19 = vld [vmem:[#allocation7 + $0x640] ss:$8 sps:$4 sm:$0xff]  }
0x15f5   : > { %v6274_v23 = vmul.f32 %v6266_v0, %v6122_v9  ;;  %v6276_v24 = vmul.f32 %v6268_v48, %v6163_v46  ;;  %v9614_v55 = vld [vmem:[#allocation7 + $0x740] ss:$8 sps:$4 sm:$0xff]   ;;  %v9619_v2 = vld [vmem:[#allocation7 + $0x654] ss:$8 sps:$4 sm:$0xff]   ;;  %v9617_v0 = vld [vmem:[#allocation7 + $0x650] ss:$8 sps:$4 sm:$0xff]  }
0x15f6   : > { %v6281_v63 = vadd.f32 %v6273_v8, %v6120_v3  ;;  %v6283_v7 = vadd.f32 %v6275_v35, %v6161_v13  ;;  %v9593_v3 = vld [vmem:[#allocation7 + $0x610] ss:$8 sps:$4 sm:$0xff]   ;;  %v9622_v22 = vld [vmem:[#allocation7 + $0x754] ss:$8 sps:$4 sm:$0xff]   ;;  %v9625_v8 = vld [vmem:[#allocation7 + $0x664] ss:$8 sps:$4 sm:$0xff]  }
0x15f7   : > { %v6282_v25 = vadd.f32 %v6274_v23, %v6122_v9  ;;  %v6284_v26 = vadd.f32 %v6276_v24, %v6163_v46  ;;  %v9596_v13 = vld [vmem:[#allocation7 + $0x710] ss:$8 sps:$4 sm:$0xff]   ;;  %v9599_v9 = vld [vmem:[#allocation7 + $0x620] ss:$8 sps:$4 sm:$0xff]   ;;  %v9628_v35 = vld [vmem:[#allocation7 + $0x764] ss:$8 sps:$4 sm:$0xff]  }
0x15f8   : > { %v6289_v31 = vmul.f32 0.7978846, %v6281_v63  ;;  %v6291_v36 = vmul.f32 0.7978846, %v6283_v7  ;;  %v9602_v46 = vld [vmem:[#allocation7 + $0x720] ss:$8 sps:$4 sm:$0xff]  }
0x15f9   : > { %v6290_v33 = vmul.f32 0.7978846, %v6282_v25  ;;  %v6292_v30 = vmul.f32 0.7978846, %v6284_v26  ;;  %v9620_v48 = vld [vmem:[#allocation7 + $0x750] ss:$8 sps:$4 sm:$0xff]  }
0x15fa   : > { %9787 = vtanh.f32 %v6289_v31  ;;  %v9623_v23 = vld [vmem:[#allocation7 + $0x660] ss:$8 sps:$4 sm:$0xff]   ;;  %v9631_v63 = vld [vmem:[#allocation7 + $0x674] ss:$8 sps:$4 sm:$0xff]   ;;  %v9629_v25 = vld [vmem:[#allocation7 + $0x670] ss:$8 sps:$4 sm:$0xff]  }
0x15fb   : > { %9789 = vtanh.f32 %v6290_v33  ;;  %v9626_v24 = vld [vmem:[#allocation7 + $0x760] ss:$8 sps:$4 sm:$0xff]   ;;  %v9634_v7 = vld [vmem:[#allocation7 + $0x774] ss:$8 sps:$4 sm:$0xff]   ;;  %v9632_v26 = vld [vmem:[#allocation7 + $0x770] ss:$8 sps:$4 sm:$0xff]  }
0x15fc   : > { %9791 = vtanh.f32 %v6292_v30  ;;  %v9637_v31 = vld [vmem:[#allocation7 + $0x684] ss:$8 sps:$4 sm:$0xff]   ;;  %v5424_v30 = vrot.slane %v10817_v60, %v10351_v21 }
0x15fd   : > { %9793 = vtanh.f32 %v6291_v36  ;;  %v9640_v33 = vld [vmem:[#allocation7 + $0x784] ss:$8 sps:$4 sm:$0xff]   ;;  %v5432_v36 = vrot.slane %v10817_v60, %v2147_v32 }
0x1604   : > { %v9788_v37 = vpop.eup %9787 }
0x1605   : > { %v9790_v28 = vpop.eup %9789  ;;  %v6305_v38 = vadd.f32 1.0, %v9788_v37  ;;  %v9635_v37 = vld [vmem:[#allocation7 + $0x680] ss:$8 sps:$4 sm:$0xff]  }
0x1606   : > { %v9792_v39 = vpop.eup %9791  ;;  %v6306_v40 = vadd.f32 1.0, %v9790_v28  ;;  %v9638_v28 = vld [vmem:[#allocation7 + $0x780] ss:$8 sps:$4 sm:$0xff]  }
0x1607   : > { %v9794_v41 = vpop.eup %9793  ;;  %v6308_v43 = vadd.f32 1.0, %v9792_v39  ;;  %v6313_v44 = vmul.f32 %v6305_v38, %v6249_v29  ;;  %v5428_v29 = vrot.slane %v10817_v60, %v10373_v50  ;;  %v5436_v38 = vrot.slane %v10817_v60, %v2151_v34  ;;  %v9643_v39 = vld [vmem:[#allocation7 + $0x694] ss:$8 sps:$4 sm:$0xff]   ;;  %v9649_v60 = vld [vmem:[#allocation7 + $0x6a4] ss:$8 sps:$4 sm:$0xff]  }
0x1608   : > { %v6314_v45 = vmul.f32 %v6306_v40, %v6250_v27  ;;  %v6307_v62 = vadd.f32 1.0, %v9794_v41  ;;  %v9646_v27 = vld [vmem:[#allocation7 + $0x794] ss:$8 sps:$4 sm:$0xff]  }
0x1609   : > { %v6316_v52 = vmul.f32 %v6308_v43, %v6252_v42  ;;  %v6321_v61 = vpack.c.bf16 %v6313_v44, %v6313_v44  ;;  %v9641_v44 = vld [vmem:[#allocation7 + $0x690] ss:$8 sps:$4 sm:$0xff]  }
0x160a   : > { %v6322_v56 = vpack.c.bf16 %v6314_v45, %v6314_v45  ;;  %v6315_v58 = vmul.f32 %v6307_v62, %v6251_v49  ;;  %v9644_v45 = vld [vmem:[#allocation7 + $0x790] ss:$8 sps:$4 sm:$0xff]   ;;  %v9652_v62 = vld [vmem:[#allocation7 + $0x7a4] ss:$8 sps:$4 sm:$0xff]  }
0x160b   : > { %v6324_v51 = vpack.c.bf16 %v6316_v52, %v6316_v52 }
0x160c   : > { %7143 = vmatprep.mubr.bf16.mxu1 %v6322_v56  ;;  %v6323_v59 = vpack.c.bf16 %v6315_v58, %v6315_v58 }
0x160d   : > { %7184 = vmatprep.mubr.bf16.mxu0 %v6324_v51  ;;  %7144 = vmatmul.mubr.bf16.vlgmr.msra.gmra.mrb[68].mxu1 %v6321_v61 }
0x160e   : > { %7185 = vmatmul.mubr.bf16.vlgmr.msra.gmra.mrb[44].mxu0 %v6323_v59  ;;  %7194 = vmatpush1.bf16.msra.mxu1 %v9587_v57  ;;  %v9647_v59 = vld [vmem:[#allocation7 + $0x6a0] ss:$8 sps:$4 sm:$0xff]  }
0x160f   : > { %7235 = vmatpush1.bf16.msra.mxu0 %v9590_v6  ;;  %7195 = vmatprep.subr.bf16.mxu1 %v9595_v53 }
0x1610   : > { %7236 = vmatprep.subr.bf16.mxu0 %v9598_v14 }
0x1612   : > { %7196 = vmatpush1.bf16.msra.mxu1 %v9593_v3 }
0x1613   : > { %7237 = vmatpush1.bf16.msra.mxu0 %v9596_v13  ;;  %7197 = vmatprep.subr.bf16.mxu1 %v9601_v4  ;;  %v9650_v13 = vld [vmem:[#allocation7 + $0x7a0] ss:$8 sps:$4 sm:$0xff]   ;;  %v9655_v4 = vld [vmem:[#allocation7 + $0x6b4] ss:$8 sps:$4 sm:$0xff]  }
0x1614   : > { %7238 = vmatprep.subr.bf16.mxu0 %v9604_v5 }
0x1616   : > { %7198 = vmatpush1.bf16.msra.mxu1 %v9599_v9 }
0x1617   : > { %7239 = vmatpush1.bf16.msra.mxu0 %v9602_v46  ;;  %7199 = vmatprep.subr.bf16.mxu1 %v9607_v10  ;;  %v9658_v46 = vld [vmem:[#allocation7 + $0x7b4] ss:$8 sps:$4 sm:$0xff]  }
0x1618   : > { %7240 = vmatprep.subr.bf16.mxu0 %v9610_v11 }
0x161a   : > { %7200 = vmatpush1.bf16.msra.mxu1 %v9605_v12 }
0x161b   : > { %7241 = vmatpush1.bf16.msra.mxu0 %v9608_v54  ;;  %7201 = vmatprep.subr.bf16.mxu1 %v9613_v18  ;;  %v9653_v18 = vld [vmem:[#allocation7 + $0x6b0] ss:$8 sps:$4 sm:$0xff]  }
0x161c   : > { %7242 = vmatprep.subr.bf16.mxu0 %v9616_v1  ;;  %v9656_v1 = vld [vmem:[#allocation7 + $0x7b0] ss:$8 sps:$4 sm:$0xff]  }
0x161e   : > { %7202 = vmatpush1.bf16.msra.mxu1 %v9611_v19  ;;  %v9661_v19 = vld [vmem:[#allocation7 + $0x6c4] ss:$8 sps:$4 sm:$0xff]  }
0x161f   : > { %7243 = vmatpush1.bf16.msra.mxu0 %v9614_v55  ;;  %7203 = vmatprep.subr.bf16.mxu1 %v9619_v2 }
0x1620   : > { %7244 = vmatprep.subr.bf16.mxu0 %v9622_v22  ;;  %v9664_v22 = vld [vmem:[#allocation7 + $0x7c4] ss:$8 sps:$4 sm:$0xff]  }
0x1622   : > { %7204 = vmatpush1.bf16.msra.mxu1 %v9617_v0 }
0x1623   : > { %7245 = vmatpush1.bf16.msra.mxu0 %v9620_v48  ;;  %7205 = vmatprep.subr.bf16.mxu1 %v9625_v8 }
0x1624   : > { %7246 = vmatprep.subr.bf16.mxu0 %v9628_v35 }
0x1626   : > { %7206 = vmatpush1.bf16.msra.mxu1 %v9623_v23  ;;  %v9659_v23 = vld [vmem:[#allocation7 + $0x6c0] ss:$8 sps:$4 sm:$0xff]  }
0x1627   : > { %7247 = vmatpush1.bf16.msra.mxu0 %v9626_v24  ;;  %7207 = vmatprep.subr.bf16.mxu1 %v9631_v63  ;;  %v9662_v24 = vld [vmem:[#allocation7 + $0x7c0] ss:$8 sps:$4 sm:$0xff]   ;;  %v9667_v63 = vld [vmem:[#allocation7 + $0x6d4] ss:$8 sps:$4 sm:$0xff]  }
0x1628   : > { %7248 = vmatprep.subr.bf16.mxu0 %v9634_v7  ;;  %v9670_v7 = vld [vmem:[#allocation7 + $0x7d4] ss:$8 sps:$4 sm:$0xff]  }
0x162a   : > { %7208 = vmatpush1.bf16.msra.mxu1 %v9629_v25  ;;  %v9665_v25 = vld [vmem:[#allocation7 + $0x6d0] ss:$8 sps:$4 sm:$0xff]  }
0x162b   : > { %7249 = vmatpush1.bf16.msra.mxu0 %v9632_v26  ;;  %7209 = vmatprep.subr.bf16.mxu1 %v9637_v31  ;;  %v9668_v26 = vld [vmem:[#allocation7 + $0x7d0] ss:$8 sps:$4 sm:$0xff]   ;;  %v9673_v31 = vld [vmem:[#allocation7 + $0x6e4] ss:$8 sps:$4 sm:$0xff]  }
0x162c   : > { %7250 = vmatprep.subr.bf16.mxu0 %v9640_v33  ;;  %v9676_v33 = vld [vmem:[#allocation7 + $0x7e4] ss:$8 sps:$4 sm:$0xff]  }
0x162d   : > { %v6201_v40 = vpop.f32.mrb[64].mxu1  ;;  %v6242_v21 = vpop.f32.mrb[40].mxu0 }
0x162e   : > { %v10837_v41 = vadd.f32 %v6201_v40, %v5424_v30  ;;  %v10839_v42 = vadd.f32 %v6242_v21, %v5432_v36  ;;  %v6203_v32 = vpop.f32.mrb[65].mxu1  ;;  %v6244_v43 = vpop.f32.mrb[41].mxu0  ;;  %7210 = vmatpush1.bf16.msra.mxu1 %v9635_v37  ;;  %v9671_v30 = vld [vmem:[#allocation7 + $0x6e0] ss:$8 sps:$4 sm:$0xff]   ;;  %v9679_v37 = vld [vmem:[#allocation7 + $0x6f4] ss:$8 sps:$4 sm:$0xff]  }
0x162f   : > { %v10841_v49 = vadd.f32 %v6203_v32, %v5428_v29  ;;  %v10843_v50 = vadd.f32 %v6244_v43, %v5436_v38  ;;  %7251 = vmatpush1.bf16.msra.mxu0 %v9638_v28  ;;  %v6205_v15 = vpop.f32.mrb[66].mxu1  ;;  %v6246_v34 = vpop.f32.mrb[42].mxu0  ;;  %7211 = vmatprep.subr.bf16.mxu1 %v9643_v39  ;;  %v9674_v36 = vld [vmem:[#allocation7 + $0x7e0] ss:$8 sps:$4 sm:$0xff]   ;;  %v9682_v29 = vld [vmem:[#allocation7 + $0x7f4] ss:$8 sps:$4 sm:$0xff]  }
0x1630   : > { %v6261_v52 = vmul.f32 0.044715, %v10837_v41  ;;  %v6263_v56 = vmul.f32 0.044715, %v10839_v42  ;;  %v6206_v57 = vpop.f32.mrb[67].mxu1  ;;  %v6247_v58 = vpop.f32.mrb[43].mxu0  ;;  %7252 = vmatprep.subr.bf16.mxu0 %v9646_v27 }
0x1631   : > { %v6262_v51 = vmul.f32 0.044715, %v10841_v49  ;;  %v6264_v6 = vmul.f32 0.044715, %v10843_v50  ;;  %v6253_v39 = vmul.f32 0.5, %v10837_v41  ;;  %v6254_v32 = vmul.f32 0.5, %v10841_v49 }
0x1632   : > { %v6269_v61 = vmul.f32 %v6261_v52, %v10837_v41  ;;  %v6271_v53 = vmul.f32 %v6263_v56, %v10839_v42  ;;  %7212 = vmatpush1.bf16.msra.mxu1 %v9641_v44  ;;  %v9677_v21 = vld [vmem:[#allocation7 + $0x6f0] ss:$8 sps:$4 sm:$0xff]   ;;  %v6256_v15 = vmul.f32 0.5, %v10843_v50  ;;  %v6255_v52 = vmul.f32 0.5, %v10839_v42 }
0x1633   : > { %v6270_v14 = vmul.f32 %v6262_v51, %v10841_v49  ;;  %v6272_v3 = vmul.f32 %v6264_v6, %v10843_v50  ;;  %7253 = vmatpush1.bf16.msra.mxu0 %v9644_v45  ;;  %7213 = vmatprep.subr.bf16.mxu1 %v9649_v60  ;;  %v9680_v45 = vld [vmem:[#allocation7 + $0x7f0] ss:$8 sps:$4 sm:$0xff]  }
0x1634   : > { %v6277_v5 = vmul.f32 %v6269_v61, %v10837_v41  ;;  %v6279_v9 = vmul.f32 %v6271_v53, %v10839_v42  ;;  %7254 = vmatprep.subr.bf16.mxu0 %v9652_v62 }
0x1635   : > { %v6278_v10 = vmul.f32 %v6270_v14, %v10841_v49  ;;  %v6280_v11 = vmul.f32 %v6272_v3, %v10843_v50 }
0x1636   : > { %v6285_v12 = vadd.f32 %v6277_v5, %v10837_v41  ;;  %v6287_v54 = vadd.f32 %v6279_v9, %v10839_v42  ;;  %7214 = vmatpush1.bf16.msra.mxu1 %v9647_v59 }
0x1637   : > { %7255 = vmatpush1.bf16.msra.mxu0 %v9650_v13  ;;  %7215 = vmatprep.subr.bf16.mxu1 %v9655_v4  ;;  %v6286_v55 = vadd.f32 %v6278_v10, %v10841_v49  ;;  %v6288_v2 = vadd.f32 %v6280_v11, %v10843_v50  ;;  %v8558_v50 = vld [vmem:[%s10998_s13 + $0x2] sm:$0x3] }
0x1638   : > { %7256 = vmatprep.subr.bf16.mxu0 %v9658_v46  ;;  %v6293_v0 = vmul.f32 0.7978846, %v6285_v12  ;;  %v6295_v35 = vmul.f32 0.7978846, %v6287_v54  ;;  %v6464_v61 = vrot.slane %v8558_v50, %v10305_v17  ;;  %v6468_v42 = vrot.slane %v8558_v50, %v10302_v16  ;;  %v9719_v50 = vld [vmem:[#allocation8 + $0xc0] ss:$8 sps:$4 sm:$0xff]  }
0x1639   : > { %v6294_v48 = vmul.f32 0.7978846, %v6286_v55  ;;  %v6296_v8 = vmul.f32 0.7978846, %v6288_v2 }
0x163a   : > { %7216 = vmatpush1.bf16.msra.mxu1 %v9653_v18  ;;  %9795 = vtanh.f32 %v6293_v0 }
0x163b   : > { %7257 = vmatpush1.bf16.msra.mxu0 %v9656_v1  ;;  %7217 = vmatprep.subr.bf16.mxu1 %v9661_v19  ;;  %9797 = vtanh.f32 %v6294_v48 }
0x163c   : > { %7258 = vmatprep.subr.bf16.mxu0 %v9664_v22  ;;  %9799 = vtanh.f32 %v6296_v8 }
0x163d   : > { %9801 = vtanh.f32 %v6295_v35 }
0x163e   : > { %7218 = vmatpush1.bf16.msra.mxu1 %v9659_v23 }
0x163f   : > { %7259 = vmatpush1.bf16.msra.mxu0 %v9662_v24  ;;  %7219 = vmatprep.subr.bf16.mxu1 %v9667_v63 }
0x1640   : > { %7260 = vmatprep.subr.bf16.mxu0 %v9670_v7 }
0x1642   : > { %7220 = vmatpush1.bf16.msra.mxu1 %v9665_v25  ;;  %v9683_v25 = vld [vmem:[#allocation8] ss:$8 sps:$4 sm:$0xff]  }
0x1643   : > { %7261 = vmatpush1.bf16.msra.mxu0 %v9668_v26  ;;  %7221 = vmatprep.subr.bf16.mxu1 %v9673_v31  ;;  %v9685_v26 = vld [vmem:[#allocation8 + $0x4] ss:$8 sps:$4 sm:$0xff]   ;;  %v9688_v31 = vld [vmem:[#allocation8 + $0x14] ss:$8 sps:$4 sm:$0xff]  }
0x1644   : > { %v9796_v28 = vpop.eup %9795  ;;  %7262 = vmatprep.subr.bf16.mxu0 %v9676_v33  ;;  %v9686_v33 = vld [vmem:[#allocation8 + $0x10] ss:$8 sps:$4 sm:$0xff]  }
0x1645   : > { %v9798_v38 = vpop.eup %9797  ;;  %v6309_v27 = vadd.f32 1.0, %v9796_v28  ;;  %v9692_v28 = vld [vmem:[#allocation8 + $0x30] ss:$8 sps:$4 sm:$0xff]  }
0x1646   : > { %v9800_v40 = vpop.eup %9799  ;;  %7222 = vmatpush1.bf16.msra.mxu1 %v9671_v30  ;;  %v6310_v43 = vadd.f32 1.0, %v9798_v38  ;;  %v9691_v30 = vld [vmem:[#allocation8 + $0x24] ss:$8 sps:$4 sm:$0xff]   ;;  %v9698_v38 = vld [vmem:[#allocation8 + $0x50] ss:$8 sps:$4 sm:$0xff]  }
0x1647   : > { %v9802_v44 = vpop.eup %9801  ;;  %7263 = vmatpush1.bf16.msra.mxu0 %v9674_v36  ;;  %7223 = vmatprep.subr.bf16.mxu1 %v9679_v37  ;;  %v6312_v34 = vadd.f32 1.0, %v9800_v40  ;;  %v6317_v60 = vmul.f32 %v6309_v27, %v6253_v39  ;;  %v9689_v36 = vld [vmem:[#allocation8 + $0x20] ss:$8 sps:$4 sm:$0xff]   ;;  %v9694_v37 = vld [vmem:[#allocation8 + $0x34] ss:$8 sps:$4 sm:$0xff]  }
0x1648   : > { %7264 = vmatprep.subr.bf16.mxu0 %v9682_v29  ;;  %v6318_v62 = vmul.f32 %v6310_v43, %v6254_v32  ;;  %v6311_v41 = vadd.f32 1.0, %v9802_v44  ;;  %v9700_v29 = vld [vmem:[#allocation8 + $0x54] ss:$8 sps:$4 sm:$0xff]   ;;  %v9703_v39 = vld [vmem:[#allocation8 + $0x64] ss:$8 sps:$4 sm:$0xff]  }
0x1649   : > { %v6320_v56 = vmul.f32 %v6312_v34, %v6256_v15  ;;  %v6325_v51 = vpack.c.bf16 %v6317_v60, %v6317_v60  ;;  %v9701_v27 = vld [vmem:[#allocation8 + $0x60] ss:$8 sps:$4 sm:$0xff]   ;;  %v9706_v40 = vld [vmem:[#allocation8 + $0x74] ss:$8 sps:$4 sm:$0xff]   ;;  %v9709_v32 = vld [vmem:[#allocation8 + $0x84] ss:$8 sps:$4 sm:$0xff]  }
0x164a   : > { %7224 = vmatpush1.bf16.msra.mxu1 %v9677_v21  ;;  %v6326_v57 = vpack.c.bf16 %v6318_v62, %v6318_v62  ;;  %v6319_v58 = vmul.f32 %v6311_v41, %v6255_v52  ;;  %v9704_v21 = vld [vmem:[#allocation8 + $0x70] ss:$8 sps:$4 sm:$0xff]   ;;  %v9707_v43 = vld [vmem:[#allocation8 + $0x80] ss:$8 sps:$4 sm:$0xff]   ;;  %v9712_v44 = vld [vmem:[#allocation8 + $0x94] ss:$8 sps:$4 sm:$0xff]  }
0x164b   : > { %7265 = vmatpush1.bf16.msra.mxu0 %v9680_v45  ;;  %v6328_v49 = vpack.c.bf16 %v6320_v56, %v6320_v56  ;;  %7529 = vmatprep.subr.bf16.mxu1 %v9685_v26  ;;  %v9710_v45 = vld [vmem:[#allocation8 + $0x90] ss:$8 sps:$4 sm:$0xff]  }
0x164c   : > { %7225 = vmatprep.mubr.bf16.mxu1 %v6326_v57  ;;  %v6327_v6 = vpack.c.bf16 %v6319_v58, %v6319_v58  ;;  %v9715_v57 = vld [vmem:[#allocation8 + $0xa4] ss:$8 sps:$4 sm:$0xff]   ;;  %v9713_v58 = vld [vmem:[#allocation8 + $0xa0] ss:$8 sps:$4 sm:$0xff]  }
0x164d   : > { %7266 = vmatprep.mubr.bf16.mxu0 %v6328_v49  ;;  %7226 = vmatmul.mubr.bf16.vlgmr.msra.gmra.mrb[72].mxu1 %v6325_v51  ;;  %v9718_v49 = vld [vmem:[#allocation8 + $0xb4] ss:$8 sps:$4 sm:$0xff]   ;;  %v9716_v51 = vld [vmem:[#allocation8 + $0xb0] ss:$8 sps:$4 sm:$0xff]  }
0x164e   : > { %7267 = vmatmul.mubr.bf16.vlgmr.msra.gmra.mrb[48].mxu0 %v6327_v6  ;;  %7530 = vmatpush1.bf16.msra.mxu1 %v9683_v25  ;;  %v9721_v6 = vld [vmem:[#allocation8 + $0xc4] ss:$8 sps:$4 sm:$0xff]  }
0x164f   : > { %7531 = vmatprep.subr.bf16.mxu1 %v9688_v31 }
0x1652   : > { %7532 = vmatpush1.bf16.msra.mxu1 %v9686_v33  ;;  %v9739_v33 = vld [vmem:[%s11003_s18 + $0x60] sm:$0xff]  }
0x1653   : > { %7533 = vmatprep.subr.bf16.mxu1 %v9691_v30  ;;  %v9740_v30 = vld [vmem:[%s11003_s18 + $0x20] sm:$0xff]  }
0x1656   : > { %7534 = vmatpush1.bf16.msra.mxu1 %v9689_v36  ;;  %v9741_v36 = vld [vmem:[%s11003_s18 + $0x68] sm:$0xff]  }
0x1657   : > { %7535 = vmatprep.subr.bf16.mxu1 %v9694_v37  ;;  %v9742_v37 = vld [vmem:[%s11003_s18 + $0x28] sm:$0xff]  }
0x165a   : > { %7536 = vmatpush1.bf16.msra.mxu1 %v9692_v28  ;;  %v9743_v28 = vld [vmem:[%s11003_s18 + $0x70] sm:$0xff]  }
0x16e0   : > { %v7145_v53 = vpop.f32.mrb[68].mxu1 }
0x16e1   : > { %v7146_v59 = vadd.f32 %v7145_v53, %v6464_v61  ;;  %v7186_v14 = vpop.f32.mrb[44].mxu0  ;;  %v7147_v3 = vpop.f32.mrb[69].mxu1  ;;  %v9724_v61 = vld [vmem:[#allocation8 + $0xd4] ss:$8 sps:$4 sm:$0xff]   ;;  %v9727_v53 = vld [vmem:[#allocation8 + $0xe4] ss:$8 sps:$4 sm:$0xff]  }
0x16e2   : > { %v7148_v13 = vadd.f32 %v7147_v3, %v6468_v42  ;;  %v7188_v4 = vpop.f32.mrb[45].mxu0  ;;  %v7149_v5 = vpop.f32.mrb[70].mxu1  ;;  %v9722_v42 = vld [vmem:[#allocation8 + $0xd0] ss:$8 sps:$4 sm:$0xff]  }
0x16e3   : > { %v7187_v9 = vadd.f32 %v7186_v14, %v7146_v59  ;;  %v7190_v46 = vpop.f32.mrb[46].mxu0  ;;  %v7150_v10 = vpop.f32.mrb[71].mxu1  ;;  %v9725_v59 = vld [vmem:[#allocation8 + $0xe0] ss:$8 sps:$4 sm:$0xff]   ;;  %v9730_v14 = vld [vmem:[#allocation8 + $0xf4] ss:$8 sps:$4 sm:$0xff]  }
0x16e4   : > { %v7189_v11 = vadd.f32 %v7188_v4, %v7148_v13  ;;  %v7191_v12 = vpop.f32.mrb[47].mxu0  ;;  %v9728_v3 = vld [vmem:[#allocation8 + $0xf0] ss:$8 sps:$4 sm:$0xff]   ;;  %v9731_v13 = vld [vmem:[%s11003_s18 + $0x40] sm:$0xff]   ;;  %v9733_v5 = vld [vmem:[%s11003_s18 + $0x48] sm:$0xff]  }
0x16e5   : > { %v9732_v4 = vld [vmem:[%s11003_s18] sm:$0xff]   ;;  %8757 = vmatprep.subr.bf16.mxu0 %v9731_v13  ;;  %v9735_v46 = vld [vmem:[%s11003_s18 + $0x50] sm:$0xff]   ;;  %v9738_v12 = vld [vmem:[%s11003_s18 + $0x18] sm:$0xff]  }
0x16e6   : > { %8758 = vmatpush3.bf16.msra.mxu0 %v9732_v4  ;;  %v9736_v10 = vld [vmem:[%s11003_s18 + $0x10] sm:$0xff]  }
0x16e7   : > { %8759 = vmatprep.subr.bf16.mxu0 %v9733_v5 }
0x1720   : > { %v7227_v54 = vpop.f32.mrb[72].mxu1 }
0x1721   : > { %v7228_v18 = vadd.f32 %v7227_v54, %v7187_v9  ;;  %v7268_v1 = vpop.f32.mrb[48].mxu0  ;;  %v7229_v19 = vpop.f32.mrb[73].mxu1  ;;  %v9734_v9 = vld [vmem:[%s11003_s18 + $0x8] sm:$0xff]  }
0x1722   : > { %v7230_v55 = vadd.f32 %v7229_v19, %v7189_v11  ;;  %v7270_v2 = vpop.f32.mrb[49].mxu0  ;;  %v7231_v22 = vpop.f32.mrb[74].mxu1  ;;  %8760 = vmatpush3.bf16.msra.mxu0 %v9734_v9  ;;  %v9737_v11 = vld [vmem:[%s11003_s18 + $0x58] sm:$0xff]   ;;  %v8687_v19 = vld [vmem:[%s10999_s14 + $0x2] sm:$0x3] }
0x1723   : > { %v7269_v0 = vadd.f32 %v7268_v1, %v7228_v18  ;;  %v7272_v48 = vpop.f32.mrb[50].mxu0  ;;  %v7232_v8 = vpop.f32.mrb[75].mxu1  ;;  %8761 = vmatprep.subr.bf16.mxu0 %v9735_v46  ;;  %v7305_v22 = vrot.slane %v8687_v19, %v10302_v16 }
0x1724   : > { %v7271_v35 = vadd.f32 %v7270_v2, %v7230_v55  ;;  %v7273_v23 = vpop.f32.mrb[51].mxu0  ;;  %v8688_v55 = vld [vmem:[%s11000_s15 + $0x2] sm:$0x3]  ;;  %v7301_v2 = vrot.slane %v8687_v19, %v10305_v17 }
0x1725   : > { %v7275_v24 = vadd.f32 %v7269_v0, %v10802_v20  ;;  %v9697_v20 = vld [vmem:[#allocation8 + $0x44] ss:$8 sps:$4 sm:$0xff]   ;;  %v7318_v23 = vrot.slane %v8688_v55, %v10302_v16 }
0x1726   : > { %v7276_v63 = vadd.f32 %v7271_v35, %v10800_v47  ;;  %v9695_v47 = vld [vmem:[#allocation8 + $0x40] ss:$8 sps:$4 sm:$0xff]   ;;  %7537 = vmatprep.subr.bf16.mxu1 %v9697_v20  ;;  %8762 = vmatpush3.bf16.msra.mxu0 %v9736_v10  ;;  %v7314_v35 = vrot.slane %v8688_v55, %v10305_v17  ;;  %v9744_v20 = vld [vmem:[%s11003_s18 + $0x30] sm:$0xff]  }
0x1727   : > { %7538 = vmatpush1.bf16.msra.mxu1 %v9695_v47  ;;  %8763 = vmatprep.subr.bf16.mxu0 %v9737_v11  ;;  %v9745_v47 = vld [vmem:[%s11003_s18 + $0x78] sm:$0xff]  }
0x1728   : > { %v7281_v7 = vadd.f32 %v7276_v63, %v7275_v24  ;;  %7539 = vmatprep.subr.bf16.mxu1 %v9700_v29  ;;  %v9746_v29 = vld [vmem:[%s11003_s18 + $0x38] sm:$0xff]  }
0x172a   : > { %7282 = vadd.xlane.f32.xlu0 %v7281_v7  ;;  %8764 = vmatpush3.bf16.msra.mxu0 %v9738_v12 }
0x172b   : > { %7540 = vmatpush1.bf16.msra.mxu1 %v9698_v38  ;;  %8765 = vmatprep.subr.bf16.mxu0 %v9739_v33  ;;  %v7357_v38 = vld [vmem:[%s11055_s1] sm:$0x3]  ;;  %s9927_s1 = scalar_lea.vmem %s9926_s4, 32 }
0x172c   : > { %7541 = vmatprep.subr.bf16.mxu1 %v9703_v39  ;;  %v7522_v39 = vrot.slane %v7357_v38, %v10305_v17  ;;  %p9929_p11 = scmp.lt.s32.totalorder %s9927_s1, %s9921_s2 }
0x172e   : > { %8766 = vmatpush3.bf16.msra.mxu0 %v9740_v30  ;;  %p9930_p13 = por %p9929_p11, %p9928_p8 }
0x172f   : > { %7542 = vmatpush1.bf16.msra.mxu1 %v9701_v27  ;;  %8767 = vmatprep.subr.bf16.mxu0 %v9741_v36  ;;  %v7526_v27 = vrot.slane %v7357_v38, %v10302_v16  ;;  %v7606_v16 = vld [vmem:[%s11057_s23] sm:$0x1] }
0x1730   : > { %7543 = vmatprep.subr.bf16.mxu1 %v9706_v40  ;;  %p9931_p5 = pnand %p9930_p13, %p9924_p7 }
0x1732   : > { %8768 = vmatpush3.bf16.msra.mxu0 %v9742_v37 }
0x1733   : > { %7544 = vmatpush1.bf16.msra.mxu1 %v9704_v21  ;;  %8769 = vmatprep.subr.bf16.mxu0 %v9743_v28 }
0x1734   : > { %7545 = vmatprep.subr.bf16.mxu1 %v9709_v32 }
0x1736   : > { %8770 = vmatpush3.bf16.msra.mxu0 %v9744_v20 }
0x1737   : > { %7546 = vmatpush1.bf16.msra.mxu1 %v9707_v43  ;;  %8771 = vmatprep.subr.bf16.mxu0 %v9745_v47 }
0x1738   : > { %7547 = vmatprep.subr.bf16.mxu1 %v9712_v44 }
0x173a   : > { %8772 = vmatpush3.bf16.msra.mxu0 %v9746_v29 }
0x173b   : > { %7548 = vmatpush1.bf16.msra.mxu1 %v9710_v45 }
0x173c   : > { %7549 = vmatprep.subr.bf16.mxu1 %v9715_v57 }
0x173f   : > { %7550 = vmatpush1.bf16.msra.mxu1 %v9713_v58 }
0x1740   : > { %7551 = vmatprep.subr.bf16.mxu1 %v9718_v49 }
0x1743   : > { %7552 = vmatpush1.bf16.msra.mxu1 %v9716_v51 }
0x1744   : > { %7553 = vmatprep.subr.bf16.mxu1 %v9721_v6 }
0x1747   : > { %7554 = vmatpush1.bf16.msra.mxu1 %v9719_v50 }
0x1748   : > { %7555 = vmatprep.subr.bf16.mxu1 %v9724_v61 }
0x174b   : > { %7556 = vmatpush1.bf16.msra.mxu1 %v9722_v42 }
0x174c   : > { %7557 = vmatprep.subr.bf16.mxu1 %v9727_v53 }
0x174f   : > { %7558 = vmatpush1.bf16.msra.mxu1 %v9725_v59 }
0x1750   : > { %7559 = vmatprep.subr.bf16.mxu1 %v9730_v14 }
0x1753   : > { %7560 = vmatpush1.bf16.msra.mxu1 %v9728_v3 }
0x17b7   : > { %v7283_v15 = vpop.xlane.xlu0 %7282 }
0x17b8   : > { %v7284_v34 = vmul.f32 0.00390625, %v7283_v15 }
0x17ba   : > { %v7285_v60 = vsub.f32 %v7275_v24, %v7284_v34  ;;  %v7286_v62 = vsub.f32 %v7276_v63, %v7284_v34 }
0x17bc   : > { %v7287_v52 = vmul.f32 %v7285_v60, %v7285_v60  ;;  %v7288_v41 = vmul.f32 %v7286_v62, %v7286_v62 }
0x17be   : > { %v7289_v56 = vadd.f32 %v7288_v41, %v7287_v52 }
0x17c0   : > { %7290 = vadd.xlane.f32.xlu1 %v7289_v56 }
0x184d   : > { %v7291_v54 = vpop.xlane.xlu1 %7290 }
0x184e   : > { %v7292_v18 = vmul.f32 0.00390625, %v7291_v54 }
0x1850   : > { %v7293_v1 = vadd.f32 1e-12, %v7292_v18 }
0x1852   : > { %9803 = vrsqrt.f32 %v7293_v1 }
0x185c   : > { %v9804_v0 = vpop.eup %9803 }
0x185d   : > { %v7295_v48 = vmul.f32 %v9804_v0, %v7285_v60  ;;  %v7296_v8 = vmul.f32 %v9804_v0, %v7286_v62 }
0x185f   : > { %v7309_v24 = vmul.f32 %v7305_v22, %v7296_v8  ;;  %v7308_v63 = vmul.f32 %v7301_v2, %v7295_v48 }
0x1861   : > { %v7322_v7 = vadd.f32 %v7318_v23, %v7309_v24  ;;  %v7321_v25 = vadd.f32 %v7314_v35, %v7308_v63 }
0x1863   : > { %v7324_v26 = vpack.c.bf16 %v7322_v7, %v7322_v7  ;;  %v7323_v31 = vpack.c.bf16 %v7321_v25, %v7321_v25 }
0x1865   : > { %7561 = vmatprep.mubr.bf16.mxu1 %v7324_v26 }
0x1866   : > { %7562 = vmatmul.mubr.bf16.vlgmr.msra.gmra.mrb[76].mxu1 %v7323_v31 }
0x1939   : > { %v7563_v40 = vpop.f32.mrb[76].mxu1 }
0x193a   : > { %v7564_v21 = vadd.f32 %v7563_v40, %v7522_v39  ;;  %v7565_v32 = vpop.f32.mrb[77].mxu1 }
0x193b   : > { %v7566_v43 = vadd.f32 %v7565_v32, %v7526_v27  ;;  %v7567_v44 = vpop.f32.mrb[78].mxu1 }
0x193c   : > { %9805 = vtanh.f32 %v7564_v21  ;;  %v7568_v45 = vpop.f32.mrb[79].mxu1 }
0x193d   : > { %9807 = vtanh.f32 %v7566_v43 }
0x1946   : > { %v9806_v15 = vpop.eup %9805 }
0x1947   : > { %v9808_v34 = vpop.eup %9807  ;;  %v7572_v62 = vpack.c.bf16 %v9806_v15, %v9806_v15 }
0x1948   : > { %v7573_v60 = vpack.c.bf16 %v9808_v34, %v9808_v34 }
0x194a   : > { %7735 = vmatprep.mubr.bf16.mxu0 %v7573_v60 }
0x194b   : > { %7736 = vmatmul.mubr.bf16.vlgmr.msra.gmra.mrb[52].mxu0 %v7572_v62 }
0x1a1e   : > { %v8773_v17 = vpop.f32.mrb[52].mxu0 }
0x1a1f   : > { %v8774_v52 = vpop.f32.mrb[53].mxu0 }
0x1a20   : > { %v8775_v41 = vadd.f32 %v8774_v52, %v8773_v17  ;;  %v8776_v56 = vpop.f32.mrb[54].mxu0 }
0x1a21   : > { %v8777_v57 = vpop.f32.mrb[55].mxu0 }
0x1a22   : > { %v7738_v58 = vadd.f32 %v8775_v41, %v7606_v16 }
0x1a24   : > { %7744 = vst.msk [vmem:[%s691_s28] sm:$0x1] %vm7743_vm3, %v7738_v58 }
0x1a25   : > { %9934 = shalt.err (!%p9931_p5)
}
0x1a26   : > { %s9935_s24 = scalar_lea.hbm %s10943_s0, 16  ;;  %s9939_s26 = scalar_lea.hbm %s11059_s30, 32 }
0x1a27   : > { %p9936_p0 = scmp.ne.s32.totalorder %s10943_s0, %s9935_s24  ;;  %p9940_p10 = scmp.lt.u32.totalorder %s10943_s0, %s11059_s30 }
0x1a28   : > { %p9941_p12 = scmp.lt.u32.totalorder %s9939_s26, %s9935_s24  ;;  %p9943_p2 = scmp.lt.u32.totalorder %s9935_s24, %s10943_s0 }
0x1a29   : > { %p9937_p6 = pnand %p9936_p0, %p11060_p3 }
0x1a2a   : > { %p9942_p1 = por %p9941_p12, %p9940_p10 }
0x1a2b   : > { %p9938_p9 = pneg %p9937_p6 }
0x1a2c   : > { %p9944_p4 = por %p9943_p2, %p9942_p1 }
0x1a2e   : > { %p9945_p7 = pnand %p9944_p4, %p9938_p9 }
0x1a30   : > { %9948 = shalt.err (!%p9945_p7)
}
0x1a31   : > { %8843 = dma.vmem_to_hbm [thread:$0]  (%p11060_p3), %s10945_s10, 16, %s10943_s0, %s7746_s19  }
0x1a32 PF: > { %s11061_s28 = sld [smem:[#allocation18_spill]]  ;;  %s11062_s22 = sld [smem:[#allocation15_spill]] }
0x1a33   : > { %s11063_s25 = sld [smem:[#allocation22_spill]] }
0x1a38   : > { %p8870_p8 = scmp.ge.s32.totalorder %s11061_s28, 2  ;;  %s7770_s2 = sand.u32 1, %s11062_s22  }
0x1a39   : > { %p11064_p11 = scmp.ne.s32.totalorder %s11063_s25, 0  ;;  %s7771_s17 = scalar_lea.sflag [#allocation4], %s7770_s2 }
0x1a3b   : > { %p8859_p13 = pnand %p8870_p8, %p11064_p11 }
0x1a3d   : > { %9978 = dma.done.wait (!%p8859_p13), %s7771_s17, 16  }
0x1a3e   : > { %9980 = vsyncadd (!%p8859_p13), %s7771_s17, 4294967280  ;;  %s11065_s24 = sld [smem:[#allocation19_spill]]  ;;  %s11066_s1 = sld [smem:[#allocation16_spill]] }
0x1a3f   : > { %s11067_s22 = sld [smem:[#allocation17_spill]]  ;;  %s11068_s23 = sld [smem:[#allocation20_spill]] }
0x1a44   : > { %p33_p5 = scmp.ge.s32.totalorder %s11065_s24, 4  }
0x1a46   :  { %35 = sbr.rel (!%p33_p5) target bundleno = 16 (0x10), region = 167 }
0x1a4d   :  { %7775 = vsyncpa [#allocation3], 1 }
0x1a4e   :  { %7777 = vsyncpa [#allocation3 + $0x1], 1 }
0x1a4f   :  { %7778 = vsyncpa [#allocation6], 1 }
0x1a50   :  { %7779 = vsyncpa [#allocation9], 1 }
0x1a51   :  { %7780 = vsyncpa [#allocation4], 1 }
0x1a52   :  { %7782 = vsyncpa [#allocation4 + $0x1], 1 }

</bundles_post_ra>
